<compile_context>
chip_gen: v7x
topology: tpu7x:2x2x1
jax: 0.10.0
libtpu: 0.0.40
codegen_flags: <defaults>
</compile_context>

<pallas_src>
import functools

import jax
import jax.numpy as jnp
from jax import lax
from jax.experimental import pallas as pl
from jax.experimental.pallas import tpu as pltpu

_LANES = 128


def _round_up(n, m):
    return ((n + m - 1) // m) * m


def _block_kernel(x_ref, w1_ref, w2_ref, bias_ref, out_ref, *, img_h):
    # x_ref   : (1, H+4, W+2, C) bf16  whole padded image (2-row / 1-col zero
    #                                  halo); resident across the row-tile axis
    # w1_ref  : (3, 3*C, C)      bf16  conv1 weights * BN2 scale, per-kh chunks,
    #                                  K ordered (kw, cin)
    # w2_ref  : (3, 3*C, C)      bf16  conv2 weights * BN2 scale
    # bias_ref: (1, 1, C)        f32   folded BN2 bias (applied after both convs)
    # out_ref : (1, th, W, C)          one row tile of the output
    _, th, W, C = out_ref.shape
    t = pl.program_id(1)
    r0 = pl.multiple_of(t * th, th)            # first output row of this tile

    bias = bias_ref[...]                       # (1, 1, C) f32

    # Row window needed by the fused conv1->conv2 tile: output rows
    # [r0, r0+th) need y rows [r0-1, r0+th], which need padded-input rows
    # [r0, r0+th+4) of the 2-row-padded image.
    x_tile = x_ref[0, pl.ds(r0, th + 4), :, :]  # (th+4, W+2, C) bf16

    def conv3x3(src, w_ref, rows):
        # src: (rows+2, W+2, C) bf16; per-kh accumulation, K = 3*C per matmul.
        acc = None
        for kh in range(3):
            slab = src[kh:kh + rows]                              # (rows, W+2, C)
            patch = jnp.concatenate(
                [slab[:, kw:kw + W, :] for kw in range(3)], axis=-1)
            d = jnp.dot(patch.reshape(rows * W, 3 * C), w_ref[kh],
                        preferred_element_type=jnp.float32)
            acc = d if acc is None else acc + d
        return acc.reshape(rows, W, C)

    # conv1 (BN2 scale pre-folded into weights) + bias + ReLU on th+2 rows
    # (the 1-row halo of the intermediate activation needed by conv2).
    y = jnp.maximum(conv3x3(x_tile, w1_ref, th + 2) + bias, 0.0)

    # Rows of y that fall outside the image are conv2's zero padding.
    gidx = lax.broadcasted_iota(jnp.int32, (th + 2, C), 0) + r0
    valid = jnp.logical_and(gidx >= 1, gidx <= img_h).reshape(th + 2, 1, C)
    y = jnp.where(valid, y, 0.0).astype(jnp.bfloat16)

    # Re-pad W: zero columns folded into one dense concat (no masked stores).
    zcol = jnp.zeros((th + 2, 1, C), jnp.bfloat16)
    ypad = jnp.concatenate([zcol, y, zcol], axis=1)               # (th+2, W+2, C)

    # conv2 + bias + residual + ReLU, epilogue kept in NHWC tile shape.
    acc2 = conv3x3(ypad, w2_ref, th)                              # (th, W, C) f32
    # Identity recovered from the (bf16) padded-input tile: single HBM stream.
    # (Slightly quantized vs. the f32 PyTorch identity; pass a second f32
    #  stream if tighter accuracy is needed.)
    identity = x_tile[2:th + 2, 1:W + 1, :].astype(jnp.float32)
    out_ref[0] = jnp.maximum(acc2 + bias + identity, 0.0).astype(out_ref.dtype)


def _prep_weights(w_oihw, scale, cp):
    # (O, I, 3, 3) -> (3, 3*cp, cp): per-kh K chunks with (kw, cin) ordering,
    # BN2 scale folded in (f32), channels zero-padded to cp, cast once to bf16.
    o, i = w_oihw.shape[0], w_oihw.shape[1]
    w = jnp.transpose(w_oihw, (2, 3, 1, 0)).astype(jnp.float32)   # (3, 3, I, O)
    w = w * scale[None, None, None, :]
    w = jnp.pad(w, ((0, 0), (0, 0), (0, cp - i), (0, cp - o)))
    return w.reshape(3, 3 * cp, cp).astype(jnp.bfloat16)


def _run_block(xpad2, w1m, w2m, bias_p, *, th, img_h, out_w, cp, out_dtype,
               single_buffer_weights):
    n, hp2, wp = xpad2.shape[0], xpad2.shape[1], xpad2.shape[2]
    n_tiles = img_h // th
    out_bytes = jnp.dtype(out_dtype).itemsize

    w_kwargs = {}
    if single_buffer_weights:
        # Grid-invariant weights: single-buffer to save VMEM (v7x headroom).
        w_kwargs = dict(pipeline_mode=pl.Buffered(1))

    flops = int(2 * 2 * n * img_h * out_w * (9 * cp) * cp)        # two convs
    bytes_accessed = int(n * hp2 * wp * cp * 2                    # input (bf16)
                         + 2 * 9 * cp * cp * 2                    # weights
                         + cp * 4                                 # bias
                         + n * img_h * out_w * cp * out_bytes)    # output

    # VMEM budget from the actual per-step footprint (blocks + intermediates).
    est = (2 * hp2 * wp * cp * 2                                  # x block x2
           + (1 if single_buffer_weights else 2) * 2 * 9 * cp * cp * 2
           + 2 * th * out_w * cp * out_bytes                      # out block x2
           + (th + 4) * wp * cp * 2                               # x_tile value
           + 2 * (th + 2) * out_w * 3 * cp * 2                    # im2col patches
           + (th + 2) * out_w * cp * 4                            # conv1 f32 acc
           + (th + 2) * wp * cp * 2                               # ypad value
           + th * out_w * cp * 4)                                 # conv2 f32 acc
    try:
        vmem_cap = pltpu.get_tpu_info().vmem_capacity_bytes
    except Exception:
        vmem_cap = 64 * 1024 * 1024                               # v7x-safe default
    vmem_limit = int(min(max(2 * est, 32 * 1024 * 1024), int(0.75 * vmem_cap)))

    kernel = functools.partial(_block_kernel, img_h=img_h)
    return pl.pallas_call(
        kernel,
        out_shape=jax.ShapeDtypeStruct((n, img_h, out_w, cp), out_dtype),
        grid_spec=pltpu.PrefetchScalarGridSpec(
            num_scalar_prefetch=0,
            grid=(n, n_tiles),        # image x row-tile; both independent
            in_specs=[
                # Whole padded image: index_map ignores the row-tile axis, so
                # Pallas keeps the block resident (no re-DMA) across t.
                pl.BlockSpec((1, hp2, wp, cp), lambda i, t: (i, 0, 0, 0)),
                pl.BlockSpec((3, 3 * cp, cp), lambda i, t: (0, 0, 0), **w_kwargs),
                pl.BlockSpec((3, 3 * cp, cp), lambda i, t: (0, 0, 0), **w_kwargs),
                pl.BlockSpec((1, 1, cp), lambda i, t: (0, 0, 0)),
            ],
            out_specs=pl.BlockSpec((1, th, out_w, cp), lambda i, t: (i, t, 0, 0)),
        ),
        compiler_params=pltpu.CompilerParams(
            dimension_semantics=("parallel", "parallel"),
            vmem_limit_bytes=vmem_limit,
        ),
        cost_estimate=pl.CostEstimate(flops=flops, transcendentals=0,
                                      bytes_accessed=bytes_accessed),
    )(xpad2, w1m, w2m, bias_p)


def block_forward(x_nchw, w1_oihw, w2_oihw, gamma, beta, run_mean, run_var,
                  eps=1e-5, out_dtype=jnp.bfloat16, row_tile=8):
    """Forward pass of Block. x_nchw: (N, C, H, W) f32. Returns NCHW f32."""
    n, cin, h, w = x_nchw.shape
    cout = w1_oihw.shape[0]
    cp = _round_up(max(cin, cout), _LANES)        # lane-dense channel axis
    th = row_tile if (row_tile < h and h % row_tile == 0) else h
    # TODO(synk): handle a ragged last row tile (h % row_tile != 0) instead of
    # falling back to one whole-image tile.

    # NCHW -> NHWC, 2-row / 1-col zero halo, channel pad, bf16 for the MXU.
    # TODO(synk): in a real NHWC bf16 pipeline keep activations in this padded
    # layout between blocks; the transpose/pad/cast here and the transpose back
    # below are full extra HBM passes for an isolated call.
    x_nhwc = jnp.transpose(x_nchw, (0, 2, 3, 1))
    xpad2 = jnp.pad(x_nhwc, ((0, 0), (2, 2), (1, 1), (0, cp - cin))
                    ).astype(jnp.bfloat16)

    # Fold eval-mode BatchNorm2 (used after BOTH convs in the PyTorch forward;
    # batch_norm1 is never used) into the weights (scale) and a bias vector.
    scale = (gamma / jnp.sqrt(run_var + eps)).astype(jnp.float32)
    bias = (beta - run_mean * scale).astype(jnp.float32)
    w1m = _prep_weights(w1_oihw, scale, cp)
    w2m = _prep_weights(w2_oihw, scale, cp)
    bias_p = jnp.pad(bias, (0, cp - cout)).reshape(1, 1, cp)

    run = functools.partial(_run_block, th=th, img_h=h, out_w=w, cp=cp,
                            out_dtype=out_dtype)
    try:
        out_nhwc = run(xpad2, w1m, w2m, bias_p, single_buffer_weights=True)
        out_nhwc = jax.block_until_ready(out_nhwc)
    except Exception:
        # pl.Buffered(1) (single-buffered weights) rejected by this jax
        # version -> fall back to default double-buffered weight specs.
        out_nhwc = run(xpad2, w1m, w2m, bias_p, single_buffer_weights=False)

    # Drop channel padding, back to NCHW f32 (module's external dtype).
    return jnp.transpose(out_nhwc[..., :cout], (0, 3, 1, 2)).astype(jnp.float32)


def _reference(x_nchw, w1, w2, gamma, beta, mean, var, eps=1e-5):
    """Pure-JAX reference matching the PyTorch forward (eval-mode BN)."""
    def conv(x, wgt):
        return lax.conv_general_dilated(
            x, wgt, window_strides=(1, 1), padding=((1, 1), (1, 1)),
            dimension_numbers=("NCHW", "OIHW", "NCHW"))

    def bn2(x):
        s = gamma / jnp.sqrt(var + eps)
        b = beta - mean * s
        return x * s[None, :, None, None] + b[None, :, None, None]

    identity = x_nchw
    h = jax.nn.relu(bn2(conv(x_nchw, w1)))
    h = bn2(conv(h, w2))
    return jax.nn.relu(h + identity)


if __name__ == "__main__":
    # Small shapes consistent with Block(in=4, out=4, stride=1, no downsample).
    N, C, H, W = 2, 4, 16, 16
    key = jax.random.PRNGKey(0)
    kx, k1, k2, kg, kb, km, kv = jax.random.split(key, 7)

    x = jax.random.normal(kx, (N, C, H, W), dtype=jnp.float32)
    w1 = jax.random.normal(k1, (C, C, 3, 3), dtype=jnp.float32) * 0.1
    w2 = jax.random.normal(k2, (C, C, 3, 3), dtype=jnp.float32) * 0.1
    # batch_norm2 parameters / running stats (batch_norm1 exists in __init__
    # but is never used in forward(), so it is intentionally omitted).
    gamma = 1.0 + 0.1 * jax.random.normal(kg, (C,), dtype=jnp.float32)
    beta = 0.1 * jax.random.normal(kb, (C,), dtype=jnp.float32)
    run_mean = 0.1 * jax.random.normal(km, (C,), dtype=jnp.float32)
    run_var = jnp.abs(jax.random.normal(kv, (C,), dtype=jnp.float32)) + 0.5

    out = block_forward(x, w1, w2, gamma, beta, run_mean, run_var)
    out = jax.block_until_ready(out)

    ref = _reference(x, w1, w2, gamma, beta, run_mean, run_var)
    assert out.shape == (N, C, H, W)
    # bf16 matmul inputs / bf16 identity / bf16 output -> loosened tolerance
    # (all accumulation is f32).
    err = float(jnp.max(jnp.abs(out - ref)))
    assert jnp.allclose(out, ref, atol=1e-1, rtol=5e-2), err

    # TODO(synk): training-mode BatchNorm (batch statistics over N,H,W) would
    # need a cross-batch reduction pass; eval-mode running-stats BN is used here.
    print("KERNEL_OK")
</pallas_src>

<mosaic_0001>
module attributes {stable_mosaic.version = 11 : i64} {
  func.func @_block_kernel(%arg0: i32, %arg1: i32, %arg2: memref<1x20x18x128xbf16, #tpu.memory_space<vmem>>, %arg3: memref<3x384x128xbf16, #tpu.memory_space<vmem>>, %arg4: memref<3x384x128xbf16, #tpu.memory_space<vmem>>, %arg5: memref<1x1x128xf32, #tpu.memory_space<vmem>>, %arg6: memref<1x8x16x128xbf16, #tpu.memory_space<vmem>>) attributes {dimension_semantics = [#tpu.dimension_semantics<parallel>, #tpu.dimension_semantics<parallel>], iteration_bounds = array<i64: 2, 2>, scalar_prefetch = 0 : i64, scratch_operands = 0 : i64, tpu.core_type = #tpu.core_type<tc>, window_params = [{transform_indices = @transform_0, window_bounds = array<i64: 1, 20, 18, 128>}, {pipeline_mode = #tpu.pipeline_mode<synchronous>, transform_indices = @transform_1, window_bounds = array<i64: 3, 384, 128>}, {pipeline_mode = #tpu.pipeline_mode<synchronous>, transform_indices = @transform_2, window_bounds = array<i64: 3, 384, 128>}, {pipeline_mode = #tpu.pipeline_mode<synchronous>, transform_indices = @transform_3, window_bounds = array<i64: 1, 1, 128>}, {transform_indices = @transform_4, window_bounds = array<i64: 1, 8, 16, 128>}]} {
    %c8_i32 = arith.constant 8 : i32
    %0 = arith.muli %arg1, %c8_i32 : i32
    %1 = tpu.assume_multiple %0, 8 : i32
    %c0 = arith.constant 0 : index
    %c0_0 = arith.constant 0 : index
    %c0_1 = arith.constant 0 : index
    %2 = vector.load %arg5[%c0, %c0_0, %c0_1] : memref<1x1x128xf32, #tpu.memory_space<vmem>>, vector<1x1x128xf32>
    %c0_2 = arith.constant 0 : index
    %3 = arith.index_cast %1 : i32 to index
    %c0_3 = arith.constant 0 : index
    %c0_4 = arith.constant 0 : index
    %4 = vector.load %arg2[%c0_2, %3, %c0_3, %c0_4] : memref<1x20x18x128xbf16, #tpu.memory_space<vmem>>, vector<1x12x18x128xbf16>
    %5 = vector.shape_cast %4 : vector<1x12x18x128xbf16> to vector<12x18x128xbf16>
    %6 = vector.extract_strided_slice %5 {offsets = [0, 0, 0], sizes = [10, 18, 128], strides = [1, 1, 1]} : vector<12x18x128xbf16> to vector<10x18x128xbf16>
    %7 = vector.extract_strided_slice %6 {offsets = [0, 0, 0], sizes = [10, 16, 128], strides = [1, 1, 1]} : vector<10x18x128xbf16> to vector<10x16x128xbf16>
    %8 = vector.extract_strided_slice %6 {offsets = [0, 1, 0], sizes = [10, 16, 128], strides = [1, 1, 1]} : vector<10x18x128xbf16> to vector<10x16x128xbf16>
    %9 = vector.extract_strided_slice %6 {offsets = [0, 2, 0], sizes = [10, 16, 128], strides = [1, 1, 1]} : vector<10x18x128xbf16> to vector<10x16x128xbf16>
    %10 = tpu.concatenate %7, %8, %9 in 2 : vector<10x16x128xbf16>, vector<10x16x128xbf16>, vector<10x16x128xbf16> -> vector<10x16x384xbf16>
    %11 = vector.shape_cast %10 : vector<10x16x384xbf16> to vector<160x384xbf16>
    %c0_5 = arith.constant 0 : index
    %c0_6 = arith.constant 0 : index
    %c0_7 = arith.constant 0 : index
    %12 = vector.load %arg3[%c0_5, %c0_6, %c0_7] : memref<3x384x128xbf16, #tpu.memory_space<vmem>>, vector<1x384x128xbf16>
    %13 = vector.shape_cast %12 : vector<1x384x128xbf16> to vector<384x128xbf16>
    %cst = arith.constant dense<0.000000e+00> : vector<160x128xf32>
    %14 = tpu.matmul %11, %13, %cst {dimension_numbers = #tpu.dot_dimension_numbers<[1], [0], [0], [1], [0, 0, 1, 1], [], []>} : vector<160x384xbf16>, vector<384x128xbf16>, vector<160x128xf32> -> vector<160x128xf32>
    %15 = vector.extract_strided_slice %5 {offsets = [1, 0, 0], sizes = [10, 18, 128], strides = [1, 1, 1]} : vector<12x18x128xbf16> to vector<10x18x128xbf16>
    %16 = vector.extract_strided_slice %15 {offsets = [0, 0, 0], sizes = [10, 16, 128], strides = [1, 1, 1]} : vector<10x18x128xbf16> to vector<10x16x128xbf16>
    %17 = vector.extract_strided_slice %15 {offsets = [0, 1, 0], sizes = [10, 16, 128], strides = [1, 1, 1]} : vector<10x18x128xbf16> to vector<10x16x128xbf16>
    %18 = vector.extract_strided_slice %15 {offsets = [0, 2, 0], sizes = [10, 16, 128], strides = [1, 1, 1]} : vector<10x18x128xbf16> to vector<10x16x128xbf16>
    %19 = tpu.concatenate %16, %17, %18 in 2 : vector<10x16x128xbf16>, vector<10x16x128xbf16>, vector<10x16x128xbf16> -> vector<10x16x384xbf16>
    %20 = vector.shape_cast %19 : vector<10x16x384xbf16> to vector<160x384xbf16>
    %c1 = arith.constant 1 : index
    %c0_8 = arith.constant 0 : index
    %c0_9 = arith.constant 0 : index
    %21 = vector.load %arg3[%c1, %c0_8, %c0_9] : memref<3x384x128xbf16, #tpu.memory_space<vmem>>, vector<1x384x128xbf16>
    %22 = vector.shape_cast %21 : vector<1x384x128xbf16> to vector<384x128xbf16>
    %cst_10 = arith.constant dense<0.000000e+00> : vector<160x128xf32>
    %23 = tpu.matmul %20, %22, %cst_10 {dimension_numbers = #tpu.dot_dimension_numbers<[1], [0], [0], [1], [0, 0, 1, 1], [], []>} : vector<160x384xbf16>, vector<384x128xbf16>, vector<160x128xf32> -> vector<160x128xf32>
    %24 = arith.addf %14, %23 : vector<160x128xf32>
    %25 = vector.extract_strided_slice %5 {offsets = [2, 0, 0], sizes = [10, 18, 128], strides = [1, 1, 1]} : vector<12x18x128xbf16> to vector<10x18x128xbf16>
    %26 = vector.extract_strided_slice %25 {offsets = [0, 0, 0], sizes = [10, 16, 128], strides = [1, 1, 1]} : vector<10x18x128xbf16> to vector<10x16x128xbf16>
    %27 = vector.extract_strided_slice %25 {offsets = [0, 1, 0], sizes = [10, 16, 128], strides = [1, 1, 1]} : vector<10x18x128xbf16> to vector<10x16x128xbf16>
    %28 = vector.extract_strided_slice %25 {offsets = [0, 2, 0], sizes = [10, 16, 128], strides = [1, 1, 1]} : vector<10x18x128xbf16> to vector<10x16x128xbf16>
    %29 = tpu.concatenate %26, %27, %28 in 2 : vector<10x16x128xbf16>, vector<10x16x128xbf16>, vector<10x16x128xbf16> -> vector<10x16x384xbf16>
    %30 = vector.shape_cast %29 : vector<10x16x384xbf16> to vector<160x384xbf16>
    %c2 = arith.constant 2 : index
    %c0_11 = arith.constant 0 : index
    %c0_12 = arith.constant 0 : index
    %31 = vector.load %arg3[%c2, %c0_11, %c0_12] : memref<3x384x128xbf16, #tpu.memory_space<vmem>>, vector<1x384x128xbf16>
    %32 = vector.shape_cast %31 : vector<1x384x128xbf16> to vector<384x128xbf16>
    %cst_13 = arith.constant dense<0.000000e+00> : vector<160x128xf32>
    %33 = tpu.matmul %30, %32, %cst_13 {dimension_numbers = #tpu.dot_dimension_numbers<[1], [0], [0], [1], [0, 0, 1, 1], [], []>} : vector<160x384xbf16>, vector<384x128xbf16>, vector<160x128xf32> -> vector<160x128xf32>
    %34 = arith.addf %24, %33 : vector<160x128xf32>
    %35 = vector.shape_cast %34 : vector<160x128xf32> to vector<10x16x128xf32>
    %36 = vector.broadcast %2 : vector<1x1x128xf32> to vector<10x16x128xf32>
    %37 = arith.addf %35, %36 : vector<10x16x128xf32>
    %cst_14 = arith.constant 0.000000e+00 : f32
    %38 = vector.broadcast %cst_14 : f32 to vector<10x16x128xf32>
    %39 = arith.maximumf %37, %38 : vector<10x16x128xf32>
    %40 = tpu.iota {dimensions = array<i32: 0>} : vector<10x128xi32>
    %41 = vector.broadcast %1 : i32 to vector<10x128xi32>
    %42 = arith.addi %40, %41 : vector<10x128xi32>
    %c1_i32 = arith.constant 1 : i32
    %43 = vector.broadcast %c1_i32 : i32 to vector<10x128xi32>
    %44 = arith.cmpi sge, %42, %43 : vector<10x128xi32>
    %c16_i32 = arith.constant 16 : i32
    %45 = vector.broadcast %c16_i32 : i32 to vector<10x128xi32>
    %46 = arith.cmpi sle, %42, %45 : vector<10x128xi32>
    %47 = arith.andi %44, %46 : vector<10x128xi1>
    %48 = vector.shape_cast %47 : vector<10x128xi1> to vector<10x1x128xi1>
    %cst_15 = arith.constant 0.000000e+00 : f32
    %49 = vector.shape_cast %48 : vector<10x1x128xi1> to vector<10x1x128xi1>
    %50 = vector.broadcast %49 : vector<10x1x128xi1> to vector<10x16x128xi1>
    %51 = vector.broadcast %cst_15 : f32 to vector<10x16x128xf32>
    %52 = arith.select %50, %39, %51 : vector<10x16x128xi1>, vector<10x16x128xf32>
    %53 = arith.truncf %52 : vector<10x16x128xf32> to vector<10x16x128xbf16>
    %cst_16 = arith.constant 0.000000e+00 : bf16
    %54 = vector.broadcast %cst_16 : bf16 to vector<10x1x128xbf16>
    %55 = tpu.concatenate %54, %53, %54 in 1 : vector<10x1x128xbf16>, vector<10x16x128xbf16>, vector<10x1x128xbf16> -> vector<10x18x128xbf16>
    %56 = vector.extract_strided_slice %55 {offsets = [0, 0, 0], sizes = [8, 18, 128], strides = [1, 1, 1]} : vector<10x18x128xbf16> to vector<8x18x128xbf16>
    %57 = vector.extract_strided_slice %56 {offsets = [0, 0, 0], sizes = [8, 16, 128], strides = [1, 1, 1]} : vector<8x18x128xbf16> to vector<8x16x128xbf16>
    %58 = vector.extract_strided_slice %56 {offsets = [0, 1, 0], sizes = [8, 16, 128], strides = [1, 1, 1]} : vector<8x18x128xbf16> to vector<8x16x128xbf16>
    %59 = vector.extract_strided_slice %56 {offsets = [0, 2, 0], sizes = [8, 16, 128], strides = [1, 1, 1]} : vector<8x18x128xbf16> to vector<8x16x128xbf16>
    %60 = tpu.concatenate %57, %58, %59 in 2 : vector<8x16x128xbf16>, vector<8x16x128xbf16>, vector<8x16x128xbf16> -> vector<8x16x384xbf16>
    %61 = vector.shape_cast %60 : vector<8x16x384xbf16> to vector<128x384xbf16>
    %c0_17 = arith.constant 0 : index
    %c0_18 = arith.constant 0 : index
    %c0_19 = arith.constant 0 : index
    %62 = vector.load %arg4[%c0_17, %c0_18, %c0_19] : memref<3x384x128xbf16, #tpu.memory_space<vmem>>, vector<1x384x128xbf16>
    %63 = vector.shape_cast %62 : vector<1x384x128xbf16> to vector<384x128xbf16>
    %cst_20 = arith.constant dense<0.000000e+00> : vector<128x128xf32>
    %64 = tpu.matmul %61, %63, %cst_20 {dimension_numbers = #tpu.dot_dimension_numbers<[1], [0], [0], [1], [0, 0, 1, 1], [], []>} : vector<128x384xbf16>, vector<384x128xbf16>, vector<128x128xf32> -> vector<128x128xf32>
    %65 = vector.extract_strided_slice %55 {offsets = [1, 0, 0], sizes = [8, 18, 128], strides = [1, 1, 1]} : vector<10x18x128xbf16> to vector<8x18x128xbf16>
    %66 = vector.extract_strided_slice %65 {offsets = [0, 0, 0], sizes = [8, 16, 128], strides = [1, 1, 1]} : vector<8x18x128xbf16> to vector<8x16x128xbf16>
    %67 = vector.extract_strided_slice %65 {offsets = [0, 1, 0], sizes = [8, 16, 128], strides = [1, 1, 1]} : vector<8x18x128xbf16> to vector<8x16x128xbf16>
    %68 = vector.extract_strided_slice %65 {offsets = [0, 2, 0], sizes = [8, 16, 128], strides = [1, 1, 1]} : vector<8x18x128xbf16> to vector<8x16x128xbf16>
    %69 = tpu.concatenate %66, %67, %68 in 2 : vector<8x16x128xbf16>, vector<8x16x128xbf16>, vector<8x16x128xbf16> -> vector<8x16x384xbf16>
    %70 = vector.shape_cast %69 : vector<8x16x384xbf16> to vector<128x384xbf16>
    %c1_21 = arith.constant 1 : index
    %c0_22 = arith.constant 0 : index
    %c0_23 = arith.constant 0 : index
    %71 = vector.load %arg4[%c1_21, %c0_22, %c0_23] : memref<3x384x128xbf16, #tpu.memory_space<vmem>>, vector<1x384x128xbf16>
    %72 = vector.shape_cast %71 : vector<1x384x128xbf16> to vector<384x128xbf16>
    %cst_24 = arith.constant dense<0.000000e+00> : vector<128x128xf32>
    %73 = tpu.matmul %70, %72, %cst_24 {dimension_numbers = #tpu.dot_dimension_numbers<[1], [0], [0], [1], [0, 0, 1, 1], [], []>} : vector<128x384xbf16>, vector<384x128xbf16>, vector<128x128xf32> -> vector<128x128xf32>
    %74 = arith.addf %64, %73 : vector<128x128xf32>
    %75 = vector.extract_strided_slice %55 {offsets = [2, 0, 0], sizes = [8, 18, 128], strides = [1, 1, 1]} : vector<10x18x128xbf16> to vector<8x18x128xbf16>
    %76 = vector.extract_strided_slice %75 {offsets = [0, 0, 0], sizes = [8, 16, 128], strides = [1, 1, 1]} : vector<8x18x128xbf16> to vector<8x16x128xbf16>
    %77 = vector.extract_strided_slice %75 {offsets = [0, 1, 0], sizes = [8, 16, 128], strides = [1, 1, 1]} : vector<8x18x128xbf16> to vector<8x16x128xbf16>
    %78 = vector.extract_strided_slice %75 {offsets = [0, 2, 0], sizes = [8, 16, 128], strides = [1, 1, 1]} : vector<8x18x128xbf16> to vector<8x16x128xbf16>
    %79 = tpu.concatenate %76, %77, %78 in 2 : vector<8x16x128xbf16>, vector<8x16x128xbf16>, vector<8x16x128xbf16> -> vector<8x16x384xbf16>
    %80 = vector.shape_cast %79 : vector<8x16x384xbf16> to vector<128x384xbf16>
    %c2_25 = arith.constant 2 : index
    %c0_26 = arith.constant 0 : index
    %c0_27 = arith.constant 0 : index
    %81 = vector.load %arg4[%c2_25, %c0_26, %c0_27] : memref<3x384x128xbf16, #tpu.memory_space<vmem>>, vector<1x384x128xbf16>
    %82 = vector.shape_cast %81 : vector<1x384x128xbf16> to vector<384x128xbf16>
    %cst_28 = arith.constant dense<0.000000e+00> : vector<128x128xf32>
    %83 = tpu.matmul %80, %82, %cst_28 {dimension_numbers = #tpu.dot_dimension_numbers<[1], [0], [0], [1], [0, 0, 1, 1], [], []>} : vector<128x384xbf16>, vector<384x128xbf16>, vector<128x128xf32> -> vector<128x128xf32>
    %84 = arith.addf %74, %83 : vector<128x128xf32>
    %85 = vector.shape_cast %84 : vector<128x128xf32> to vector<8x16x128xf32>
    %86 = vector.extract_strided_slice %5 {offsets = [2, 1, 0], sizes = [8, 16, 128], strides = [1, 1, 1]} : vector<12x18x128xbf16> to vector<8x16x128xbf16>
    %87 = arith.extf %86 : vector<8x16x128xbf16> to vector<8x16x128xf32>
    %88 = vector.broadcast %2 : vector<1x1x128xf32> to vector<8x16x128xf32>
    %89 = arith.addf %85, %88 : vector<8x16x128xf32>
    %90 = arith.addf %89, %87 : vector<8x16x128xf32>
    %cst_29 = arith.constant 0.000000e+00 : f32
    %91 = vector.broadcast %cst_29 : f32 to vector<8x16x128xf32>
    %92 = arith.maximumf %90, %91 : vector<8x16x128xf32>
    %93 = arith.truncf %92 : vector<8x16x128xf32> to vector<8x16x128xbf16>
    %c0_30 = arith.constant 0 : index
    %c0_31 = arith.constant 0 : index
    %c0_32 = arith.constant 0 : index
    %c0_33 = arith.constant 0 : index
    %94 = vector.load %arg6[%c0_30, %c0_31, %c0_32, %c0_33] : memref<1x8x16x128xbf16, #tpu.memory_space<vmem>>, vector<1x8x16x128xbf16>
    %95 = vector.shape_cast %94 : vector<1x8x16x128xbf16> to vector<8x16x128xbf16>
    %96 = vector.shape_cast %93 : vector<8x16x128xbf16> to vector<1x8x16x128xbf16>
    tpu.vector_store %arg6[%c0_30, %c0_31, %c0_32, %c0_33], %96 {strides = array<i32>} : memref<1x8x16x128xbf16, #tpu.memory_space<vmem>>, vector<1x8x16x128xbf16>,
    return
  }
  func.func @transform_0(%arg0: i32, %arg1: i32) -> (i32, i32, i32, i32) {
    %c0_i32 = arith.constant 0 : i32
    %c0_i32_0 = arith.constant 0 : i32
    %c0_i32_1 = arith.constant 0 : i32
    %c0_i32_2 = arith.constant 0 : i32
    return %arg0, %c0_i32, %c0_i32_0, %c0_i32_1 : i32, i32, i32, i32
  }
  func.func @transform_1(%arg0: i32, %arg1: i32) -> (i32, i32, i32) {
    %c0_i32 = arith.constant 0 : i32
    %c0_i32_0 = arith.constant 0 : i32
    %c0_i32_1 = arith.constant 0 : i32
    %c0_i32_2 = arith.constant 0 : i32
    return %c0_i32, %c0_i32_0, %c0_i32_1 : i32, i32, i32
  }
  func.func @transform_2(%arg0: i32, %arg1: i32) -> (i32, i32, i32) {
    %c0_i32 = arith.constant 0 : i32
    %c0_i32_0 = arith.constant 0 : i32
    %c0_i32_1 = arith.constant 0 : i32
    %c0_i32_2 = arith.constant 0 : i32
    return %c0_i32, %c0_i32_0, %c0_i32_1 : i32, i32, i32
  }
  func.func @transform_3(%arg0: i32, %arg1: i32) -> (i32, i32, i32) {
    %c0_i32 = arith.constant 0 : i32
    %c0_i32_0 = arith.constant 0 : i32
    %c0_i32_1 = arith.constant 0 : i32
    %c0_i32_2 = arith.constant 0 : i32
    return %c0_i32, %c0_i32_0, %c0_i32_1 : i32, i32, i32
  }
  func.func @transform_4(%arg0: i32, %arg1: i32) -> (i32, i32, i32, i32) {
    %c0_i32 = arith.constant 0 : i32
    %c0_i32_0 = arith.constant 0 : i32
    %c0_i32_1 = arith.constant 0 : i32
    return %arg0, %arg1, %c0_i32, %c0_i32_0 : i32, i32, i32, i32
  }
}

module attributes {stable_mosaic.version = 11 : i64} {
  func.func @_block_kernel(%arg0: i32, %arg1: i32, %arg2: memref<1x20x18x128xbf16, #tpu.memory_space<vmem>>, %arg3: memref<3x384x128xbf16, #tpu.memory_space<vmem>>, %arg4: memref<3x384x128xbf16, #tpu.memory_space<vmem>>, %arg5: memref<1x1x128xf32, #tpu.memory_space<vmem>>, %arg6: memref<1x8x16x128xbf16, #tpu.memory_space<vmem>>) attributes {dimension_semantics = [#tpu.dimension_semantics<parallel>, #tpu.dimension_semantics<parallel>], iteration_bounds = array<i64: 2, 2>, scalar_prefetch = 0 : i64, scratch_operands = 0 : i64, tpu.core_type = #tpu.core_type<tc>, window_params = [{transform_indices = @transform_0, window_bounds = array<i64: 1, 20, 18, 128>}, {pipeline_mode = #tpu.pipeline_mode<synchronous>, transform_indices = @transform_1, window_bounds = array<i64: 3, 384, 128>}, {pipeline_mode = #tpu.pipeline_mode<synchronous>, transform_indices = @transform_2, window_bounds = array<i64: 3, 384, 128>}, {pipeline_mode = #tpu.pipeline_mode<synchronous>, transform_indices = @transform_3, window_bounds = array<i64: 1, 1, 128>}, {transform_indices = @transform_4, window_bounds = array<i64: 1, 8, 16, 128>}]} {
    %c8_i32 = arith.constant 8 : i32
    %0 = arith.muli %arg1, %c8_i32 : i32
    %1 = tpu.assume_multiple %0, 8 : i32
    %c0 = arith.constant 0 : index
    %c0_0 = arith.constant 0 : index
    %c0_1 = arith.constant 0 : index
    %2 = vector.load %arg5[%c0, %c0_0, %c0_1] : memref<1x1x128xf32, #tpu.memory_space<vmem>>, vector<1x1x128xf32>
    %c0_2 = arith.constant 0 : index
    %3 = arith.index_cast %1 : i32 to index
    %c0_3 = arith.constant 0 : index
    %c0_4 = arith.constant 0 : index
    %4 = vector.load %arg2[%c0_2, %3, %c0_3, %c0_4] : memref<1x20x18x128xbf16, #tpu.memory_space<vmem>>, vector<1x12x18x128xbf16>
    %5 = vector.shape_cast %4 : vector<1x12x18x128xbf16> to vector<12x18x128xbf16>
    %6 = vector.extract_strided_slice %5 {offsets = [0, 0, 0], sizes = [10, 18, 128], strides = [1, 1, 1]} : vector<12x18x128xbf16> to vector<10x18x128xbf16>
    %7 = vector.extract_strided_slice %6 {offsets = [0, 0, 0], sizes = [10, 16, 128], strides = [1, 1, 1]} : vector<10x18x128xbf16> to vector<10x16x128xbf16>
    %8 = vector.extract_strided_slice %6 {offsets = [0, 1, 0], sizes = [10, 16, 128], strides = [1, 1, 1]} : vector<10x18x128xbf16> to vector<10x16x128xbf16>
    %9 = vector.extract_strided_slice %6 {offsets = [0, 2, 0], sizes = [10, 16, 128], strides = [1, 1, 1]} : vector<10x18x128xbf16> to vector<10x16x128xbf16>
    %10 = tpu.concatenate %7, %8, %9 in 2 : vector<10x16x128xbf16>, vector<10x16x128xbf16>, vector<10x16x128xbf16> -> vector<10x16x384xbf16>
    %11 = vector.shape_cast %10 : vector<10x16x384xbf16> to vector<160x384xbf16>
    %c0_5 = arith.constant 0 : index
    %c0_6 = arith.constant 0 : index
    %c0_7 = arith.constant 0 : index
    %12 = vector.load %arg3[%c0_5, %c0_6, %c0_7] : memref<3x384x128xbf16, #tpu.memory_space<vmem>>, vector<1x384x128xbf16>
    %13 = vector.shape_cast %12 : vector<1x384x128xbf16> to vector<384x128xbf16>
    %cst = arith.constant dense<0.000000e+00> : vector<160x128xf32>
    %14 = tpu.matmul %11, %13, %cst {dimension_numbers = #tpu.dot_dimension_numbers<[1], [0], [0], [1], [0, 0, 1, 1], [], []>} : vector<160x384xbf16>, vector<384x128xbf16>, vector<160x128xf32> -> vector<160x128xf32>
    %15 = vector.extract_strided_slice %5 {offsets = [1, 0, 0], sizes = [10, 18, 128], strides = [1, 1, 1]} : vector<12x18x128xbf16> to vector<10x18x128xbf16>
    %16 = vector.extract_strided_slice %15 {offsets = [0, 0, 0], sizes = [10, 16, 128], strides = [1, 1, 1]} : vector<10x18x128xbf16> to vector<10x16x128xbf16>
    %17 = vector.extract_strided_slice %15 {offsets = [0, 1, 0], sizes = [10, 16, 128], strides = [1, 1, 1]} : vector<10x18x128xbf16> to vector<10x16x128xbf16>
    %18 = vector.extract_strided_slice %15 {offsets = [0, 2, 0], sizes = [10, 16, 128], strides = [1, 1, 1]} : vector<10x18x128xbf16> to vector<10x16x128xbf16>
    %19 = tpu.concatenate %16, %17, %18 in 2 : vector<10x16x128xbf16>, vector<10x16x128xbf16>, vector<10x16x128xbf16> -> vector<10x16x384xbf16>
    %20 = vector.shape_cast %19 : vector<10x16x384xbf16> to vector<160x384xbf16>
    %c1 = arith.constant 1 : index
    %c0_8 = arith.constant 0 : index
    %c0_9 = arith.constant 0 : index
    %21 = vector.load %arg3[%c1, %c0_8, %c0_9] : memref<3x384x128xbf16, #tpu.memory_space<vmem>>, vector<1x384x128xbf16>
    %22 = vector.shape_cast %21 : vector<1x384x128xbf16> to vector<384x128xbf16>
    %cst_10 = arith.constant dense<0.000000e+00> : vector<160x128xf32>
    %23 = tpu.matmul %20, %22, %cst_10 {dimension_numbers = #tpu.dot_dimension_numbers<[1], [0], [0], [1], [0, 0, 1, 1], [], []>} : vector<160x384xbf16>, vector<384x128xbf16>, vector<160x128xf32> -> vector<160x128xf32>
    %24 = arith.addf %14, %23 : vector<160x128xf32>
    %25 = vector.extract_strided_slice %5 {offsets = [2, 0, 0], sizes = [10, 18, 128], strides = [1, 1, 1]} : vector<12x18x128xbf16> to vector<10x18x128xbf16>
    %26 = vector.extract_strided_slice %25 {offsets = [0, 0, 0], sizes = [10, 16, 128], strides = [1, 1, 1]} : vector<10x18x128xbf16> to vector<10x16x128xbf16>
    %27 = vector.extract_strided_slice %25 {offsets = [0, 1, 0], sizes = [10, 16, 128], strides = [1, 1, 1]} : vector<10x18x128xbf16> to vector<10x16x128xbf16>
    %28 = vector.extract_strided_slice %25 {offsets = [0, 2, 0], sizes = [10, 16, 128], strides = [1, 1, 1]} : vector<10x18x128xbf16> to vector<10x16x128xbf16>
    %29 = tpu.concatenate %26, %27, %28 in 2 : vector<10x16x128xbf16>, vector<10x16x128xbf16>, vector<10x16x128xbf16> -> vector<10x16x384xbf16>
    %30 = vector.shape_cast %29 : vector<10x16x384xbf16> to vector<160x384xbf16>
    %c2 = arith.constant 2 : index
    %c0_11 = arith.constant 0 : index
    %c0_12 = arith.constant 0 : index
    %31 = vector.load %arg3[%c2, %c0_11, %c0_12] : memref<3x384x128xbf16, #tpu.memory_space<vmem>>, vector<1x384x128xbf16>
    %32 = vector.shape_cast %31 : vector<1x384x128xbf16> to vector<384x128xbf16>
    %cst_13 = arith.constant dense<0.000000e+00> : vector<160x128xf32>
    %33 = tpu.matmul %30, %32, %cst_13 {dimension_numbers = #tpu.dot_dimension_numbers<[1], [0], [0], [1], [0, 0, 1, 1], [], []>} : vector<160x384xbf16>, vector<384x128xbf16>, vector<160x128xf32> -> vector<160x128xf32>
    %34 = arith.addf %24, %33 : vector<160x128xf32>
    %35 = vector.shape_cast %34 : vector<160x128xf32> to vector<10x16x128xf32>
    %36 = vector.broadcast %2 : vector<1x1x128xf32> to vector<10x16x128xf32>
    %37 = arith.addf %35, %36 : vector<10x16x128xf32>
    %cst_14 = arith.constant 0.000000e+00 : f32
    %38 = vector.broadcast %cst_14 : f32 to vector<10x16x128xf32>
    %39 = arith.maximumf %37, %38 : vector<10x16x128xf32>
    %40 = tpu.iota {dimensions = array<i32: 0>} : vector<10x128xi32>
    %41 = vector.broadcast %1 : i32 to vector<10x128xi32>
    %42 = arith.addi %40, %41 : vector<10x128xi32>
    %c1_i32 = arith.constant 1 : i32
    %43 = vector.broadcast %c1_i32 : i32 to vector<10x128xi32>
    %44 = arith.cmpi sge, %42, %43 : vector<10x128xi32>
    %c16_i32 = arith.constant 16 : i32
    %45 = vector.broadcast %c16_i32 : i32 to vector<10x128xi32>
    %46 = arith.cmpi sle, %42, %45 : vector<10x128xi32>
    %47 = arith.andi %44, %46 : vector<10x128xi1>
    %48 = vector.shape_cast %47 : vector<10x128xi1> to vector<10x1x128xi1>
    %cst_15 = arith.constant 0.000000e+00 : f32
    %49 = vector.shape_cast %48 : vector<10x1x128xi1> to vector<10x1x128xi1>
    %50 = vector.broadcast %49 : vector<10x1x128xi1> to vector<10x16x128xi1>
    %51 = vector.broadcast %cst_15 : f32 to vector<10x16x128xf32>
    %52 = arith.select %50, %39, %51 : vector<10x16x128xi1>, vector<10x16x128xf32>
    %53 = arith.truncf %52 : vector<10x16x128xf32> to vector<10x16x128xbf16>
    %cst_16 = arith.constant 0.000000e+00 : bf16
    %54 = vector.broadcast %cst_16 : bf16 to vector<10x1x128xbf16>
    %55 = tpu.concatenate %54, %53, %54 in 1 : vector<10x1x128xbf16>, vector<10x16x128xbf16>, vector<10x1x128xbf16> -> vector<10x18x128xbf16>
    %56 = vector.extract_strided_slice %55 {offsets = [0, 0, 0], sizes = [8, 18, 128], strides = [1, 1, 1]} : vector<10x18x128xbf16> to vector<8x18x128xbf16>
    %57 = vector.extract_strided_slice %56 {offsets = [0, 0, 0], sizes = [8, 16, 128], strides = [1, 1, 1]} : vector<8x18x128xbf16> to vector<8x16x128xbf16>
    %58 = vector.extract_strided_slice %56 {offsets = [0, 1, 0], sizes = [8, 16, 128], strides = [1, 1, 1]} : vector<8x18x128xbf16> to vector<8x16x128xbf16>
    %59 = vector.extract_strided_slice %56 {offsets = [0, 2, 0], sizes = [8, 16, 128], strides = [1, 1, 1]} : vector<8x18x128xbf16> to vector<8x16x128xbf16>
    %60 = tpu.concatenate %57, %58, %59 in 2 : vector<8x16x128xbf16>, vector<8x16x128xbf16>, vector<8x16x128xbf16> -> vector<8x16x384xbf16>
    %61 = vector.shape_cast %60 : vector<8x16x384xbf16> to vector<128x384xbf16>
    %c0_17 = arith.constant 0 : index
    %c0_18 = arith.constant 0 : index
    %c0_19 = arith.constant 0 : index
    %62 = vector.load %arg4[%c0_17, %c0_18, %c0_19] : memref<3x384x128xbf16, #tpu.memory_space<vmem>>, vector<1x384x128xbf16>
    %63 = vector.shape_cast %62 : vector<1x384x128xbf16> to vector<384x128xbf16>
    %cst_20 = arith.constant dense<0.000000e+00> : vector<128x128xf32>
    %64 = tpu.matmul %61, %63, %cst_20 {dimension_numbers = #tpu.dot_dimension_numbers<[1], [0], [0], [1], [0, 0, 1, 1], [], []>} : vector<128x384xbf16>, vector<384x128xbf16>, vector<128x128xf32> -> vector<128x128xf32>
    %65 = vector.extract_strided_slice %55 {offsets = [1, 0, 0], sizes = [8, 18, 128], strides = [1, 1, 1]} : vector<10x18x128xbf16> to vector<8x18x128xbf16>
    %66 = vector.extract_strided_slice %65 {offsets = [0, 0, 0], sizes = [8, 16, 128], strides = [1, 1, 1]} : vector<8x18x128xbf16> to vector<8x16x128xbf16>
    %67 = vector.extract_strided_slice %65 {offsets = [0, 1, 0], sizes = [8, 16, 128], strides = [1, 1, 1]} : vector<8x18x128xbf16> to vector<8x16x128xbf16>
    %68 = vector.extract_strided_slice %65 {offsets = [0, 2, 0], sizes = [8, 16, 128], strides = [1, 1, 1]} : vector<8x18x128xbf16> to vector<8x16x128xbf16>
    %69 = tpu.concatenate %66, %67, %68 in 2 : vector<8x16x128xbf16>, vector<8x16x128xbf16>, vector<8x16x128xbf16> -> vector<8x16x384xbf16>
    %70 = vector.shape_cast %69 : vector<8x16x384xbf16> to vector<128x384xbf16>
    %c1_21 = arith.constant 1 : index
    %c0_22 = arith.constant 0 : index
    %c0_23 = arith.constant 0 : index
    %71 = vector.load %arg4[%c1_21, %c0_22, %c0_23] : memref<3x384x128xbf16, #tpu.memory_space<vmem>>, vector<1x384x128xbf16>
    %72 = vector.shape_cast %71 : vector<1x384x128xbf16> to vector<384x128xbf16>
    %cst_24 = arith.constant dense<0.000000e+00> : vector<128x128xf32>
    %73 = tpu.matmul %70, %72, %cst_24 {dimension_numbers = #tpu.dot_dimension_numbers<[1], [0], [0], [1], [0, 0, 1, 1], [], []>} : vector<128x384xbf16>, vector<384x128xbf16>, vector<128x128xf32> -> vector<128x128xf32>
    %74 = arith.addf %64, %73 : vector<128x128xf32>
    %75 = vector.extract_strided_slice %55 {offsets = [2, 0, 0], sizes = [8, 18, 128], strides = [1, 1, 1]} : vector<10x18x128xbf16> to vector<8x18x128xbf16>
    %76 = vector.extract_strided_slice %75 {offsets = [0, 0, 0], sizes = [8, 16, 128], strides = [1, 1, 1]} : vector<8x18x128xbf16> to vector<8x16x128xbf16>
    %77 = vector.extract_strided_slice %75 {offsets = [0, 1, 0], sizes = [8, 16, 128], strides = [1, 1, 1]} : vector<8x18x128xbf16> to vector<8x16x128xbf16>
    %78 = vector.extract_strided_slice %75 {offsets = [0, 2, 0], sizes = [8, 16, 128], strides = [1, 1, 1]} : vector<8x18x128xbf16> to vector<8x16x128xbf16>
    %79 = tpu.concatenate %76, %77, %78 in 2 : vector<8x16x128xbf16>, vector<8x16x128xbf16>, vector<8x16x128xbf16> -> vector<8x16x384xbf16>
    %80 = vector.shape_cast %79 : vector<8x16x384xbf16> to vector<128x384xbf16>
    %c2_25 = arith.constant 2 : index
    %c0_26 = arith.constant 0 : index
    %c0_27 = arith.constant 0 : index
    %81 = vector.load %arg4[%c2_25, %c0_26, %c0_27] : memref<3x384x128xbf16, #tpu.memory_space<vmem>>, vector<1x384x128xbf16>
    %82 = vector.shape_cast %81 : vector<1x384x128xbf16> to vector<384x128xbf16>
    %cst_28 = arith.constant dense<0.000000e+00> : vector<128x128xf32>
    %83 = tpu.matmul %80, %82, %cst_28 {dimension_numbers = #tpu.dot_dimension_numbers<[1], [0], [0], [1], [0, 0, 1, 1], [], []>} : vector<128x384xbf16>, vector<384x128xbf16>, vector<128x128xf32> -> vector<128x128xf32>
    %84 = arith.addf %74, %83 : vector<128x128xf32>
    %85 = vector.shape_cast %84 : vector<128x128xf32> to vector<8x16x128xf32>
    %86 = vector.extract_strided_slice %5 {offsets = [2, 1, 0], sizes = [8, 16, 128], strides = [1, 1, 1]} : vector<12x18x128xbf16> to vector<8x16x128xbf16>
    %87 = arith.extf %86 : vector<8x16x128xbf16> to vector<8x16x128xf32>
    %88 = vector.broadcast %2 : vector<1x1x128xf32> to vector<8x16x128xf32>
    %89 = arith.addf %85, %88 : vector<8x16x128xf32>
    %90 = arith.addf %89, %87 : vector<8x16x128xf32>
    %cst_29 = arith.constant 0.000000e+00 : f32
    %91 = vector.broadcast %cst_29 : f32 to vector<8x16x128xf32>
    %92 = arith.maximumf %90, %91 : vector<8x16x128xf32>
    %93 = arith.truncf %92 : vector<8x16x128xf32> to vector<8x16x128xbf16>
    %c0_30 = arith.constant 0 : index
    %c0_31 = arith.constant 0 : index
    %c0_32 = arith.constant 0 : index
    %c0_33 = arith.constant 0 : index
    %94 = vector.load %arg6[%c0_30, %c0_31, %c0_32, %c0_33] : memref<1x8x16x128xbf16, #tpu.memory_space<vmem>>, vector<1x8x16x128xbf16>
    %95 = vector.shape_cast %94 : vector<1x8x16x128xbf16> to vector<8x16x128xbf16>
    %96 = vector.shape_cast %93 : vector<8x16x128xbf16> to vector<1x8x16x128xbf16>
    tpu.vector_store %arg6[%c0_30, %c0_31, %c0_32, %c0_33], %96 {strides = array<i32>} : memref<1x8x16x128xbf16, #tpu.memory_space<vmem>>, vector<1x8x16x128xbf16>,
    return
  }
  func.func @transform_0(%arg0: i32, %arg1: i32) -> (i32, i32, i32, i32) {
    %c0_i32 = arith.constant 0 : i32
    %c0_i32_0 = arith.constant 0 : i32
    %c0_i32_1 = arith.constant 0 : i32
    %c0_i32_2 = arith.constant 0 : i32
    return %arg0, %c0_i32, %c0_i32_0, %c0_i32_1 : i32, i32, i32, i32
  }
  func.func @transform_1(%arg0: i32, %arg1: i32) -> (i32, i32, i32) {
    %c0_i32 = arith.constant 0 : i32
    %c0_i32_0 = arith.constant 0 : i32
    %c0_i32_1 = arith.constant 0 : i32
    %c0_i32_2 = arith.constant 0 : i32
    return %c0_i32, %c0_i32_0, %c0_i32_1 : i32, i32, i32
  }
  func.func @transform_2(%arg0: i32, %arg1: i32) -> (i32, i32, i32) {
    %c0_i32 = arith.constant 0 : i32
    %c0_i32_0 = arith.constant 0 : i32
    %c0_i32_1 = arith.constant 0 : i32
    %c0_i32_2 = arith.constant 0 : i32
    return %c0_i32, %c0_i32_0, %c0_i32_1 : i32, i32, i32
  }
  func.func @transform_3(%arg0: i32, %arg1: i32) -> (i32, i32, i32) {
    %c0_i32 = arith.constant 0 : i32
    %c0_i32_0 = arith.constant 0 : i32
    %c0_i32_1 = arith.constant 0 : i32
    %c0_i32_2 = arith.constant 0 : i32
    return %c0_i32, %c0_i32_0, %c0_i32_1 : i32, i32, i32
  }
  func.func @transform_4(%arg0: i32, %arg1: i32) -> (i32, i32, i32, i32) {
    %c0_i32 = arith.constant 0 : i32
    %c0_i32_0 = arith.constant 0 : i32
    %c0_i32_1 = arith.constant 0 : i32
    return %arg0, %arg1, %c0_i32, %c0_i32_0 : i32, i32, i32, i32
  }
}

</mosaic_0001>

<bundles_post_ra>
// kernel: tpu_custom_call.1
= control target key start
LH: loop header
LB: loop body
LE: loop exit
PB: predicated region body
PF: predicated region fallthrough
CT: control target
= control target key end

     0   :  { %9 = vsyncpa [#allocation3], 0  ;;  %s6873_s0 = inlined_call_operand.vmem [shape: bf16[2,20,18,128], index: 0, kind: input, shape index: {}]   ;;  %s6874_s1 = inlined_call_operand.vmem [shape: bf16[3,384,128], index: 1, kind: input, shape index: {}]   ;;  %s6875_s2 = inlined_call_operand.hbm [shape: bf16[3,384,128], index: 2, kind: input, shape index: {}]   ;;  %s6876_s3 = inlined_call_operand.vmem [shape: f32[1,1,128], index: 3, kind: input, shape index: {}]   ;;  %s6877_s4 = inlined_call_operand.hbm [shape: bf16[2,16,16,128], index: 4, kind: output, shape index: {}]  }
   0x1   :  { %10 = vsyncpa [#allocation4], 0 }
   0x2   :  { %12 = vsyncpa [#allocation4 + $0x1], 0  ;;  %s5549_s15 = smov 0   ;;  %s5551_s16 = smov 0  }
   0x3   :  { %s5553_s17 = smov 0   ;;  %s5555_s18 = smov 0  }
   0x4   :  { %s5557_s19 = smov 0   ;;  %s5559_s20 = smov 0  }
   0x5   :  { %s5561_s21 = smov 0   ;;  %s5563_s22 = smov 0  }
   0x6 LB: > { %s3837_s23 = sadd.s32 4294967295, %s5515_s22   ;;  %s3838_s24 = sadd.s32 4294967294, %s5515_s22   ;;  %s5515_s22 = sphi %s5563_s22, %s18_s22   ;;  %s5511_s21 = sphi %s5561_s21, %s6899_s21   ;;  %s5507_s20 = sphi %s5559_s20, %s6898_s20   ;;  %s5503_s19 = sphi %s5557_s19, %s6897_s19   ;;  %s5499_s18 = sphi %s5555_s18, %s6896_s18   ;;  %s5495_s17 = sphi %s5553_s17, %s6895_s17   ;;  %s5491_s16 = sphi %s5551_s16, %s6894_s16   ;;  %s5487_s15 = sphi %s5549_s15, %s6893_s15  }
   0x7   : > { %s27_s25 = sadd.s32 1, %s5507_s20  ;;  %s30_s26 = sadd.s32 1, %s5511_s21 }
   0x8   : > { %p28_p0 = scmp.ge.s32.totalorder %s27_s25, 2  ;;  %s128_s27 = sadd.s32 1, %s5495_s17 }
   0x9   : > { %p138_p1 = scmp.ne.s32.totalorder %s5495_s17, %s5491_s16  ;;  %p139_p2 = scmp.eq.s32.totalorder %s3837_s23, 3 }
   0xa   : > { %s6901_s25 = smov (%p28_p0, %s27_s25), 0  ;;  %s6903_s26 = smov (!%p28_p0, %s30_s26), %s5511_s21 }
   0xb   : > { %s124_s28 = ssub.s32 %s5507_s20, %s6901_s25  ;;  %p5601_p3 = por %p139_p2, %p138_p1 }
   0xc   : > { %p32_p4 = scmp.ge.s32.totalorder %s6903_s26, 2  ;;  %p144_p5 = scmp.ne.s32.totalorder %s5491_s16, %s5487_s15 }
   0xd   : > { %s6882_s29 = scalar_select %p5601_p3, 1, 0 }
   0xe   : > { %p145_p6 = scmp.eq.s32.totalorder %s3838_s24, 3  ;;  %p3839_p7 = scmp.ge.s32.totalorder %s5515_s22, 1 }
   0xf   : > { %s6905_s26 = smov (%p32_p4, %s6903_s26), 0  ;;  %p152_p9 = scmp.lt.s32.totalorder %s5515_s22, 5 }
  0x10   : > { %p5610_p8 = por %p145_p6, %p144_p5  ;;  %s123_s5 = ssub.s32 %s5511_s21, %s6905_s26 }
  0x11   : > { %s125_s6 = sor.u32 %s124_s28, %s123_s5  ;;  %p5617_p10 = pnand %p3839_p7, %p152_p9 }
  0x12   : > { %s6883_s30 = scalar_select %p5610_p8, 1, 0 }
  0x13   : > { %s6884_s7 = scalar_select %p5617_p10, 1, 0 }
  0x14   : > { %p126_p11 = scmp.eq.s32.totalorder %s125_s6, 0  ;;  %p5621_p12 = scmp.eq.s32.totalorder %s3837_s23, 0 }
  0x15   : > { %p5115_p13 = pneg %p5617_p10  ;;  %s5517_s10 = smov [#allocation2]  }
  0x16   : > { %s6885_s8 = scalar_select %p5621_p12, 1, 0 }
  0x17   : > { %s5628_s9 = scalar_select %p126_p11, %s5495_s17, %s128_s27  }
  0x18   : > { %s167_s11 = sshll.u32 %s5517_s10, 4  ;;  %p5632_p0 = pnand %p5621_p12, %p5115_p13  ;;  %s168_s11 = int_to_ptr.vmem [resolvable:$true] %s167_s11 }
  0x19   : > { %s5389_s23 = scalar_lea.hbm %s6875_s2, 9216 }
  0x1a   : > { %p5390_p1 = scmp.ne.s32.totalorder %s6875_s2, %s5389_s23  ;;  %p5391_p2 = pneg %p5632_p0 }
  0x1b   : > { %p5396_p6 = scmp.lt.u32.totalorder %s5389_s23, %s6875_s2 }
  0x1c   : > { %p5392_p4 = pnand %p5391_p2, %p5390_p1 }
  0x1e   : > { %p5393_p5 = pneg %p5392_p4 }
  0x20   : > { %p5398_p7 = pnand %p5396_p6, %p5393_p5 }
  0x22   : > { %5401 = shalt.err (!%p5398_p7)
}
  0x23   : > { %s5402_s6 = scalar_lea.vmem %s168_s11, 9216  ;;  %p5410_p8 = scmp.lt.s32.totalorder %s168_s11, %s168_s11 }
  0x24   : > { %p5403_p9 = scmp.ne.s32.totalorder %s168_s11, %s5402_s6  ;;  %p5411_p3 = scmp.lt.s32.totalorder %s5402_s6, %s5402_s6 }
  0x26   : > { %p5405_p11 = pnand %p5403_p9, %p5391_p2  ;;  %p5412_p12 = por %p5411_p3, %p5410_p8 }
  0x28   : > { %p5406_p13 = pneg %p5405_p11 }
  0x2a   : > { %p5413_p10 = pnand %p5412_p12, %p5406_p13 }
  0x2c   : > { %5416 = shalt.err (!%p5413_p10)
}
  0x2d   : > { %s5518_s10 = smov 64   ;;  %s5519_s13 = smov 4  }
  0x2e   : > { %5118 = dma.hbm_to_vmem [thread:$0]  (!%p5632_p0), %s6875_s2, 9216, %s168_s11, [#allocation3], %s5518_s10, %s5518_s10, %s5519_s13  }
  0x2f   : > { %p6887_p1 = scmp.ne.s32.totalorder %s6884_s7, 0 }
  0x30   : > { %p6888_p4 = scmp.ne.s32.totalorder (!%p6887_p1), %s6885_s8, 0 }
  0x31   : > { %194 = sbr.rel (%p6887_p1) target bundleno = 881 (0x371), region = 36 }
  0x38   : > { %5478 = dma.done.wait (%p6888_p4), [#allocation3], 9216  }
  0x39   : > { %5480 = vsyncadd (%p6888_p4), [#allocation3], 4294958080  ;;  %v5196_v0 = vld [vmem:[%s6874_s1 + $0x100] sm:$0xff]   ;;  %v5200_v4 = vld [vmem:[%s6874_s1 + $0x108] sm:$0xff]   ;;  %p220_p3 = scmp.lt.s32.totalorder %s5503_s19, 1  ;;  %s4137_s11 = smul.u32 96, %s5499_s18 }
  0x3a   : > { %v5197_v1 = vld [vmem:[%s6874_s1 + $0x40] sm:$0xff]   ;;  %4202 = vmatprep.subr.bf16.mxu0 %v5196_v0  ;;  %v5201_v5 = vld [vmem:[%s6874_s1 + $0x48] sm:$0xff]   ;;  %v5204_v8 = vld [vmem:[%s6874_s1 + $0x110] sm:$0xff]   ;;  %vm358_vm0 = vsmask.f32 7424  ;;  %vm489_vm1 = vcmask 1046528  }
  0x3b   : > { %v5198_v2 = vld [vmem:[%s6874_s1 + $0xc0] sm:$0xff]   ;;  %4296 = vmatprep.subr.bf16.mxu1 %v5197_v1  ;;  %v5202_v6 = vld [vmem:[%s6874_s1 + $0xc8] sm:$0xff]   ;;  %v5205_v9 = vld [vmem:[%s6874_s1 + $0x50] sm:$0xff]   ;;  %s221_s28 = scalar_select %p220_p3, %s5503_s19, 1  ;;  %vm2108_vm10 = vcmask 1040384  }
  0x3c   : > { %v5199_v3 = vld [vmem:[%s6874_s1] sm:$0xff]   ;;  %4203 = vmatpush3.bf16.msra.mxu0 %v5198_v2  ;;  %v5203_v7 = vld [vmem:[%s6874_s1 + $0x8] sm:$0xff]   ;;  %v5206_v10 = vld [vmem:[%s6874_s1 + $0xd0] sm:$0xff]   ;;  %s3846_s5 = sshll.u32 %s5499_s18, 3  ;;  %vm2109_vm11 = vsmask.f32 256 }
  0x3d   : > { %4297 = vmatpush3.bf16.msra.mxu1 %v5199_v3  ;;  %4204 = vmatprep.subr.bf16.mxu0 %v5200_v4  ;;  %v5207_v11 = vld [vmem:[%s6874_s1 + $0x10] sm:$0xff]   ;;  %v5208_v12 = vld [vmem:[%s6874_s1 + $0x118] sm:$0xff]   ;;  %v5212_v16 = vld [vmem:[%s6874_s1 + $0x120] sm:$0xff]   ;;  %s5108_s13 = smul.u32 240, %s221_s28  ;;  %s217_s28 = sand.u32 1, %s5491_s16  }
  0x3e   : > { %4298 = vmatprep.subr.bf16.mxu1 %v5201_v5  ;;  %v5209_v13 = vld [vmem:[%s6874_s1 + $0x58] sm:$0xff]   ;;  %v5213_v17 = vld [vmem:[%s6874_s1 + $0x60] sm:$0xff]   ;;  %v5216_v20 = vld [vmem:[%s6874_s1 + $0x128] sm:$0xff]   ;;  %s6755_s8 = sshll.u32 %s217_s28, 6  ;;  %s4133_s14 = sshll.u32 %s5503_s19, 5 }
  0x3f   : > { %v5210_v14 = vld [vmem:[%s6874_s1 + $0xd8] sm:$0xff]   ;;  %v5214_v18 = vld [vmem:[%s6874_s1 + $0xe0] sm:$0xff]   ;;  %v5217_v21 = vld [vmem:[%s6874_s1 + $0x68] sm:$0xff]   ;;  %s224_s10 = scalar_lea.vmem %s6873_s0, %s5108_s13  ;;  %s6821_s12 = scalar_lea.sflag [#allocation4], %s217_s28 }
  0x40   : > { %4205 = vmatpush3.bf16.msra.mxu0 %v5202_v6  ;;  %v5211_v15 = vld [vmem:[%s6874_s1 + $0x18] sm:$0xff]   ;;  %v5215_v19 = vld [vmem:[%s6874_s1 + $0x20] sm:$0xff]   ;;  %v5218_v22 = vld [vmem:[%s6874_s1 + $0xe8] sm:$0xff]   ;;  %s5757_s7 = scalar_lea.vmem %s224_s10, %s4137_s11  ;;  %s6768_s10 = scalar_lea.vmem [#allocation5], %s6755_s8 }
  0x41   : > { %4299 = vmatpush3.bf16.msra.mxu1 %v5203_v7  ;;  %4206 = vmatprep.subr.bf16.mxu0 %v5204_v8  ;;  %v5219_v23 = vld [vmem:[%s6874_s1 + $0x28] sm:$0xff]   ;;  %v5220_v24 = vld [vmem:[%s6874_s1 + $0x130] sm:$0xff]   ;;  %v5224_v28 = vld [vmem:[%s6874_s1 + $0x138] sm:$0xff]   ;;  %s3747_s24 = sshll.u32 %s6768_s10, 4  ;;  %p6891_p10 = scmp.ne.s32.totalorder %s6882_s29, 0  ;;  %s6815_s24 = int_to_ptr.vmem [resolvable:$true] %s3747_s24 }
  0x42   : > { %4300 = vmatprep.subr.bf16.mxu1 %v5205_v9  ;;  %v5221_v25 = vld [vmem:[%s6874_s1 + $0x70] sm:$0xff]   ;;  %v5225_v29 = vld [vmem:[%s6874_s1 + $0x78] sm:$0xff]   ;;  %v5769_v34 = vld [vmem:[%s5757_s7] sm:$0xff]   ;;  %s5417_s13 = scalar_lea.vmem %s6815_s24, 1024  ;;  %s5521_s6 = smov [#allocation5]  }
  0x43   : > { %v5222_v26 = vld [vmem:[%s6874_s1 + $0xf0] sm:$0xff]   ;;  %v5226_v30 = vld [vmem:[%s6874_s1 + $0xf8] sm:$0xff]   ;;  %v5775_v38 = vld [vmem:[%s5757_s7 + $0x8] ss:$0 sps:$4 sm:$0x11]   ;;  %v360_v39 = vshrl.u32 %v5769_v34, 16  ;;  %p5418_p8 = scmp.ne.s32.totalorder %s6815_s24, %s5417_s13 }
  0x44   : > { %4207 = vmatpush3.bf16.msra.mxu0 %v5206_v10  ;;  %v5223_v27 = vld [vmem:[%s6874_s1 + $0x30] sm:$0xff]   ;;  %v5227_v31 = vld [vmem:[%s6874_s1 + $0x38] sm:$0xff]   ;;  %v362_v40 = vshll.u32 %v5769_v34, 16  ;;  %v367_v43 = vshll.u32 %v5775_v38, 16  ;;  %v5232_v44 = vld [vmem:[%s6874_s1 + $0x140] sm:$0xff]   ;;  %s5421_s11 = sshll.u32 %s5521_s6, 4  ;;  %s5422_s11 = int_to_ptr.vmem [resolvable:$false] %s5421_s11 }
  0x45   : > { %4301 = vmatpush3.bf16.msra.mxu1 %v5207_v11  ;;  %4208 = vmatprep.subr.bf16.mxu0 %v5208_v12  ;;  %v5763_v32 = vld [vmem:[%s5757_s7 + $0xc] sm:$0xff]   ;;  %v5766_v33 = vld [vmem:[%s5757_s7 + $0x14] ss:$0 sps:$4 sm:$0x11]   ;;  %v5784_v45 = vld [vmem:[%s5757_s7 + $0x18] sm:$0xff]   ;;  %p5419_p12 = pnand %p5418_p8, %p6891_p10  ;;  %s5423_s8 = scalar_lea.vmem %s5422_s11, 2048 }
  0x46   : > { %4302 = vmatprep.subr.bf16.mxu1 %v5209_v13  ;;  %v372_v35 = vshrl.u32 %v5763_v32, 16  ;;  %v374_v36 = vshll.u32 %v5763_v32, 16  ;;  %v379_v37 = vshll.u32 %v5766_v33, 16  ;;  %v364_v46 = vrot.slane %v362_v40, 1  ;;  %v240_v47 = vld [vmem:[%s5757_s7 + $0x20] sm:$0x1]  ;;  %vm6355_vm13 = vmand %vm2108_vm10, %vm2109_vm11  ;;  %p5424_p2 = scmp.lt.s32.totalorder %s6815_s24, %s5422_s11  ;;  %p5425_p5 = scmp.lt.s32.totalorder %s5423_s8, %s5417_s13 }
  0x47   : > { %v5788_v48 = vld [vmem:[%s5757_s7 + $0x24] sm:$0xff]   ;;  %v369_v50 = vrot.slane %v367_v43, 1  ;;  %v5790_v51 = vcombine.low %v240_v47, %v240_v47  ;;  %v243_v53 = vld [vmem:[%s5757_s7 + $0x2c] sm:$0x1]  ;;  %v384_v55 = vshrl.u32 %v5784_v45, 16  ;;  %v386_v56 = vshll.u32 %v5784_v45, 16  ;;  %p5420_p0 = pneg %p5419_p12 }
  0x48   : > { %4209 = vmatpush3.bf16.msra.mxu0 %v5210_v14  ;;  %v376_v41 = vrot.slane %v374_v36, 1  ;;  %v381_v42 = vrot.slane %v379_v37, 1  ;;  %v5235_v52 = vld [vmem:[%s6874_s1 + $0x148] sm:$0xff]   ;;  %v365_v54 = vor.u32 %v364_v46, %v360_v39  ;;  %v5798_v57 = vcombine.low %v243_v53, %v243_v53  ;;  %v5805_v62 = vld [vmem:[%s5757_s7 + $0x30] sm:$0xff]   ;;  %v246_v63 = vld [vmem:[%s5757_s7 + $0x38] sm:$0x1]  ;;  %p5426_p6 = por %p5425_p5, %p5424_p2 }
  0x49   : > { %4303 = vmatpush3.bf16.msra.mxu1 %v5211_v15  ;;  %4210 = vmatprep.subr.bf16.mxu0 %v5212_v16  ;;  %v391_v59 = vshll.u32 %v5790_v51, 16  ;;  %v396_v60 = vshrl.u32 %v5788_v48, 16  ;;  %v398_v61 = vshll.u32 %v5788_v48, 16  ;;  %v388_v1 = vrot.slane %v386_v56, 1  ;;  %v5244_v7 = vld [vmem:[%s6874_s1 + $0x80] sm:$0xff]   ;;  %v5238_v10 = vld [vmem:[%s6874_s1 + $0x150] sm:$0xff]  }
  0x4a   : > { %4304 = vmatprep.subr.bf16.mxu1 %v5213_v17  ;;  %v377_v49 = vor.u32 %v376_v41, %v372_v35  ;;  %v370_v0 = vsel %vm358_vm0, %v365_v54, %v369_v50  ;;  %v403_v2 = vshll.u32 %v5798_v57, 16  ;;  %v5812_v6 = vcombine.low %v246_v63, %v246_v63  ;;  %v5825_v13 = vld [vmem:[%s5757_s7 + $0x3c] sm:$0xff]   ;;  %v5248_v14 = vld [vmem:[%s6874_s1 + $0x88] sm:$0xff]   ;;  %v5882_v46 = vld [vmem:[%s5757_s7 + $0x54] sm:$0xff]   ;;  %p5427_p7 = pnand %p5426_p6, %p5420_p0 }
  0x4b   : > { %1199 = vmatprep.mubr.bf16.mxu1 %v370_v0  ;;  %v393_v3 = vrot.slane %v391_v59, 1  ;;  %v400_v4 = vrot.slane %v398_v61, 1  ;;  %v389_v5 = vor.u32 %v388_v1, %v384_v55  ;;  %v410_v11 = vshll.u32 %v5805_v62, 16  ;;  %v5251_v37 = vld [vmem:[%s6874_s1 + $0x168] sm:$0xff]   ;;  %v5259_v39 = vld [vmem:[%s6874_s1 + $0xa0] sm:$0xff]   ;;  %v5255_v47 = vld [vmem:[%s6874_s1 + $0x170] sm:$0xff]  }
  0x4c   : > { %4211 = vmatpush3.bf16.msra.mxu0 %v5214_v18  ;;  %v382_v58 = vsel %vm358_vm0, %v377_v49, %v381_v42  ;;  %v405_v9 = vrot.slane %v403_v2, 1  ;;  %v415_v15 = vshll.u32 %v5812_v6, 16  ;;  %v408_v17 = vshrl.u32 %v5805_v62, 16  ;;  %v5260_v40 = vld [vmem:[%s6874_s1 + $0xa8] sm:$0xff]   ;;  %v255_v49 = vld [vmem:[%s5757_s7 + $0x5c] sm:$0x1] }
  0x4d   : > { %4305 = vmatpush3.bf16.msra.mxu1 %v5215_v19  ;;  %4212 = vmatprep.subr.bf16.mxu0 %v5216_v20  ;;  %v401_v8 = vor.u32 %v400_v4, %v396_v60  ;;  %v5822_v12 = vsel %vm358_vm0, %v389_v5, %v393_v3  ;;  %v412_v18 = vrot.slane %v410_v11, 1  ;;  %v5241_v19 = vld [vmem:[%s6874_s1 + $0x158] sm:$0xff]   ;;  %v249_v20 = vld [vmem:[%s5757_s7 + $0x44] sm:$0x1]  ;;  %v493_v50 = vrot.slane %v5763_v32, 1 }
  0x4e   : > { %4306 = vmatprep.subr.bf16.mxu1 %v5217_v21  ;;  %829 = vmatprep.mubr.bf16.mxu0 %v382_v58  ;;  %v5254_v21 = vld [vmem:[%s6874_s1 + $0x90] sm:$0xff]   ;;  %v494_v53 = vrot.slane %v5766_v33, 1  ;;  %v490_v54 = vrot.slane %v5769_v34, 1  ;;  %v491_v55 = vrot.slane %v5775_v38, 1  ;;  %v5912_v60 = vcombine.low %v255_v49, %v255_v49  ;;  %v5915_v61 = vld [vmem:[%s5757_s7 + $0x60] sm:$0xff]   ;;  %v5265_v63 = vld [vmem:[%s6874_s1 + $0xb8] sm:$0xff]  }
  0x4f   : > { %v5833_v16 = vsel %vm358_vm0, %v401_v8, %v405_v9  ;;  %v5264_v33 = vld [vmem:[%s6874_s1 + $0xb0] sm:$0xff]   ;;  %v446_v2 = vshll.u32 %v5882_v46, 16  ;;  %v5266_v3 = vld [vmem:[%s6874_s1 + $0x1c0] sm:$0xff]   ;;  %v444_v4 = vshrl.u32 %v5882_v46, 16 }
  0x50   : > { %4213 = vmatpush3.bf16.msra.mxu0 %v5218_v22  ;;  %v417_v22 = vrot.slane %v415_v15, 1  ;;  %v5907_v38 = vsel %vm489_vm1, %v490_v54, %v491_v55  ;;  %v451_v5 = vshll.u32 %v5912_v60, 16  ;;  %v5933_v9 = vld [vmem:[%s6874_s1 + $0x200] sm:$0xff]   ;;  %v499_v54 = vrot.slane %v5788_v48, 1 }
  0x51   : > { %4307 = vmatpush3.bf16.msra.mxu1 %v5219_v23  ;;  %4214 = vmatprep.subr.bf16.mxu0 %v5220_v24  ;;  %v5847_v23 = vld [vmem:[%s5757_s7 + $0x48] sm:$0xff]   ;;  %v413_v24 = vor.u32 %v412_v18, %v408_v17  ;;  %v448_v8 = vrot.slane %v446_v2, 1  ;;  %v458_v17 = vshll.u32 %v5915_v61, 16  ;;  %v500_v55 = vrot.slane %v5798_v57, 1 }
  0x52   : > { %4308 = vmatprep.subr.bf16.mxu1 %v5221_v25  ;;  %v5850_v25 = vcombine.low %v249_v20, %v249_v20  ;;  %v453_v11 = vrot.slane %v451_v5, 1  ;;  %v5944_v18 = vld [vmem:[%s5757_s7 + $0x6c] sm:$0xff]   ;;  %v456_v20 = vshrl.u32 %v5915_v61, 16  ;;  %v512_v2 = vrot.slane %v5912_v60, 1 }
  0x53   : > { %v5269_v5 = vld [vmem:[%s6874_s1 + $0x188] sm:$0xff]  }
  0x54   : > { %4215 = vmatpush3.bf16.msra.mxu0 %v5222_v26  ;;  %v422_v26 = vshll.u32 %v5825_v13, 16  ;;  %v427_v36 = vshll.u32 %v5850_v25, 16  ;;  %v506_v57 = vrot.slane %v5850_v25, 1  ;;  %v5267_v25 = vld [vmem:[%s6874_s1 + $0x180] sm:$0xff]  }
  0x55   : > { %4309 = vmatpush3.bf16.msra.mxu1 %v5223_v27  ;;  %4216 = vmatprep.subr.bf16.mxu0 %v5224_v28  ;;  %v5256_v27 = vld [vmem:[%s6874_s1 + $0x98] sm:$0xff]   ;;  %v5247_v28 = vld [vmem:[%s6874_s1 + $0x160] sm:$0xff]  }
  0x56   : > { %4310 = vmatprep.subr.bf16.mxu1 %v5225_v29  ;;  %v252_v29 = vld [vmem:[%s5757_s7 + $0x50] sm:$0x1]  ;;  %v424_v35 = vrot.slane %v422_v26, 1  ;;  %v429_v42 = vrot.slane %v427_v36, 1 }
  0x57   : > { %v5878_v43 = vcombine.low %v252_v29, %v252_v29  ;;  %v470_v29 = vshll.u32 %v5944_v18, 16 }
  0x58   : > { %4217 = vmatpush3.bf16.msra.mxu0 %v5226_v30  ;;  %v5861_v30 = vsel %vm358_vm0, %v413_v24, %v417_v22  ;;  %v460_v24 = vrot.slane %v458_v17, 1  ;;  %v5278_v17 = vld [vmem:[%s6874_s1 + $0x218] sm:$0xff]  }
  0x59   : > { %4311 = vmatpush3.bf16.msra.mxu1 %v5227_v31  ;;  %4724 = vmatprep.subr.bf16.mxu0 %v5232_v44  ;;  %v420_v31 = vshrl.u32 %v5825_v13, 16  ;;  %v439_v59 = vshll.u32 %v5878_v43, 16 }
  0x5a   : > { %4760 = vmatprep.subr.bf16.mxu1 %v5244_v7 }
  0x5b   : > { %830 = vmatmul.mubr.bf16.vlgmr.msra.gmra.mrb[0].mxu0 %v5763_v32  ;;  %v425_v41 = vor.u32 %v424_v35, %v420_v31  ;;  %v441_v1 = vrot.slane %v439_v59, 1  ;;  %v461_v31 = vor.u32 %v460_v24, %v456_v20  ;;  %v503_v59 = vrot.slane %v5812_v6, 1  ;;  %v5277_v20 = vld [vmem:[%s6874_s1 + $0x1e0] sm:$0xff]  }
  0x5c   : > { %1200 = vmatmul.mubr.bf16.vlgmr.msra.gmra.mrb[0].mxu1 %v5769_v34  ;;  %4725 = vmatpush3.bf16.msra.mxu0 %v5232_v44  ;;  %v434_v44 = vshll.u32 %v5847_v23, 16  ;;  %v5904_v34 = vsel %vm489_vm1, %v493_v50, %v494_v53  ;;  %v497_v53 = vrot.slane %v5790_v51, 1  ;;  %v505_v51 = vrot.slane %v5825_v13, 1  ;;  %v5280_v24 = vld [vmem:[%s6874_s1 + $0x220] sm:$0xff]  }
  0x5d   : > { %1207 = vmatprep.mubr.bf16.mxu1 %v382_v58  ;;  %4726 = vmatprep.subr.bf16.mxu0 %v5235_v52  ;;  %v5894_v56 = vsel %vm358_vm0, %v425_v41, %v429_v42  ;;  %v472_v41 = vrot.slane %v470_v29, 1 }
  0x5e   : > { %837 = vmatprep.mubr.bf16.mxu0 %v5822_v12  ;;  %4761 = vmatpush3.bf16.msra.mxu1 %v5244_v7  ;;  %v436_v58 = vrot.slane %v434_v44, 1 }
  0x5f   : > { %4762 = vmatprep.subr.bf16.mxu1 %v5248_v14 }
  0x60   : > { %4727 = vmatpush3.bf16.msra.mxu0 %v5235_v52  ;;  %v432_v52 = vshrl.u32 %v5847_v23, 16 }
  0x61   : > { %4728 = vmatprep.subr.bf16.mxu0 %v5238_v10 }
  0x62   : > { %4763 = vmatpush3.bf16.msra.mxu1 %v5248_v14  ;;  %v437_v0 = vor.u32 %v436_v58, %v432_v52  ;;  %v449_v14 = vor.u32 %v448_v8, %v444_v4  ;;  %v496_v52 = vrot.slane %v5784_v45, 1  ;;  %v502_v58 = vrot.slane %v5805_v62, 1  ;;  %v5273_v4 = vld [vmem:[%s6874_s1 + $0x208] sm:$0xff]   ;;  %v5271_v8 = vld [vmem:[%s6874_s1 + $0x1d0] sm:$0xff]  }
  0x63   : > { %838 = vmatmul.mubr.bf16.gmra.mrb[4].mxu0 %v5784_v45  ;;  %4764 = vmatprep.subr.bf16.mxu1 %v5254_v21 }
  0x64   : > { %1208 = vmatmul.mubr.bf16.gmra.mrb[4].mxu1 %v5763_v32  ;;  %845 = vmatprep.mubr.bf16.mxu0 %v5833_v16  ;;  %v5261_v32 = vld [vmem:[%s6874_s1 + $0x178] sm:$0xff]   ;;  %v5928_v7 = vsel %vm358_vm0, %v437_v0, %v441_v1  ;;  %v5953_v22 = vsel %vm358_vm0, %v449_v14, %v453_v11  ;;  %v509_v0 = vrot.slane %v5878_v43, 1  ;;  %v511_v1 = vrot.slane %v5882_v46, 1  ;;  %v5268_v43 = vld [vmem:[%s6874_s1 + $0x1c8] sm:$0xff]   ;;  %v5272_v11 = vld [vmem:[%s6874_s1 + $0x190] sm:$0xff]  }
  0x65   : > { %1215 = vmatprep.mubr.bf16.mxu1 %v5822_v12  ;;  %4729 = vmatpush3.bf16.msra.mxu0 %v5238_v10  ;;  %v258_v10 = vld [vmem:[%s5757_s7 + $0x68] sm:$0x1]  ;;  %v6015_v60 = vsel %vm489_vm1, %v496_v52, %v497_v53  ;;  %v5274_v14 = vld [vmem:[%s6874_s1 + $0x1d8] sm:$0xff]   ;;  %v5285_v52 = vld [vmem:[%s6874_s1 + $0x1b0] sm:$0xff]  }
  0x66   : > { %4730 = vmatprep.subr.bf16.mxu0 %v5241_v19  ;;  %4765 = vmatpush3.bf16.msra.mxu1 %v5254_v21  ;;  %v5940_v15 = vcombine.low %v258_v10, %v258_v10  ;;  %v5950_v21 = vld [vmem:[%s5757_s7 + $0x80] ss:$0 sps:$4 sm:$0x11]   ;;  %v5276_v10 = vld [vmem:[%s6874_s1 + $0x210] sm:$0xff]   ;;  %v5289_v53 = vld [vmem:[%s6874_s1 + $0x238] sm:$0xff]  }
  0x67   : > { %4766 = vmatprep.subr.bf16.mxu1 %v5256_v27 }
  0x68   : > { %v463_v26 = vshll.u32 %v5940_v15, 16 }
  0x69   : > { %4731 = vmatpush3.bf16.msra.mxu0 %v5241_v19  ;;  %v261_v19 = vld [vmem:[%s5757_s7 + $0x74] sm:$0x1] }
  0x6a   : > { %4732 = vmatprep.subr.bf16.mxu0 %v5247_v28  ;;  %4767 = vmatpush3.bf16.msra.mxu1 %v5256_v27  ;;  %v5956_v27 = vcombine.low %v261_v19, %v261_v19  ;;  %v465_v35 = vrot.slane %v463_v26, 1  ;;  %v5275_v19 = vld [vmem:[%s6874_s1 + $0x198] sm:$0xff]   ;;  %v5279_v26 = vld [vmem:[%s6874_s1 + $0x1a0] sm:$0xff]  }
  0x6b   : > { %846 = vmatmul.mubr.bf16.gmra.mrb[8].mxu0 %v5788_v48  ;;  %4768 = vmatprep.subr.bf16.mxu1 %v5259_v39 }
  0x6c   : > { %1216 = vmatmul.mubr.bf16.gmra.mrb[8].mxu1 %v5784_v45  ;;  %853 = vmatprep.mubr.bf16.mxu0 %v5861_v30  ;;  %v475_v36 = vshll.u32 %v5956_v27, 16  ;;  %v5971_v42 = vsel %vm358_vm0, %v461_v31, %v465_v35  ;;  %v5281_v31 = vld [vmem:[%s6874_s1 + $0x1e8] sm:$0xff]  }
  0x6d   : > { %1223 = vmatprep.mubr.bf16.mxu1 %v5833_v16  ;;  %4733 = vmatpush3.bf16.msra.mxu0 %v5247_v28  ;;  %v5959_v28 = vld [vmem:[%s5757_s7 + $0x78] sm:$0xff]   ;;  %v5283_v35 = vld [vmem:[%s6874_s1 + $0x228] sm:$0xff]  }
  0x6e   : > { %4734 = vmatprep.subr.bf16.mxu0 %v5251_v37  ;;  %4769 = vmatpush3.bf16.msra.mxu1 %v5259_v39  ;;  %v595_v39 = vshll.u32 %v5950_v21, 16  ;;  %v477_v44 = vrot.slane %v475_v36, 1  ;;  %v513_v36 = vsel %vm489_vm1, %v511_v1, %v512_v2  ;;  %v5295_v2 = vld [vmem:[#allocation2 + $0x108] sm:$0xff]  }
  0x6f   : > { %4770 = vmatprep.subr.bf16.mxu1 %v5260_v40 }
  0x70   : > { %v597_v50 = vrot.slane %v595_v39, 1  ;;  %v515_v39 = vrot.slane %v5940_v15, 1  ;;  %v5286_v15 = vld [vmem:[%s6874_s1 + $0x230] sm:$0xff]  }
  0x71   : > { %4735 = vmatpush3.bf16.msra.mxu0 %v5251_v37  ;;  %v590_v37 = vshll.u32 %v5959_v28, 16 }
  0x72   : > { %4736 = vmatprep.subr.bf16.mxu0 %v5255_v47  ;;  %4771 = vmatpush3.bf16.msra.mxu1 %v5260_v40  ;;  %v468_v40 = vshrl.u32 %v5944_v18, 16 }
  0x73   : > { %854 = vmatmul.mubr.bf16.gmra.mrb[12].mxu0 %v5805_v62  ;;  %4772 = vmatprep.subr.bf16.mxu1 %v5264_v33  ;;  %v592_v49 = vrot.slane %v590_v37, 1  ;;  %v514_v37 = vrot.slane %v5915_v61, 1 }
  0x74   : > { %1224 = vmatmul.mubr.bf16.gmra.mrb[12].mxu1 %v5788_v48  ;;  %861 = vmatprep.mubr.bf16.mxu0 %v5894_v56 }
  0x75   : > { %1231 = vmatprep.mubr.bf16.mxu1 %v5861_v30  ;;  %4737 = vmatpush3.bf16.msra.mxu0 %v5255_v47  ;;  %v588_v47 = vshrl.u32 %v5959_v28, 16 }
  0x76   : > { %4738 = vmatprep.subr.bf16.mxu0 %v5261_v32  ;;  %4773 = vmatpush3.bf16.msra.mxu1 %v5264_v33 }
  0x77   : > { %4774 = vmatprep.subr.bf16.mxu1 %v5265_v63  ;;  %v593_v6 = vor.u32 %v592_v49, %v588_v47  ;;  %v518_v47 = vrot.slane %v5956_v27, 1  ;;  %v516_v49 = vsel %vm489_vm1, %v514_v37, %v515_v39  ;;  %v5287_v27 = vld [vmem:[%s6874_s1 + $0x1f8] sm:$0xff]   ;;  %v5304_v37 = vld [vmem:[#allocation2 + $0x120] sm:$0xff]  }
  0x79   : > { %4739 = vmatpush3.bf16.msra.mxu0 %v5261_v32  ;;  %v473_v32 = vor.u32 %v472_v41, %v468_v40  ;;  %v5282_v40 = vld [vmem:[%s6874_s1 + $0x1a8] sm:$0xff]   ;;  %v5284_v41 = vld [vmem:[%s6874_s1 + $0x1f0] sm:$0xff]  }
  0x7a   : > { %4390 = vmatprep.subr.bf16.mxu0 %v5266_v3  ;;  %4775 = vmatpush3.bf16.msra.mxu1 %v5265_v63  ;;  %v508_v63 = vrot.slane %v5847_v23, 1  ;;  %v5998_v3 = vsel %vm358_vm0, %v593_v6, %v597_v50 }
  0x7b   : > { %862 = vmatmul.mubr.bf16.gmra.mrb[16].mxu0 %v5825_v13  ;;  %4796 = vmatprep.subr.bf16.mxu1 %v5933_v9  ;;  %v5985_v33 = vsel %vm358_vm0, %v473_v32, %v477_v44  ;;  %v517_v44 = vrot.slane %v5944_v18, 1 }
  0x7c   : > { %1232 = vmatmul.mubr.bf16.gmra.mrb[16].mxu1 %v5805_v62  ;;  %869 = vmatprep.mubr.bf16.mxu0 %v5928_v7  ;;  %v510_v29 = vsel %vm489_vm1, %v508_v63, %v509_v0  ;;  %v5294_v63 = vld [vmem:[#allocation2 + $0x140] sm:$0xff]  }
  0x7d   : > { %1239 = vmatprep.mubr.bf16.mxu1 %v5894_v56  ;;  %v519_v50 = vsel %vm489_vm1, %v517_v44, %v518_v47 }
  0x83   : > { %870 = vmatmul.mubr.bf16.gmra.mrb[20].mxu0 %v5847_v23 }
  0x84   : > { %1240 = vmatmul.mubr.bf16.gmra.mrb[20].mxu1 %v5825_v13  ;;  %877 = vmatprep.mubr.bf16.mxu0 %v5953_v22 }
  0x85   : > { %1247 = vmatprep.mubr.bf16.mxu1 %v5928_v7 }
  0x8b   : > { %878 = vmatmul.mubr.bf16.gmra.mrb[24].mxu0 %v5882_v46 }
  0x8c   : > { %1248 = vmatmul.mubr.bf16.gmra.mrb[24].mxu1 %v5847_v23  ;;  %885 = vmatprep.mubr.bf16.mxu0 %v5971_v42 }
  0x8d   : > { %1255 = vmatprep.mubr.bf16.mxu1 %v5953_v22 }
  0x93   : > { %886 = vmatmul.mubr.bf16.gmra.mrb[28].mxu0 %v5915_v61 }
  0x94   : > { %1256 = vmatmul.mubr.bf16.gmra.mrb[28].mxu1 %v5882_v46  ;;  %893 = vmatprep.mubr.bf16.mxu0 %v5985_v33 }
  0x95   : > { %1263 = vmatprep.mubr.bf16.mxu1 %v5971_v42 }
  0x9b   : > { %894 = vmatmul.mubr.bf16.gmra.mrb[32].mxu0 %v5944_v18 }
  0x9c   : > { %1264 = vmatmul.mubr.bf16.gmra.mrb[32].mxu1 %v5915_v61  ;;  %901 = vmatprep.mubr.bf16.mxu0 %v5998_v3 }
  0x9d   : > { %1271 = vmatprep.mubr.bf16.mxu1 %v5985_v33 }
  0xa3   : > { %902 = vmatmul.mubr.bf16.gmra.mrb[36].mxu0 %v5959_v28 }
  0xa4   : > { %1272 = vmatmul.mubr.bf16.gmra.mrb[36].mxu1 %v5944_v18  ;;  %4740 = vmatprep.mubr.bf16.mxu0 %v5904_v34 }
  0xa5   : > { %4776 = vmatprep.mubr.bf16.mxu1 %v5907_v38  ;;  %v6024_v38 = vsel %vm489_vm1, %v499_v54, %v500_v55  ;;  %v600_v54 = vrot.slane %v5959_v28, 1  ;;  %v601_v55 = vrot.slane %v5950_v21, 1 }
  0xab   : > { %4741 = vmatmul.mubr.bf16.vlgmr.msra.gmra.mrb[40].mxu0 %v6015_v60 }
  0xac   : > { %4777 = vmatmul.mubr.bf16.vlgmr.msra.gmra.mrb[40].mxu1 %v5904_v34  ;;  %4391 = vmatpush3.bf16.msra.mxu0 %v5267_v25  ;;  %v6041_v34 = vsel %vm489_vm1, %v502_v58, %v503_v59  ;;  %v5288_v58 = vld [vmem:[%s6874_s1 + $0x1b8] sm:$0xff]   ;;  %v602_v59 = vsel %vm489_vm1, %v600_v54, %v601_v55  ;;  %v5296_v25 = vld [vmem:[#allocation2 + $0xc8] sm:$0xff]  }
  0xad   : > { %4392 = vmatprep.subr.bf16.mxu0 %v5268_v43  ;;  %4744 = vmatprep.mubr.bf16.mxu0 %v6024_v38  ;;  %v5307_v54 = vld [vmem:[#allocation2 + $0x128] sm:$0xff]  }
  0xae   : > { %4780 = vmatprep.mubr.bf16.mxu1 %v6015_v60  ;;  %4797 = vmatpush3.bf16.msra.mxu1 %v5933_v9  ;;  %v6050_v9 = vsel %vm489_vm1, %v505_v51, %v506_v57 }
  0xaf   : > { %4798 = vmatprep.subr.bf16.mxu1 %v5273_v4 }
  0xb0   : > { %4393 = vmatpush3.bf16.msra.mxu0 %v5269_v5 }
  0xb1   : > { %4394 = vmatprep.subr.bf16.mxu0 %v5271_v8 }
  0xb2   : > { %4799 = vmatpush3.bf16.msra.mxu1 %v5273_v4  ;;  %v5298_v4 = vld [vmem:[#allocation2 + $0x110] sm:$0xff]  }
  0xb3   : > { %4745 = vmatmul.mubr.bf16.gmra.mrb[44].mxu0 %v6041_v34  ;;  %4800 = vmatprep.subr.bf16.mxu1 %v5276_v10 }
  0xb4   : > { %4781 = vmatmul.mubr.bf16.gmra.mrb[44].mxu1 %v6024_v38  ;;  %4395 = vmatpush3.bf16.msra.mxu0 %v5272_v11 }
  0xb5   : > { %4748 = vmatprep.mubr.bf16.mxu0 %v6050_v9  ;;  %4784 = vmatprep.mubr.bf16.mxu1 %v6041_v34 }
  0xb6   : > { %4396 = vmatprep.subr.bf16.mxu0 %v5274_v14  ;;  %4801 = vmatpush3.bf16.msra.mxu1 %v5276_v10 }
  0xb7   : > { %4802 = vmatprep.subr.bf16.mxu1 %v5278_v17 }
  0xb8   : > { %4397 = vmatpush3.bf16.msra.mxu0 %v5275_v19 }
  0xb9   : > { %4398 = vmatprep.subr.bf16.mxu0 %v5277_v20 }
  0xba   : > { %4803 = vmatpush3.bf16.msra.mxu1 %v5278_v17  ;;  %v5300_v17 = vld [vmem:[#allocation2 + $0x150] sm:$0xff]  }
  0xbb   : > { %4749 = vmatmul.mubr.bf16.gmra.mrb[48].mxu0 %v510_v29  ;;  %4804 = vmatprep.subr.bf16.mxu1 %v5280_v24 }
  0xbc   : > { %4785 = vmatmul.mubr.bf16.gmra.mrb[48].mxu1 %v6050_v9  ;;  %4399 = vmatpush3.bf16.msra.mxu0 %v5279_v26 }
  0xbd   : > { %4752 = vmatprep.mubr.bf16.mxu0 %v513_v36  ;;  %4788 = vmatprep.mubr.bf16.mxu1 %v510_v29 }
  0xbe   : > { %4400 = vmatprep.subr.bf16.mxu0 %v5281_v31  ;;  %4805 = vmatpush3.bf16.msra.mxu1 %v5280_v24  ;;  %v5301_v24 = vld [vmem:[#allocation2 + $0x118] sm:$0xff]  }
  0xbf   : > { %4806 = vmatprep.subr.bf16.mxu1 %v5283_v35  ;;  %v5302_v31 = vld [vmem:[#allocation2 + $0xd8] sm:$0xff]  }
  0xc0   : > { %4401 = vmatpush3.bf16.msra.mxu0 %v5282_v40  ;;  %v5305_v40 = vld [vmem:[#allocation2 + $0xe0] sm:$0xff]  }
  0xc1   : > { %4402 = vmatprep.subr.bf16.mxu0 %v5284_v41 }
  0xc2   : > { %4807 = vmatpush3.bf16.msra.mxu1 %v5283_v35 }
  0xc3   : > { %4753 = vmatmul.mubr.bf16.gmra.mrb[52].mxu0 %v516_v49  ;;  %4808 = vmatprep.subr.bf16.mxu1 %v5286_v15 }
  0xc4   : > { %4789 = vmatmul.mubr.bf16.gmra.mrb[52].mxu1 %v513_v36  ;;  %4756 = vmatprep.mubr.bf16.mxu0 %v519_v50 }
  0xc5   : > { %4792 = vmatprep.mubr.bf16.mxu1 %v516_v49  ;;  %4403 = vmatpush3.bf16.msra.mxu0 %v5285_v52 }
  0xc6   : > { %4809 = vmatpush3.bf16.msra.mxu1 %v5286_v15  ;;  %4404 = vmatprep.subr.bf16.mxu0 %v5287_v27 }
  0xc7   : > { %4810 = vmatprep.subr.bf16.mxu1 %v5289_v53 }
  0xc9   : > { %4405 = vmatpush3.bf16.msra.mxu0 %v5288_v58 }
  0xca   : > { %4811 = vmatpush3.bf16.msra.mxu1 %v5289_v53 }
  0xcb   : > { %4757 = vmatmul.mubr.bf16.gmra.mrb[56].mxu0 %v602_v59  ;;  %4832 = vmatprep.subr.bf16.mxu1 %v5294_v63 }
  0xcc   : > { %4793 = vmatmul.mubr.bf16.gmra.mrb[56].mxu1 %v519_v50  ;;  %1644 = vmatprep.mubr.bf16.mxu0 %v5822_v12  ;;  %v5291_v12 = vld [vmem:[%s5757_s7 + $0x8c] ss:$0 sps:$4 sm:$0x11]  }
  0xcd   : > { %4812 = vmatprep.mubr.bf16.mxu1 %v6015_v60  ;;  %v5297_v60 = vld [vmem:[#allocation2 + $0x148] sm:$0xff]  }
  0xd3   : > { %1645 = vmatmul.mubr.bf16.vlgmr.msra.gmra.mrb[60].mxu0 %v5784_v45  ;;  %v5290_v45 = vld [vmem:[%s5757_s7 + $0x84] sm:$0xff]  }
  0xd4   : > { %4813 = vmatmul.mubr.bf16.vlgmr.msra.gmra.mrb[40].mxu1 %v6024_v38  ;;  %1652 = vmatprep.mubr.bf16.mxu0 %v5833_v16  ;;  %v1416_v16 = vrot.slane %v5291_v12, 1  ;;  %v5299_v38 = vld [vmem:[#allocation2 + $0xd0] sm:$0xff]  }
  0xd5   : > { %4816 = vmatprep.mubr.bf16.mxu1 %v6041_v34  ;;  %4833 = vmatpush3.bf16.msra.mxu1 %v5294_v63  ;;  %v5315_v63 = vld [vmem:[#allocation2 + $0x178] sm:$0xff]  }
  0xd6   : > { %4834 = vmatprep.subr.bf16.mxu1 %v5297_v60 }
  0xd9   : > { %4835 = vmatpush3.bf16.msra.mxu1 %v5297_v60 }
  0xda   : > { %4836 = vmatprep.subr.bf16.mxu1 %v5300_v17 }
  0xdb   : > { %1653 = vmatmul.mubr.bf16.gmra.mrb[64].mxu0 %v5788_v48  ;;  %v1415_v48 = vrot.slane %v5290_v45, 1 }
  0xdc   : > { %4817 = vmatmul.mubr.bf16.gmra.mrb[44].mxu1 %v6050_v9  ;;  %1660 = vmatprep.mubr.bf16.mxu0 %v5861_v30 }
  0xdd   : > { %4820 = vmatprep.mubr.bf16.mxu1 %v510_v29  ;;  %v1417_v21 = vsel %vm489_vm1, %v1415_v48, %v1416_v16  ;;  %4837 = vmatpush3.bf16.msra.mxu1 %v5300_v17  ;;  %v5310_v48 = vld [vmem:[#allocation2 + $0x130] sm:$0xff]  }
  0xe3   : > { %1661 = vmatmul.mubr.bf16.gmra.mrb[68].mxu0 %v5805_v62  ;;  %v1405_v62 = vshll.u32 %v5290_v45, 16 }
  0xe4   : > { %4821 = vmatmul.mubr.bf16.gmra.mrb[48].mxu1 %v513_v36  ;;  %1668 = vmatprep.mubr.bf16.mxu0 %v5894_v56  ;;  %v1410_v56 = vshll.u32 %v5291_v12, 16  ;;  %v5303_v36 = vld [vmem:[#allocation2 + $0x158] sm:$0xff]   ;;  %v5309_v12 = vld [vmem:[#allocation2 + $0x168] sm:$0xff]  }
  0xe5   : > { %4824 = vmatprep.mubr.bf16.mxu1 %v516_v49  ;;  %v1407_v30 = vrot.slane %v1405_v62, 1  ;;  %4838 = vmatprep.subr.bf16.mxu1 %v5303_v36 }
  0xe6   : > { %4839 = vmatpush3.bf16.msra.mxu1 %v5303_v36 }
  0xeb   : > { %1669 = vmatmul.mubr.bf16.gmra.mrb[72].mxu0 %v5825_v13  ;;  %v1403_v13 = vshrl.u32 %v5290_v45, 16 }
  0xec   : > { %4825 = vmatmul.mubr.bf16.gmra.mrb[52].mxu1 %v519_v50  ;;  %1676 = vmatprep.mubr.bf16.mxu0 %v5928_v7  ;;  %v1412_v7 = vrot.slane %v1410_v56, 1  ;;  %v5306_v50 = vld [vmem:[#allocation2 + $0x160] sm:$0xff]  }
  0xed   : > { %4828 = vmatprep.mubr.bf16.mxu1 %v602_v59  ;;  %4840 = vmatprep.subr.bf16.mxu1 %v5306_v50  ;;  %v5308_v59 = vld [vmem:[#allocation2 + $0xe8] sm:$0xff]  }
  0xee   : > { %4841 = vmatpush3.bf16.msra.mxu1 %v5306_v50 }
  0xef   : > { %4842 = vmatprep.subr.bf16.mxu1 %v5309_v12 }
  0xf2   : > { %4843 = vmatpush3.bf16.msra.mxu1 %v5309_v12 }
  0xf3   : > { %1677 = vmatmul.mubr.bf16.gmra.mrb[76].mxu0 %v5847_v23  ;;  %v1408_v23 = vor.u32 %v1407_v30, %v1403_v13 }
  0xf4   : > { %4829 = vmatmul.mubr.bf16.gmra.mrb[56].mxu1 %v1417_v21  ;;  %1684 = vmatprep.mubr.bf16.mxu0 %v5953_v22  ;;  %v5311_v21 = vld [vmem:[#allocation2 + $0xf0] sm:$0xff]  }
  0xf5   : > { %v1413_v22 = vsel %vm358_vm0, %v1408_v23, %v1412_v7  ;;  %v5312_v7 = vld [vmem:[#allocation2 + $0x170] sm:$0xff]  }
  0xf6   : > { %4844 = vmatprep.subr.bf16.mxu1 %v5312_v7 }
  0xf7   : > { %4845 = vmatpush3.bf16.msra.mxu1 %v5312_v7 }
  0xf8   : > { %4846 = vmatprep.subr.bf16.mxu1 %v5315_v63 }
  0xfb   : > { %1685 = vmatmul.mubr.bf16.gmra.mrb[80].mxu0 %v5882_v46  ;;  %v5292_v46 = vld [vmem:[#allocation2 + $0x100] sm:$0xff]   ;;  %4847 = vmatpush3.bf16.msra.mxu1 %v5315_v63 }
  0xfc   : > { %1692 = vmatprep.mubr.bf16.mxu0 %v5971_v42  ;;  %v5293_v42 = vld [vmem:[#allocation2 + $0xc0] sm:$0xff]   ;;  %4484 = vmatprep.subr.bf16.mxu0 %v5292_v46 }
  0xfd   : > { %4485 = vmatpush3.bf16.msra.mxu0 %v5293_v42  ;;  %v5313_v42 = vld [vmem:[#allocation2 + $0x138] sm:$0xff]  }
  0xfe   : > { %4486 = vmatprep.subr.bf16.mxu0 %v5295_v2 }
 0x101   : > { %4487 = vmatpush3.bf16.msra.mxu0 %v5296_v25 }
 0x102   : > { %4488 = vmatprep.subr.bf16.mxu0 %v5298_v4 }
 0x103   : > { %1693 = vmatmul.mubr.bf16.gmra.mrb[84].mxu0 %v5915_v61 }
 0x104   : > { %1700 = vmatprep.mubr.bf16.mxu0 %v5985_v33 }
 0x105   : > { %4489 = vmatpush3.bf16.msra.mxu0 %v5299_v38 }
 0x106   : > { %4490 = vmatprep.subr.bf16.mxu0 %v5301_v24 }
 0x109   : > { %4491 = vmatpush3.bf16.msra.mxu0 %v5302_v31 }
 0x10a   : > { %4492 = vmatprep.subr.bf16.mxu0 %v5304_v37 }
 0x10b   : > { %1701 = vmatmul.mubr.bf16.gmra.mrb[88].mxu0 %v5944_v18 }
 0x10c   : > { %1708 = vmatprep.mubr.bf16.mxu0 %v5998_v3 }
 0x10d   : > { %4493 = vmatpush3.bf16.msra.mxu0 %v5305_v40 }
 0x10e   : > { %4494 = vmatprep.subr.bf16.mxu0 %v5307_v54 }
 0x111   : > { %4495 = vmatpush3.bf16.msra.mxu0 %v5308_v59 }
 0x112   : > { %4496 = vmatprep.subr.bf16.mxu0 %v5310_v48 }
 0x113   : > { %1709 = vmatmul.mubr.bf16.gmra.mrb[92].mxu0 %v5959_v28 }
 0x114   : > { %1716 = vmatprep.mubr.bf16.mxu0 %v1413_v22 }
 0x115   : > { %4497 = vmatpush3.bf16.msra.mxu0 %v5311_v21  ;;  %v1904_v21 = vlaneseq }
 0x116   : > { %4498 = vmatprep.subr.bf16.mxu0 %v5313_v42  ;;  %v6193_v42 = vld [vmem:[#allocation2 + $0x80] sm:$0xff]  }
 0x117   : > { %4864 = vmatprep.subr.bf16.mxu1 %v6193_v42 }
 0x11b   : > { %1717 = vmatmul.mubr.bf16.gmra.mrb[96].mxu0 %v5290_v45 }
 0x12e   : > { %v4218_v61 = vpop.f32.mrb[0].mxu0 }
 0x12f   : > { %v4219_v32 = vpop.f32.mrb[1].mxu0  ;;  %v4312_v33 = vpop.f32.mrb[0].mxu1 }
 0x130   : > { %v6133_v51 = vadd.f32 %v4219_v32, %v4218_v61  ;;  %v4221_v57 = vpop.f32.mrb[2].mxu0  ;;  %v4313_v18 = vpop.f32.mrb[1].mxu1 }
 0x131   : > { %v4222_v0 = vpop.f32.mrb[3].mxu0  ;;  %v6135_v6 = vadd.f32 %v4313_v18, %v4312_v33  ;;  %v4315_v1 = vpop.f32.mrb[2].mxu1 }
 0x132   : > { %v6137_v28 = vadd.f32 %v4222_v0, %v4221_v57  ;;  %v4316_v3 = vpop.f32.mrb[3].mxu1  ;;  %v5314_v57 = vld [vmem:[#allocation2 + $0xf8] sm:$0xff]  }
 0x133   : > { %v6139_v43 = vadd.f32 %v4316_v3, %v4315_v1  ;;  %4499 = vmatpush3.bf16.msra.mxu0 %v5314_v57 }
 0x136   : > { %v4224_v5 = vpop.f32.mrb[4].mxu0 }
 0x137   : > { %v4225_v8 = vpop.f32.mrb[5].mxu0  ;;  %v4318_v10 = vpop.f32.mrb[4].mxu1 }
 0x138   : > { %v6141_v11 = vadd.f32 %v4225_v8, %v4224_v5  ;;  %v4227_v34 = vpop.f32.mrb[6].mxu0  ;;  %v4319_v14 = vpop.f32.mrb[5].mxu1 }
 0x139   : > { %v4228_v9 = vpop.f32.mrb[7].mxu0  ;;  %v6143_v19 = vadd.f32 %v4319_v14, %v4318_v10  ;;  %v4321_v20 = vpop.f32.mrb[6].mxu1 }
 0x13a   : > { %v6145_v26 = vadd.f32 %v4228_v9, %v4227_v34  ;;  %v4322_v29 = vpop.f32.mrb[7].mxu1 }
 0x13b   : > { %v6147_v35 = vadd.f32 %v4322_v29, %v4321_v20 }
 0x13e   : > { %v4230_v39 = vpop.f32.mrb[8].mxu0 }
 0x13f   : > { %v4231_v41 = vpop.f32.mrb[9].mxu0  ;;  %v4324_v44 = vpop.f32.mrb[8].mxu1 }
 0x140   : > { %v6149_v47 = vadd.f32 %v4231_v41, %v4230_v39  ;;  %v4233_v15 = vpop.f32.mrb[10].mxu0  ;;  %v4325_v49 = vpop.f32.mrb[9].mxu1 }
 0x141   : > { %v4234_v52 = vpop.f32.mrb[11].mxu0  ;;  %v6151_v27 = vadd.f32 %v4325_v49, %v4324_v44  ;;  %v4327_v53 = vpop.f32.mrb[10].mxu1 }
 0x142   : > { %v6153_v55 = vadd.f32 %v4234_v52, %v4233_v15  ;;  %v4328_v58 = vpop.f32.mrb[11].mxu1 }
 0x143   : > { %v6155_v45 = vadd.f32 %v4328_v58, %v4327_v53 }
 0x146   : > { %v4236_v16 = vpop.f32.mrb[12].mxu0 }
 0x147   : > { %v4237_v62 = vpop.f32.mrb[13].mxu0  ;;  %v4330_v13 = vpop.f32.mrb[12].mxu1 }
 0x148   : > { %v6157_v30 = vadd.f32 %v4237_v62, %v4236_v16  ;;  %v4239_v56 = vpop.f32.mrb[14].mxu0  ;;  %v4331_v23 = vpop.f32.mrb[13].mxu1 }
 0x149   : > { %v4240_v22 = vpop.f32.mrb[15].mxu0  ;;  %v6159_v46 = vadd.f32 %v4331_v23, %v4330_v13  ;;  %v4333_v61 = vpop.f32.mrb[14].mxu1  ;;  %v6189_v23 = vshrl.u32 %v1904_v21, 7 }
 0x14a   : > { %v6161_v32 = vadd.f32 %v4240_v22, %v4239_v56  ;;  %v4334_v33 = vpop.f32.mrb[15].mxu1 }
 0x14b   : > { %v6163_v18 = vadd.f32 %v4334_v33, %v4333_v61 }
 0x14e   : > { %v4242_v0 = vpop.f32.mrb[16].mxu0 }
 0x14f   : > { %v4243_v1 = vpop.f32.mrb[17].mxu0  ;;  %v4336_v2 = vpop.f32.mrb[16].mxu1 }
 0x150   : > { %v6165_v3 = vadd.f32 %v4243_v1, %v4242_v0  ;;  %v4245_v25 = vpop.f32.mrb[18].mxu0  ;;  %v4337_v60 = vpop.f32.mrb[17].mxu1  ;;  %v1906_v0 = vadd.s32 8, %v6189_v23 }
 0x151   : > { %v4246_v4 = vpop.f32.mrb[19].mxu0  ;;  %v6167_v5 = vadd.f32 %v4337_v60, %v4336_v2  ;;  %v4339_v38 = vpop.f32.mrb[18].mxu1  ;;  %v6204_v60 = vstv %s3846_s5 }
 0x152   : > { %v6169_v8 = vadd.f32 %v4246_v4, %v4245_v25  ;;  %v4340_v10 = vpop.f32.mrb[19].mxu1  ;;  %v1909_v4 = vadd.s32 %v6204_v60, %v1906_v0 }
 0x153   : > { %v6171_v34 = vadd.f32 %v4340_v10, %v4339_v38  ;;  %v5318_v38 = vld [vmem:[#allocation2 + $0x40] sm:$0xff]  }
 0x154   : > { %4564 = vmatprep.subr.bf16.mxu0 %v5318_v38  ;;  %vm1911_vm2 = vcmp.ge.s32.totalorder %v1909_v4, 1  ;;  %vm1913_vm3 = vcmp.le.s32.totalorder %v1909_v4, 16 }
 0x155   : > { %vm1915_vm4 = vmand %vm1911_vm2, %vm1913_vm3 }
 0x156   : > { %v4248_v14 = vpop.f32.mrb[20].mxu0 }
 0x157   : > { %v4249_v17 = vpop.f32.mrb[21].mxu0  ;;  %v4342_v9 = vpop.f32.mrb[20].mxu1 }
 0x158   : > { %v6173_v20 = vadd.f32 %v4249_v17, %v4248_v14  ;;  %v4251_v24 = vpop.f32.mrb[22].mxu0  ;;  %v4343_v29 = vpop.f32.mrb[21].mxu1 }
 0x159   : > { %v4252_v31 = vpop.f32.mrb[23].mxu0  ;;  %v6175_v36 = vadd.f32 %v4343_v29, %v4342_v9  ;;  %v4345_v37 = vpop.f32.mrb[22].mxu1 }
 0x15a   : > { %v6177_v39 = vadd.f32 %v4252_v31, %v4251_v24  ;;  %v4346_v40 = vpop.f32.mrb[23].mxu1 }
 0x15b   : > { %v6179_v41 = vadd.f32 %v4346_v40, %v4345_v37 }
 0x15e   : > { %v4254_v44 = vpop.f32.mrb[24].mxu0 }
 0x15f   : > { %v4255_v15 = vpop.f32.mrb[25].mxu0  ;;  %v4348_v49 = vpop.f32.mrb[24].mxu1 }
 0x160   : > { %v6181_v50 = vadd.f32 %v4255_v15, %v4254_v44  ;;  %v4257_v52 = vpop.f32.mrb[26].mxu0  ;;  %v4349_v53 = vpop.f32.mrb[25].mxu1 }
 0x161   : > { %v4258_v54 = vpop.f32.mrb[27].mxu0  ;;  %v6183_v58 = vadd.f32 %v4349_v53, %v4348_v49  ;;  %v4351_v59 = vpop.f32.mrb[26].mxu1  ;;  %v1924_v53 = vsub.s32 1, %v6189_v23 }
 0x162   : > { %v6185_v12 = vadd.f32 %v4258_v54, %v4257_v52  ;;  %v4352_v48 = vpop.f32.mrb[27].mxu1 }
 0x163   : > { %v6187_v16 = vadd.f32 %v4352_v48, %v4351_v59  ;;  %v5520_v48 = vmov 0  }
 0x164   : > { %v6217_v21 = vsel %vm1915_vm4, 1, %v5520_v48 }
 0x166   : > { %v4260_v62 = vpop.f32.mrb[28].mxu0 }
 0x167   : > { %v4261_v13 = vpop.f32.mrb[29].mxu0  ;;  %v4354_v56 = vpop.f32.mrb[28].mxu1 }
 0x168   : > { %v6191_v7 = vadd.f32 %v4261_v13, %v4260_v62  ;;  %v4263_v22 = vpop.f32.mrb[30].mxu0  ;;  %v4355_v61 = vpop.f32.mrb[29].mxu1 }
 0x169   : > { %v4264_v33 = vpop.f32.mrb[31].mxu0  ;;  %v6195_v57 = vadd.f32 %v4355_v61, %v4354_v56  ;;  %v4357_v63 = vpop.f32.mrb[30].mxu1 }
 0x16a   : > { %v6199_v1 = vadd.f32 %v4264_v33, %v4263_v22  ;;  %v4358_v2 = vpop.f32.mrb[31].mxu1  ;;  %v6222_v22 = vrot.slane %v6217_v21, %v1924_v53 }
 0x16b   : > { %v6202_v25 = vadd.f32 %v4358_v2, %v4357_v63 }
 0x16e   : > { %v4266_v10 = vpop.f32.mrb[32].mxu0 }
 0x16f   : > { %v4267_v14 = vpop.f32.mrb[33].mxu0  ;;  %v4360_v17 = vpop.f32.mrb[32].mxu1 }
 0x170   : > { %v6207_v9 = vadd.f32 %v4267_v14, %v4266_v10  ;;  %v4269_v24 = vpop.f32.mrb[34].mxu0  ;;  %v4361_v29 = vpop.f32.mrb[33].mxu1 }
 0x171   : > { %v4270_v31 = vpop.f32.mrb[35].mxu0  ;;  %v6209_v37 = vadd.f32 %v4361_v29, %v4360_v17  ;;  %v4363_v40 = vpop.f32.mrb[34].mxu1 }
 0x172   : > { %v6211_v44 = vadd.f32 %v4270_v31, %v4269_v24  ;;  %v4364_v15 = vpop.f32.mrb[35].mxu1 }
 0x173   : > { %v6213_v49 = vadd.f32 %v4364_v15, %v4363_v40 }
 0x176   : > { %v4272_v52 = vpop.f32.mrb[36].mxu0 }
 0x177   : > { %v4273_v54 = vpop.f32.mrb[37].mxu0  ;;  %v4366_v59 = vpop.f32.mrb[36].mxu1 }
 0x178   : > { %v4274_v62 = vadd.f32 %v4273_v54, %v4272_v52  ;;  %v4275_v13 = vpop.f32.mrb[38].mxu0  ;;  %v4367_v56 = vpop.f32.mrb[37].mxu1 }
 0x179   : > { %v4276_v61 = vpop.f32.mrb[39].mxu0  ;;  %v4368_v33 = vadd.f32 %v4367_v56, %v4366_v59  ;;  %v4369_v63 = vpop.f32.mrb[38].mxu1 }
 0x17a   : > { %v4277_v0 = vadd.f32 %v4276_v61, %v4275_v13  ;;  %v4370_v2 = vpop.f32.mrb[39].mxu1 }
 0x17b   : > { %v4371_v4 = vadd.f32 %v4370_v2, %v4369_v63 }
 0x17e   : > { %v4742_v38 = vpop.f32.mrb[40].mxu0 }
 0x17f   : > { %v953_v10 = vadd.f32 %v4742_v38, %v6141_v11  ;;  %v944_v14 = vpop.f32.mrb[41].mxu0 }
 0x180   : > { %v945_v17 = vadd.f32 %v6133_v51, %v944_v14  ;;  %v4743_v24 = vpop.f32.mrb[42].mxu0 }
 0x181   : > { %v6227_v29 = vadd.f32 %v6143_v19, %v953_v10  ;;  %v956_v31 = vadd.f32 %v4743_v24, %v6145_v26  ;;  %v947_v40 = vpop.f32.mrb[43].mxu0 }
 0x182   : > { %v6231_v15 = vadd.f32 %v6135_v6, %v945_v17  ;;  %v948_v52 = vadd.f32 %v6137_v28, %v947_v40 }
 0x183   : > { %v6235_v54 = vadd.f32 %v6147_v35, %v956_v31 }
 0x184   : > { %v6238_v11 = vadd.f32 %v6139_v43, %v948_v52 }
 0x186   : > { %v4746_v59 = vpop.f32.mrb[44].mxu0 }
 0x187   : > { %v969_v51 = vadd.f32 %v4746_v59, %v6157_v30  ;;  %v960_v13 = vpop.f32.mrb[45].mxu0 }
 0x188   : > { %v961_v19 = vadd.f32 %v6149_v47, %v960_v13  ;;  %v4747_v56 = vpop.f32.mrb[46].mxu0 }
 0x189   : > { %v6243_v26 = vadd.f32 %v6159_v46, %v969_v51  ;;  %v972_v6 = vadd.f32 %v4747_v56, %v6161_v32  ;;  %v963_v61 = vpop.f32.mrb[47].mxu0 }
 0x18a   : > { %v6247_v28 = vadd.f32 %v6151_v27, %v961_v19  ;;  %v964_v35 = vadd.f32 %v6153_v55, %v963_v61 }
 0x18b   : > { %v6251_v43 = vadd.f32 %v6163_v18, %v972_v6  ;;  %v1920_v6 = vsub.s32 0, %v6189_v23 }
 0x18c   : > { %v6254_v30 = vadd.f32 %v6155_v45, %v964_v35 }
 0x18e   : > { %v4750_v63 = vpop.f32.mrb[48].mxu0 }
 0x18f   : > { %v985_v47 = vadd.f32 %v4750_v63, %v6173_v20  ;;  %v976_v2 = vpop.f32.mrb[49].mxu0  ;;  %v6310_v63 = vld [vmem:[%s6876_s3] ss:$0 sm:$0xff] }
 0x190   : > { %v977_v46 = vadd.f32 %v6165_v3, %v976_v2  ;;  %v4751_v38 = vpop.f32.mrb[50].mxu0 }
 0x191   : > { %v6259_v32 = vadd.f32 %v6175_v36, %v985_v47  ;;  %v988_v27 = vadd.f32 %v4751_v38, %v6177_v39  ;;  %v979_v10 = vpop.f32.mrb[51].mxu0 }
 0x192   : > { %v6263_v55 = vadd.f32 %v6167_v5, %v977_v46  ;;  %v980_v18 = vadd.f32 %v6169_v8, %v979_v10 }
 0x193   : > { %v6267_v45 = vadd.f32 %v6179_v41, %v988_v27 }
 0x194   : > { %v6270_v20 = vadd.f32 %v6171_v34, %v980_v18 }
 0x196   : > { %v4754_v14 = vpop.f32.mrb[52].mxu0 }
 0x197   : > { %v1001_v3 = vadd.f32 %v4754_v14, %v6191_v7  ;;  %v992_v17 = vpop.f32.mrb[53].mxu0 }
 0x198   : > { %v993_v36 = vadd.f32 %v6181_v50, %v992_v17  ;;  %v4755_v24 = vpop.f32.mrb[54].mxu0 }
 0x199   : > { %v6275_v39 = vadd.f32 %v6195_v57, %v1001_v3  ;;  %v1004_v5 = vadd.f32 %v4755_v24, %v6199_v1  ;;  %v995_v31 = vpop.f32.mrb[55].mxu0  ;;  %v1908_v1 = vadd.s32 %v6204_v60, %v6189_v23 }
 0x19a   : > { %v6279_v8 = vadd.f32 %v6183_v58, %v993_v36  ;;  %v996_v41 = vadd.f32 %v6185_v12, %v995_v31 }
 0x19b   : > { %v6283_v34 = vadd.f32 %v6202_v25, %v1004_v5  ;;  %vm1910_vm5 = vcmp.ge.s32.totalorder %v1908_v1, 1  ;;  %vm1912_vm6 = vcmp.le.s32.totalorder %v1908_v1, 16 }
 0x19c   : > { %v6286_v7 = vadd.f32 %v6187_v16, %v996_v41  ;;  %vm1914_vm7 = vmand %vm1910_vm5, %vm1912_vm6  ;;  %vm1967_vm6 = vcmp.ne.s32.totalorder %v6222_v22, 0 }
 0x19e   : > { %v4758_v40 = vpop.f32.mrb[56].mxu0 }
 0x19f   : > { %v1017_v50 = vadd.f32 %v4758_v40, %v4274_v62  ;;  %v1008_v52 = vpop.f32.mrb[57].mxu0 }
 0x1a0   : > { %v1009_v57 = vadd.f32 %v6207_v9, %v1008_v52  ;;  %v4759_v59 = vpop.f32.mrb[58].mxu0 }
 0x1a1   : > { %v6291_v51 = vadd.f32 %v4368_v33, %v1017_v50  ;;  %v1020_v58 = vadd.f32 %v4759_v59, %v4277_v0  ;;  %v1011_v13 = vpop.f32.mrb[59].mxu0 }
 0x1a2   : > { %v6294_v12 = vadd.f32 %v6209_v37, %v1009_v57  ;;  %v1012_v25 = vadd.f32 %v6211_v44, %v1011_v13 }
 0x1a3   : > { %v6297_v16 = vadd.f32 %v4371_v4, %v1020_v58  ;;  %v6305_v4 = vsel %vm1914_vm7, 1, %v5520_v48 }
 0x1a4   : > { %v6300_v62 = vadd.f32 %v6213_v49, %v1012_v25  ;;  %v1921_v46 = vrot.slane %v6305_v4, %v1920_v6  ;;  %v1925_v58 = vrot.slane %v6305_v4, %v1924_v53 }
 0x1a6   : > { %v4406_v9 = vpop.f32.mrb[60].mxu0  ;;  %vm1958_vm8 = vcmp.ne.s32.totalorder %v1921_v46, 0  ;;  %vm1959_vm9 = vcmp.ne.s32.totalorder %v1925_v58, 0 }
 0x1a7   : > { %v4814_v19 = vpop.f32.mrb[40].mxu1  ;;  %v4407_v56 = vpop.f32.mrb[61].mxu0 }
 0x1a8   : > { %v4408_v60 = vadd.f32 %v4407_v56, %v4406_v9  ;;  %v1759_v33 = vpop.f32.mrb[41].mxu1  ;;  %v4409_v0 = vpop.f32.mrb[62].mxu0 }
 0x1a9   : > { %v4815_v37 = vpop.f32.mrb[42].mxu1  ;;  %v4410_v61 = vpop.f32.mrb[63].mxu0 }
 0x1aa   : > { %v4934_v44 = vadd.f32 %v4408_v60, %v6231_v15  ;;  %v4411_v49 = vadd.f32 %v4410_v61, %v4409_v0  ;;  %v1762_v35 = vpop.f32.mrb[43].mxu1  ;;  %v1928_v61 = vsub.s32 2, %v6189_v23 }
 0x1ac   : > { %v4935_v47 = vadd.f32 %v4934_v44, %v1759_v33  ;;  %v4942_v2 = vadd.f32 %v4411_v49, %v6238_v11 }
 0x1ae   : > { %v1864_v38 = vadd.f32 %v4935_v47, %v6310_v63  ;;  %v4943_v15 = vadd.f32 %v4942_v2, %v1762_v35  ;;  %v4412_v27 = vpop.f32.mrb[64].mxu0 }
 0x1af   : > { %v6317_v48 = vpop.f32.mrb[44].mxu1  ;;  %v4413_v10 = vpop.f32.mrb[65].mxu0 }
 0x1b0   : > { %v1884_v18 = vmax.f32 %v1864_v38, 0.0  ;;  %v1865_v14 = vadd.f32 %v4943_v15, %v6310_v63  ;;  %v4414_v3 = vadd.f32 %v4413_v10, %v4412_v27  ;;  %v1775_v17 = vpop.f32.mrb[45].mxu1  ;;  %v4415_v36 = vpop.f32.mrb[66].mxu0  ;;  %v1929_v10 = vrot.slane %v6305_v4, %v1928_v61 }
 0x1b1   : > { %v6320_v24 = vpop.f32.mrb[46].mxu1  ;;  %v4416_v11 = vpop.f32.mrb[67].mxu0 }
 0x1b2   : > { %v1885_v5 = vmax.f32 %v1865_v14, 0.0  ;;  %v4930_v31 = vadd.f32 %v4414_v3, %v6227_v29  ;;  %v4417_v41 = vadd.f32 %v4416_v11, %v4415_v36  ;;  %v1778_v40 = vpop.f32.mrb[47].mxu1  ;;  %v1988_v50 = vsel %vm1958_vm8, %v1884_v18, 0.0 }
 0x1b3   : > { %v1932_v18 = vsub.s32 3, %v6189_v23  ;;  %vm1960_vm12 = vcmp.ne.s32.totalorder %v1929_v10, 0 }
 0x1b4   : > { %v1989_v52 = vsel %vm1958_vm8, %v1885_v5, 0.0  ;;  %v4931_v57 = vadd.f32 %v4930_v31, %v4814_v19  ;;  %v4938_v59 = vadd.f32 %v4417_v41, %v6235_v54 }
 0x1b5   : > { %v6324_v1 = vpack.c.bf16 %v1989_v52, %v1988_v50 }
 0x1b6   : > { %v1866_v13 = vadd.f32 %v4931_v57, %v6310_v63  ;;  %v4939_v25 = vadd.f32 %v4938_v59, %v4815_v37  ;;  %v4418_v9 = vpop.f32.mrb[68].mxu0  ;;  %v1933_v57 = vrot.slane %v6305_v4, %v1932_v18 }
 0x1b7   : > { %v6330_v56 = vpop.f32.mrb[48].mxu1  ;;  %v4419_v29 = vpop.f32.mrb[69].mxu0 }
 0x1b8   : > { %v1886_v60 = vmax.f32 %v1866_v13, 0.0  ;;  %v1867_v33 = vadd.f32 %v4939_v25, %v6310_v63  ;;  %v4420_v0 = vadd.f32 %v4419_v29, %v4418_v9  ;;  %v6333_v19 = vpop.f32.mrb[49].mxu1  ;;  %v4421_v54 = vpop.f32.mrb[70].mxu0  ;;  %vm1961_vm14 = vcmp.ne.s32.totalorder %v1933_v57, 0 }
 0x1b9   : > { %v6336_v44 = vpop.f32.mrb[50].mxu1  ;;  %v4422_v53 = vpop.f32.mrb[71].mxu0 }
 0x1ba   : > { %v1887_v49 = vmax.f32 %v1867_v33, 0.0  ;;  %v4950_v37 = vadd.f32 %v4420_v0, %v6247_v28  ;;  %v4423_v35 = vadd.f32 %v4422_v53, %v4421_v54  ;;  %v6339_v47 = vpop.f32.mrb[51].mxu1  ;;  %v1990_v2 = vsel %vm1959_vm9, %v1886_v60, 0.0 }
 0x1bc   : > { %v1991_v46 = vsel %vm1959_vm9, %v1887_v49, 0.0  ;;  %v4951_v38 = vadd.f32 %v4950_v37, %v1775_v17  ;;  %v4958_v15 = vadd.f32 %v4423_v35, %v6254_v30  ;;  %v1936_v35 = vsub.s32 4, %v6189_v23 }
 0x1bd   : > { %v2009_v27 = vpack.c.bf16 %v1991_v46, %v1990_v2 }
 0x1be   : > { %v1868_v14 = vadd.f32 %v4951_v38, %v6310_v63  ;;  %v4959_v3 = vadd.f32 %v4958_v15, %v1778_v40  ;;  %v4424_v36 = vpop.f32.mrb[72].mxu0 }
 0x1bf   : > { %v6345_v28 = vpop.f32.mrb[52].mxu1  ;;  %v4425_v11 = vpop.f32.mrb[73].mxu0  ;;  %v2026_v5 = vshrl.u32 %v2009_v27, 16  ;;  %v2029_v52 = vshll.u32 %v2009_v27, 16 }
 0x1c0   : > { %v1888_v31 = vmax.f32 %v1868_v14, 0.0  ;;  %v1869_v17 = vadd.f32 %v4959_v3, %v6310_v63  ;;  %v4426_v41 = vadd.f32 %v4425_v11, %v4424_v36  ;;  %v6348_v30 = vpop.f32.mrb[53].mxu1  ;;  %v4427_v50 = vpop.f32.mrb[74].mxu0  ;;  %v1940_v3 = vsub.s32 5, %v6189_v23 }
 0x1c1   : > { %v6351_v59 = vpop.f32.mrb[54].mxu1  ;;  %v4428_v40 = vpop.f32.mrb[75].mxu0  ;;  %v2028_v58 = vrot.slane %v2026_v5, 7 }
 0x1c2   : > { %v1889_v13 = vmax.f32 %v1869_v17, 0.0  ;;  %v4946_v9 = vadd.f32 %v4426_v41, %v6243_v26  ;;  %v4429_v29 = vadd.f32 %v4428_v40, %v4427_v50  ;;  %v6360_v60 = vpop.f32.mrb[55].mxu1  ;;  %v1992_v54 = vsel %vm1960_vm12, %v1888_v31, 0.0 }
 0x1c3   : > { %v2031_v33 = vor.u32 %v2029_v52, %v2028_v58  ;;  %v2122_v0 = vsel %vm6355_vm13, %v2028_v58, 0 }
 0x1c4   : > { %v1993_v61 = vsel %vm1960_vm12, %v1889_v13, 0.0  ;;  %v4947_v53 = vadd.f32 %v4946_v9, %v6317_v48  ;;  %v4954_v49 = vadd.f32 %v4429_v29, %v6251_v43  ;;  %v2255_v27 = vrot.slane %v2122_v0, 1 }
 0x1c5   : > { %v2010_v37 = vpack.c.bf16 %v1993_v61, %v1992_v54  ;;  %v6369_v26 = vsel %vm6355_vm13, 0, %v2031_v33  ;;  %v2151_v14 = vshll.u32 %v2122_v0, 16  ;;  %v1937_v33 = vrot.slane %v6305_v4, %v1936_v35 }
 0x1c6   : > { %v1870_v2 = vadd.f32 %v4947_v53, %v6310_v63  ;;  %v4955_v46 = vadd.f32 %v4954_v49, %v6320_v24  ;;  %v4430_v38 = vpop.f32.mrb[76].mxu0  ;;  %v2254_v15 = vrot.slane %v6369_v26, 1  ;;  %v2146_v18 = vshll.u32 %v6369_v26, 16 }
 0x1c7   : > { %v2033_v10 = vshrl.u32 %v2010_v37, 16  ;;  %v6374_v48 = vpop.f32.mrb[56].mxu1  ;;  %v4431_v43 = vpop.f32.mrb[77].mxu0  ;;  %v2036_v50 = vshll.u32 %v2010_v37, 16  ;;  %v2144_v58 = vshrl.u32 %v6369_v26, 16  ;;  %v2153_v49 = vrot.slane %v2151_v14, 1 }
 0x1c8   : > { %v1890_v36 = vmax.f32 %v1870_v2, 0.0  ;;  %v1871_v11 = vadd.f32 %v4955_v46, %v6310_v63  ;;  %v4432_v5 = vadd.f32 %v4431_v43, %v4430_v38  ;;  %v6379_v31 = vpop.f32.mrb[57].mxu1  ;;  %v4433_v24 = vpop.f32.mrb[78].mxu0  ;;  %v6382_v17 = vsel %vm489_vm1, %v2254_v15, %v2255_v27 }
 0x1c9   : > { %v2035_v41 = vrot.slane %v2033_v10, 7  ;;  %v6384_v52 = vpop.f32.mrb[58].mxu1  ;;  %v4434_v40 = vpop.f32.mrb[79].mxu0  ;;  %4848 = vmatprep.mubr.bf16.mxu1 %v6382_v17  ;;  %v2148_v13 = vrot.slane %v2146_v18, 1  ;;  %v6406_v43 = vrot.slane %v6305_v4, %v1940_v3  ;;  %v5321_v18 = vld [vmem:[#allocation2 + $0x48] sm:$0xff]   ;;  %vm1962_vm15 = vcmp.ne.s32.totalorder %v1937_v33, 0 }
 0x1ca   : > { %v1891_v9 = vmax.f32 %v1871_v11, 0.0  ;;  %v4966_v29 = vadd.f32 %v4432_v5, %v6263_v55  ;;  %v4435_v0 = vadd.f32 %v4434_v40, %v4433_v24  ;;  %v6390_v54 = vpop.f32.mrb[59].mxu1  ;;  %v1994_v2 = vsel %vm1961_vm14, %v1890_v36, 0.0  ;;  %v5319_v55 = vld [vmem:[#allocation2] sm:$0xff]  }
 0x1cb   : > { %v2038_v61 = vor.u32 %v2036_v50, %v2035_v41  ;;  %v2149_v53 = vor.u32 %v2148_v13, %v2144_v58  ;;  %v2123_v37 = vsel %vm6355_vm13, %v2035_v41, 0  ;;  %v5317_v41 = vld [vmem:[#allocation2 + $0x88] sm:$0xff]   ;;  %vm1963_vm2 = vcmp.ne.s32.totalorder %v6406_v43, 0 }
 0x1cc   : > { %v1995_v46 = vsel %vm1961_vm14, %v1891_v9, 0.0  ;;  %v4967_v38 = vadd.f32 %v4966_v29, %v6333_v19  ;;  %v4974_v15 = vadd.f32 %v4435_v0, %v6270_v20  ;;  %v2258_v36 = vrot.slane %v2123_v37, 1  ;;  %v5322_v9 = vld [vmem:[#allocation2 + $0x8] sm:$0xff]  }
 0x1cd   : > { %v6400_v35 = vsel %vm6355_vm13, 0, %v2038_v61  ;;  %v2011_v27 = vpack.c.bf16 %v1995_v46, %v1994_v2  ;;  %v6403_v10 = vsel %vm358_vm0, %v2149_v53, %v2153_v49  ;;  %v2163_v24 = vshll.u32 %v2123_v37, 16  ;;  %v5324_v37 = vld [vmem:[#allocation2 + $0x50] sm:$0xff]   ;;  %v5333_v43 = vld [vmem:[#allocation2 + $0x68] sm:$0xff]  }
 0x1ce   : > { %v1872_v57 = vadd.f32 %v4967_v38, %v6310_v63  ;;  %v4975_v14 = vadd.f32 %v4974_v15, %v6339_v47  ;;  %2575 = vmatprep.mubr.bf16.mxu0 %v6403_v10  ;;  %v4436_v20 = vpop.f32.mrb[80].mxu0  ;;  %v2257_v19 = vrot.slane %v6400_v35, 1  ;;  %v2158_v5 = vshll.u32 %v6400_v35, 16 }
 0x1cf   : > { %2576 = vmatmul.mubr.bf16.vlgmr.msra.gmra.mrb[100].mxu0 %v6369_v26  ;;  %v4437_v11 = vpop.f32.mrb[81].mxu0  ;;  %v2040_v3 = vshrl.u32 %v2011_v27, 16  ;;  %v2043_v29 = vshll.u32 %v2011_v27, 16  ;;  %v2156_v61 = vshrl.u32 %v6400_v35, 16 }
 0x1d0   : > { %v1892_v50 = vmax.f32 %v1872_v57, 0.0  ;;  %v1873_v40 = vadd.f32 %v4975_v14, %v6310_v63  ;;  %v4438_v58 = vadd.f32 %v4437_v11, %v4436_v20  ;;  %v4439_v47 = vpop.f32.mrb[82].mxu0  ;;  %v6416_v13 = vsel %vm489_vm1, %v2257_v19, %v2258_v36  ;;  %4565 = vmatpush3.bf16.msra.mxu0 %v5319_v55  ;;  %v5320_v14 = vld [vmem:[#allocation2 + $0x90] sm:$0xff]  }
 0x1d1   : > { %v4440_v0 = vpop.f32.mrb[83].mxu0  ;;  %4849 = vmatmul.mubr.bf16.vlgmr.msra.gmra.mrb[60].mxu1 %v6416_v13  ;;  %v2160_v53 = vrot.slane %v2158_v5, 1  ;;  %v2042_v49 = vrot.slane %v2040_v3, 7  ;;  %4566 = vmatprep.subr.bf16.mxu0 %v5321_v18  ;;  %v2165_v55 = vrot.slane %v2163_v24, 1  ;;  %v5325_v36 = vld [vmem:[#allocation2 + $0x10] sm:$0xff]   ;;  %v1944_v5 = vsub.s32 6, %v6189_v23 }
 0x1d2   : > { %v1893_v2 = vmax.f32 %v1873_v40, 0.0  ;;  %v4962_v46 = vadd.f32 %v4438_v58, %v6259_v32  ;;  %v4441_v38 = vadd.f32 %v4440_v0, %v4439_v47  ;;  %4865 = vmatpush3.bf16.msra.mxu1 %v6193_v42  ;;  %v1996_v20 = vsel %vm1962_vm15, %v1892_v50, 0.0  ;;  %v5327_v3 = vld [vmem:[#allocation2 + $0x58] sm:$0xff]  }
 0x1d3   : > { %v2161_v15 = vor.u32 %v2160_v53, %v2156_v61  ;;  %v2045_v27 = vor.u32 %v2043_v29, %v2042_v49  ;;  %v2124_v57 = vsel %vm6355_vm13, %v2042_v49, 0  ;;  %4866 = vmatprep.subr.bf16.mxu1 %v5317_v41  ;;  %v1948_v29 = vsub.s32 7, %v6189_v23  ;;  %v5323_v61 = vld [vmem:[#allocation2 + $0x98] sm:$0xff]  }
 0x1d4   : > { %v1997_v18 = vsel %vm1962_vm15, %v1893_v2, 0.0  ;;  %v4963_v19 = vadd.f32 %v4962_v46, %v6330_v56  ;;  %v4970_v32 = vadd.f32 %v4441_v38, %v6267_v45  ;;  %4567 = vmatpush3.bf16.msra.mxu0 %v5322_v9  ;;  %v2261_v40 = vrot.slane %v2124_v57, 1 }
 0x1d5   : > { %v2012_v11 = vpack.c.bf16 %v1997_v18, %v1996_v20  ;;  %v6430_v42 = vsel %vm358_vm0, %v2161_v15, %v2165_v55  ;;  %v6435_v24 = vsel %vm6355_vm13, 0, %v2045_v27  ;;  %4568 = vmatprep.subr.bf16.mxu0 %v5324_v37  ;;  %v2175_v9 = vshll.u32 %v2124_v57, 16  ;;  %v5330_v57 = vld [vmem:[#allocation2 + $0x60] sm:$0xff]  }
 0x1d6   : > { %v1874_v33 = vadd.f32 %v4963_v19, %v6310_v63  ;;  %v4971_v56 = vadd.f32 %v4970_v32, %v6336_v44  ;;  %2583 = vmatprep.mubr.bf16.mxu0 %v6430_v42  ;;  %v4442_v45 = vpop.f32.mrb[84].mxu0  ;;  %v2260_v50 = vrot.slane %v6435_v24, 1  ;;  %4867 = vmatpush3.bf16.msra.mxu1 %v5317_v41  ;;  %v2170_v47 = vshll.u32 %v6435_v24, 16  ;;  %v5328_v41 = vld [vmem:[#allocation2 + $0x18] sm:$0xff]  }
 0x1d7   : > { %2584 = vmatmul.mubr.bf16.gmra.mrb[104].mxu0 %v6400_v35  ;;  %v4443_v58 = vpop.f32.mrb[85].mxu0  ;;  %v2047_v0 = vshrl.u32 %v2012_v11, 16  ;;  %4868 = vmatprep.subr.bf16.mxu1 %v5320_v14  ;;  %v2050_v46 = vshll.u32 %v2012_v11, 16  ;;  %v2168_v15 = vshrl.u32 %v6435_v24, 16  ;;  %v6452_v19 = vrot.slane %v6305_v4, %v1944_v5 }
 0x1d8   : > { %v1894_v53 = vmax.f32 %v1874_v33, 0.0  ;;  %v1875_v44 = vadd.f32 %v4971_v56, %v6310_v63  ;;  %v4444_v49 = vadd.f32 %v4443_v58, %v4442_v45  ;;  %v4445_v37 = vpop.f32.mrb[86].mxu0  ;;  %v6446_v2 = vsel %vm489_vm1, %v2260_v50, %v2261_v40  ;;  %4569 = vmatpush3.bf16.msra.mxu0 %v5325_v36  ;;  %v5326_v45 = vld [vmem:[#allocation2 + $0xa0] sm:$0xff]  }
 0x1d9   : > { %v4446_v38 = vpop.f32.mrb[87].mxu0  ;;  %4852 = vmatprep.mubr.bf16.mxu1 %v6446_v2  ;;  %v2172_v55 = vrot.slane %v2170_v47, 1  ;;  %v2049_v27 = vrot.slane %v2047_v0, 7  ;;  %4570 = vmatprep.subr.bf16.mxu0 %v5327_v3  ;;  %v2177_v33 = vrot.slane %v2175_v9, 1  ;;  %v6466_v47 = vrot.slane %v6305_v4, %v1948_v29 }
 0x1da   : > { %v1895_v20 = vmax.f32 %v1875_v44, 0.0  ;;  %v4982_v18 = vadd.f32 %v4444_v49, %v6279_v8  ;;  %v4447_v32 = vadd.f32 %v4446_v38, %v4445_v37  ;;  %4869 = vmatpush3.bf16.msra.mxu1 %v5320_v14  ;;  %v1998_v3 = vsel %vm1963_vm2, %v1894_v53, 0.0  ;;  %v5331_v14 = vld [vmem:[#allocation2 + $0x20] sm:$0xff]  }
 0x1db   : > { %v2173_v36 = vor.u32 %v2172_v55, %v2168_v15  ;;  %v2052_v11 = vor.u32 %v2050_v46, %v2049_v27  ;;  %v2125_v56 = vsel %vm6355_vm13, %v2049_v27, 0  ;;  %4870 = vmatprep.subr.bf16.mxu1 %v5323_v61  ;;  %vm1964_vm3 = vcmp.ne.s32.totalorder %v6452_v19, 0  ;;  %v5339_v19 = vld [vmem:[#allocation2 + $0x78] sm:$0xff]  }
 0x1dc   : > { %v1999_v50 = vsel %vm1963_vm2, %v1895_v20, 0.0  ;;  %v4983_v8 = vadd.f32 %v4982_v18, %v6348_v30  ;;  %v4990_v5 = vadd.f32 %v4447_v32, %v6286_v7  ;;  %4571 = vmatpush3.bf16.msra.mxu0 %v5328_v41  ;;  %v2264_v44 = vrot.slane %v2125_v56, 1  ;;  %v5329_v41 = vld [vmem:[#allocation2 + $0xa8] sm:$0xff]  }
 0x1dd   : > { %v2013_v40 = vpack.c.bf16 %v1999_v50, %v1998_v3  ;;  %v6463_v58 = vsel %vm358_vm0, %v2173_v36, %v2177_v33  ;;  %v6470_v9 = vsel %vm6355_vm13, 0, %v2052_v11  ;;  %4572 = vmatprep.subr.bf16.mxu0 %v5330_v57  ;;  %v2187_v49 = vshll.u32 %v2125_v56, 16  ;;  %v5336_v36 = vld [vmem:[#allocation2 + $0x70] sm:$0xff]  }
 0x1de   : > { %v1876_v0 = vadd.f32 %v4983_v8, %v6310_v63  ;;  %v4991_v30 = vadd.f32 %v4990_v5, %v6360_v60  ;;  %2591 = vmatprep.mubr.bf16.mxu0 %v6463_v58  ;;  %v4448_v7 = vpop.f32.mrb[88].mxu0  ;;  %v2263_v53 = vrot.slane %v6470_v9, 1  ;;  %4871 = vmatpush3.bf16.msra.mxu1 %v5323_v61  ;;  %v2182_v29 = vshll.u32 %v6470_v9, 16  ;;  %v5334_v61 = vld [vmem:[#allocation2 + $0x28] sm:$0xff]  }
 0x1df   : > { %2592 = vmatmul.mubr.bf16.gmra.mrb[108].mxu0 %v6435_v24  ;;  %v4449_v4 = vpop.f32.mrb[89].mxu0  ;;  %v2054_v37 = vshrl.u32 %v2013_v40, 16  ;;  %4872 = vmatprep.subr.bf16.mxu1 %v5326_v45  ;;  %v2057_v27 = vshll.u32 %v2013_v40, 16  ;;  %v2180_v20 = vshrl.u32 %v6470_v9, 16  ;;  %vm1965_vm4 = vcmp.ne.s32.totalorder %v6466_v47, 0 }
 0x1e0   : > { %v1896_v46 = vmax.f32 %v1876_v0, 0.0  ;;  %v1877_v60 = vadd.f32 %v4991_v30, %v6310_v63  ;;  %v4450_v38 = vadd.f32 %v4449_v4, %v4448_v7  ;;  %v4451_v15 = vpop.f32.mrb[90].mxu0  ;;  %v6481_v55 = vsel %vm489_vm1, %v2263_v53, %v2264_v44  ;;  %4573 = vmatpush3.bf16.msra.mxu0 %v5331_v14  ;;  %v5332_v14 = vld [vmem:[#allocation2 + $0xb0] sm:$0xff]  }
 0x1e1   : > { %v4452_v57 = vpop.f32.mrb[91].mxu0  ;;  %4853 = vmatmul.mubr.bf16.gmra.mrb[64].mxu1 %v6481_v55  ;;  %v2184_v18 = vrot.slane %v2182_v29, 1  ;;  %v2056_v32 = vrot.slane %v2054_v37, 7  ;;  %4574 = vmatprep.subr.bf16.mxu0 %v5333_v43  ;;  %v2189_v50 = vrot.slane %v2187_v49, 1  ;;  %v6501_v53 = vrot.slane %v6217_v21, %v1920_v6 }
 0x1e2   : > { %v1897_v33 = vmax.f32 %v1877_v60, 0.0  ;;  %v4978_v11 = vadd.f32 %v4450_v38, %v6275_v39  ;;  %v4453_v56 = vadd.f32 %v4452_v57, %v4451_v15  ;;  %4873 = vmatpush3.bf16.msra.mxu1 %v5326_v45  ;;  %v2000_v40 = vsel %vm1964_vm3, %v1896_v46, 0.0  ;;  %v5337_v45 = vld [vmem:[#allocation2 + $0x30] sm:$0xff]   ;;  %v5335_v60 = vld [vmem:[#allocation2 + $0xb8] sm:$0xff]  }
 0x1e3   : > { %v2185_v3 = vor.u32 %v2184_v18, %v2180_v20  ;;  %v2059_v8 = vor.u32 %v2057_v27, %v2056_v32  ;;  %v2126_v5 = vsel %vm6355_vm13, %v2056_v32, 0  ;;  %4874 = vmatprep.subr.bf16.mxu1 %v5329_v41  ;;  %v2019_v23 = vshrl.u32 %v6324_v1, 16 }
 0x1e4   : > { %v2001_v43 = vsel %vm1964_vm3, %v1897_v33, 0.0  ;;  %v4979_v39 = vadd.f32 %v4978_v11, %v6345_v28  ;;  %v4986_v0 = vadd.f32 %v4453_v56, %v6283_v34  ;;  %4575 = vmatpush3.bf16.msra.mxu0 %v5334_v61  ;;  %v2267_v49 = vrot.slane %v2126_v5, 1 }
 0x1e5   : > { %v2014_v30 = vpack.c.bf16 %v2001_v43, %v2000_v40  ;;  %v6496_v7 = vsel %vm358_vm0, %v2185_v3, %v2189_v50  ;;  %v6505_v44 = vsel %vm6355_vm13, 0, %v2059_v8  ;;  %4576 = vmatprep.subr.bf16.mxu0 %v5336_v36  ;;  %v2199_v37 = vshll.u32 %v2126_v5, 16  ;;  %v5338_v40 = vld [vmem:[#allocation2 + $0x1c0] sm:$0xff]  }
 0x1e6   : > { %v1878_v28 = vadd.f32 %v4979_v39, %v6310_v63  ;;  %v4987_v34 = vadd.f32 %v4986_v0, %v6351_v59  ;;  %2599 = vmatprep.mubr.bf16.mxu0 %v6496_v7  ;;  %v4454_v4 = vpop.f32.mrb[92].mxu0  ;;  %v2266_v29 = vrot.slane %v6505_v44, 1  ;;  %4875 = vmatpush3.bf16.msra.mxu1 %v5329_v41  ;;  %v2194_v6 = vshll.u32 %v6505_v44, 16  ;;  %v5341_v41 = vld [vmem:[#allocation2 + $0x38] sm:$0xff]  }
 0x1e7   : > { %2600 = vmatmul.mubr.bf16.gmra.mrb[112].mxu0 %v6470_v9  ;;  %v4455_v21 = vpop.f32.mrb[93].mxu0  ;;  %v2061_v46 = vshrl.u32 %v2014_v30, 16  ;;  %4876 = vmatprep.subr.bf16.mxu1 %v5332_v14  ;;  %v2064_v57 = vshll.u32 %v2014_v30, 16  ;;  %v2192_v18 = vshrl.u32 %v6505_v44, 16  ;;  %vm1966_vm5 = vcmp.ne.s32.totalorder %v6501_v53, 0 }
 0x1e8   : > { %v1898_v38 = vmax.f32 %v1878_v28, 0.0  ;;  %v1879_v59 = vadd.f32 %v4987_v34, %v6310_v63  ;;  %v4456_v15 = vadd.f32 %v4455_v21, %v4454_v4  ;;  %v4457_v61 = vpop.f32.mrb[94].mxu0  ;;  %v6516_v27 = vsel %vm489_vm1, %v2266_v29, %v2267_v49  ;;  %4577 = vmatpush3.bf16.msra.mxu0 %v5337_v45 }
 0x1e9   : > { %v4458_v20 = vpop.f32.mrb[95].mxu0  ;;  %4856 = vmatprep.mubr.bf16.mxu1 %v6516_v27  ;;  %v2196_v32 = vrot.slane %v2194_v6, 1  ;;  %v2063_v36 = vrot.slane %v2061_v46, 7  ;;  %4578 = vmatprep.subr.bf16.mxu0 %v5339_v19  ;;  %v2201_v50 = vrot.slane %v2199_v37, 1  ;;  %v2022_v4 = vshll.u32 %v6324_v1, 16 }
 0x1ea   : > { %v1899_v33 = vmax.f32 %v1879_v59, 0.0  ;;  %v4998_v11 = vadd.f32 %v4456_v15, %v6294_v12  ;;  %v4459_v56 = vadd.f32 %v4458_v20, %v4457_v61  ;;  %4877 = vmatpush3.bf16.msra.mxu1 %v5332_v14  ;;  %v2002_v43 = vsel %vm1965_vm4, %v1898_v38, 0.0 }
 0x1eb   : > { %v2197_v3 = vor.u32 %v2196_v32, %v2192_v18  ;;  %v2066_v8 = vor.u32 %v2064_v57, %v2063_v36  ;;  %v2127_v5 = vsel %vm6355_vm13, %v2063_v36, 0  ;;  %4878 = vmatprep.subr.bf16.mxu1 %v5335_v60  ;;  %v6530_v14 = vrot.slane %v2019_v23, 7 }
 0x1ec   : > { %v2003_v39 = vsel %vm1965_vm4, %v1899_v33, 0.0  ;;  %v4999_v12 = vadd.f32 %v4998_v11, %v6379_v31  ;;  %v5006_v0 = vadd.f32 %v4459_v56, %v6300_v62  ;;  %4579 = vmatpush3.bf16.msra.mxu0 %v5341_v41  ;;  %v2270_v34 = vrot.slane %v2127_v5, 1 }
 0x1ed   : > { %v2015_v45 = vpack.c.bf16 %v2003_v39, %v2002_v43  ;;  %v6533_v30 = vsel %vm358_vm0, %v2197_v3, %v2201_v50  ;;  %v6537_v19 = vsel %vm6355_vm13, 0, %v2066_v8  ;;  %v2211_v23 = vshll.u32 %v2127_v5, 16 }
 0x1ee   : > { %v1880_v28 = vadd.f32 %v4999_v12, %v6310_v63  ;;  %v5007_v47 = vadd.f32 %v5006_v0, %v6390_v54  ;;  %2607 = vmatprep.mubr.bf16.mxu0 %v6533_v30  ;;  %v4460_v31 = vpop.f32.mrb[96].mxu0  ;;  %v2269_v62 = vrot.slane %v6537_v19, 1  ;;  %4879 = vmatpush3.bf16.msra.mxu1 %v5335_v60  ;;  %v2206_v49 = vshll.u32 %v6537_v19, 16 }
 0x1ef   : > { %2608 = vmatmul.mubr.bf16.gmra.mrb[116].mxu0 %v6505_v44  ;;  %v4461_v29 = vpop.f32.mrb[97].mxu0  ;;  %v2068_v21 = vshrl.u32 %v2015_v45, 16  ;;  %4644 = vmatprep.subr.bf16.mxu1 %v5338_v40  ;;  %v2071_v59 = vshll.u32 %v2015_v45, 16  ;;  %v2204_v1 = vshrl.u32 %v6537_v19, 16  ;;  %v2024_v41 = vor.u32 %v2022_v4, %v6530_v14 }
 0x1f0   : > { %v1900_v6 = vmax.f32 %v1880_v28, 0.0  ;;  %v1881_v54 = vadd.f32 %v5007_v47, %v6310_v63  ;;  %v4462_v37 = vadd.f32 %v4461_v29, %v4460_v31  ;;  %v4463_v46 = vpop.f32.mrb[98].mxu0  ;;  %v6548_v38 = vsel %vm489_vm1, %v2269_v62, %v2270_v34 }
 0x1f1   : > { %v4464_v60 = vpop.f32.mrb[99].mxu0  ;;  %4857 = vmatmul.mubr.bf16.gmra.mrb[68].mxu1 %v6548_v38  ;;  %v2208_v15 = vrot.slane %v2206_v49, 1  ;;  %v2070_v61 = vrot.slane %v2068_v21, 7  ;;  %v2213_v36 = vrot.slane %v2211_v23, 1  ;;  %v2111_v45 = vsel %vm6355_vm13, 0, %v2024_v41 }
 0x1f2   : > { %v1901_v57 = vmax.f32 %v1881_v54, 0.0  ;;  %v4994_v20 = vadd.f32 %v4462_v37, %v6291_v51  ;;  %v4465_v18 = vadd.f32 %v4464_v60, %v4463_v46  ;;  %v2004_v56 = vsel %vm1966_vm5, %v1900_v6, 0.0 }
 0x1f3   : > { %v2209_v32 = vor.u32 %v2208_v15, %v2204_v1  ;;  %v2073_v33 = vor.u32 %v2071_v59, %v2070_v61  ;;  %v2128_v11 = vsel %vm6355_vm13, %v2070_v61, 0  ;;  %v2134_v23 = vshll.u32 %v2111_v45, 16 }
 0x1f4   : > { %v2005_v3 = vsel %vm1966_vm5, %v1901_v57, 0.0  ;;  %v4995_v50 = vadd.f32 %v4994_v20, %v6374_v48  ;;  %v5002_v8 = vadd.f32 %v4465_v18, %v6297_v16  ;;  %v2273_v53 = vrot.slane %v2128_v11, 1 }
 0x1f5   : > { %v2016_v5 = vpack.c.bf16 %v2005_v3, %v2004_v56  ;;  %v6564_v51 = vsel %vm358_vm0, %v2209_v32, %v2213_v36  ;;  %v6568_v40 = vsel %vm6355_vm13, 0, %v2073_v33  ;;  %v2223_v12 = vshll.u32 %v2128_v11, 16 }
 0x1f6   : > { %v1882_v43 = vadd.f32 %v4995_v50, %v6310_v63  ;;  %v5003_v39 = vadd.f32 %v5002_v8, %v6384_v52  ;;  %2615 = vmatprep.mubr.bf16.mxu0 %v6564_v51  ;;  %v2272_v48 = vrot.slane %v6568_v40, 1  ;;  %v2218_v16 = vshll.u32 %v6568_v40, 16 }
 0x1f7   : > { %2616 = vmatmul.mubr.bf16.gmra.mrb[120].mxu0 %v6537_v19  ;;  %v2075_v0 = vshrl.u32 %v2016_v5, 16  ;;  %v2078_v52 = vshll.u32 %v2016_v5, 16  ;;  %v2216_v62 = vshrl.u32 %v6568_v40, 16  ;;  %v2225_v6 = vrot.slane %v2223_v12, 1  ;;  %v5344_v12 = vld [vmem:[#allocation2 + $0x1d0] sm:$0xff]  }
 0x1f8   : > { %v1902_v28 = vmax.f32 %v1882_v43, 0.0  ;;  %v1883_v47 = vadd.f32 %v5003_v39, %v6310_v63  ;;  %v6580_v31 = vsel %vm489_vm1, %v2272_v48, %v2273_v53  ;;  %v2220_v34 = vrot.slane %v2218_v16, 1  ;;  %v5340_v39 = vld [vmem:[#allocation2 + $0x180] sm:$0xff]   ;;  %v5342_v53 = vld [vmem:[#allocation2 + $0x1c8] sm:$0xff]  }
 0x1f9   : > { %4860 = vmatprep.mubr.bf16.mxu1 %v6580_v31  ;;  %v2077_v4 = vrot.slane %v2075_v0, 7  ;;  %v2121_v46 = vsel %vm6355_vm13, %v6530_v14, 0  ;;  %v2251_v15 = vrot.slane %v2111_v45, 1  ;;  %v2136_v20 = vrot.slane %v2134_v23, 1  ;;  %v5343_v16 = vld [vmem:[#allocation2 + $0x188] sm:$0xff]   ;;  %v5345_v0 = vld [vmem:[#allocation2 + $0x190] sm:$0xff]  }
 0x1fa   : > { %v2006_v29 = vsel %vm1967_vm6, %v1902_v28, 0.0  ;;  %v1903_v49 = vmax.f32 %v1883_v47, 0.0  ;;  %v2221_v21 = vor.u32 %v2220_v34, %v2216_v62  ;;  %v2252_v14 = vrot.slane %v2121_v46, 1  ;;  %v5346_v28 = vld [vmem:[#allocation2 + $0x1d8] sm:$0xff]   ;;  %v5350_v62 = vld [vmem:[#allocation2 + $0x1e8] sm:$0xff]   ;;  %v5353_v34 = vld [vmem:[#allocation2 + $0x1b0] sm:$0xff]  }
 0x1fb   : > { %v2080_v54 = vor.u32 %v2078_v52, %v2077_v4  ;;  %v2129_v63 = vsel %vm6355_vm13, %v2077_v4, 0  ;;  %v2132_v11 = vshrl.u32 %v2111_v45, 16  ;;  %v2139_v56 = vshll.u32 %v2121_v46, 16  ;;  %v5347_v47 = vld [vmem:[#allocation2 + $0x198] sm:$0xff]   ;;  %v5349_v52 = vld [vmem:[#allocation2 + $0x1a0] sm:$0xff]   ;;  %v5358_v23 = vld [vmem:[#allocation2 + $0x210] sm:$0xff]  }
 0x1fc   : > { %v2007_v37 = vsel %vm1967_vm6, %v1903_v49, 0.0  ;;  %v6596_v60 = vsel %vm358_vm0, %v2221_v21, %v2225_v6  ;;  %v2347_v22 = vrot.slane %v2129_v63, 1  ;;  %v2339_v57 = vshll.u32 %v2129_v63, 16  ;;  %v5354_v4 = vld [vmem:[#allocation2 + $0x1f8] sm:$0xff]   ;;  %v5357_v49 = vld [vmem:[#allocation2 + $0x208] sm:$0xff]   ;;  %v5360_v21 = vld [vmem:[#allocation2 + $0x220] sm:$0xff]  }
 0x1fd   : > { %v6593_v59 = vpack.c.bf16 %v2007_v37, %v2006_v29  ;;  %v6600_v1 = vsel %vm6355_vm13, 0, %v2080_v54  ;;  %2623 = vmatprep.mubr.bf16.mxu0 %v6596_v60  ;;  %v2253_v33 = vsel %vm489_vm1, %v2251_v15, %v2252_v14  ;;  %v2137_v8 = vor.u32 %v2136_v20, %v2132_v11  ;;  %v5356_v29 = vld [vmem:[#allocation2 + $0x200] sm:$0xff]  }
 0x1fe   : > { %v2346_v61 = vrot.slane %v6600_v1, 1  ;;  %v2334_v41 = vshll.u32 %v6600_v1, 16  ;;  %v2332_v32 = vshrl.u32 %v6600_v1, 16  ;;  %v2341_v50 = vrot.slane %v2339_v57, 1 }
 0x1ff   : > { %2624 = vmatmul.mubr.bf16.gmra.mrb[124].mxu0 %v6568_v40  ;;  %v2141_v43 = vrot.slane %v2139_v56, 1 }
 0x200   : > { %v6607_v18 = vsel %vm489_vm1, %v2346_v61, %v2347_v22  ;;  %v2336_v36 = vrot.slane %v2334_v41, 1 }
 0x201   : > { %4861 = vmatmul.mubr.bf16.gmra.mrb[72].mxu1 %v6607_v18  ;;  %v2142_v48 = vsel %vm358_vm0, %v2137_v8, %v2141_v43 }
 0x202   : > { %4880 = vmatprep.mubr.bf16.mxu1 %v2253_v33  ;;  %v2337_v3 = vor.u32 %v2336_v36, %v2332_v32 }
 0x204   : > { %v6613_v5 = vsel %vm358_vm0, %v2337_v3, %v2341_v50 }
 0x205   : > { %2631 = vmatprep.mubr.bf16.mxu0 %v6613_v5 }
 0x207   : > { %2632 = vmatmul.mubr.bf16.gmra.mrb[128].mxu0 %v6600_v1 }
 0x208   : > { %2913 = vmatprep.mubr.bf16.mxu0 %v2142_v48 }
 0x209   : > { %4881 = vmatmul.mubr.bf16.vlgmr.msra.gmra.mrb[60].mxu1 %v6382_v17  ;;  %v5348_v17 = vld [vmem:[#allocation2 + $0x1e0] sm:$0xff]  }
 0x20a   : > { %4884 = vmatprep.mubr.bf16.mxu1 %v6416_v13  ;;  %4645 = vmatpush3.bf16.msra.mxu1 %v5340_v39 }
 0x20b   : > { %4646 = vmatprep.subr.bf16.mxu1 %v5342_v53 }
 0x20e   : > { %4647 = vmatpush3.bf16.msra.mxu1 %v5343_v16 }
 0x20f   : > { %2914 = vmatmul.mubr.bf16.vlgmr.msra.gmra.mrb[132].mxu0 %v2111_v45  ;;  %4648 = vmatprep.subr.bf16.mxu1 %v5344_v12  ;;  %v5352_v45 = vld [vmem:[#allocation2 + $0x1f0] sm:$0xff]  }
 0x210   : > { %2921 = vmatprep.mubr.bf16.mxu0 %v6403_v10  ;;  %v5351_v10 = vld [vmem:[#allocation2 + $0x1a8] sm:$0xff]  }
 0x211   : > { %4885 = vmatmul.mubr.bf16.gmra.mrb[64].mxu1 %v6446_v2 }
 0x212   : > { %4888 = vmatprep.mubr.bf16.mxu1 %v6481_v55  ;;  %4649 = vmatpush3.bf16.msra.mxu1 %v5345_v0 }
 0x213   : > { %4650 = vmatprep.subr.bf16.mxu1 %v5346_v28 }
 0x216   : > { %4651 = vmatpush3.bf16.msra.mxu1 %v5347_v47 }
 0x217   : > { %2922 = vmatmul.mubr.bf16.gmra.mrb[136].mxu0 %v6369_v26  ;;  %4652 = vmatprep.subr.bf16.mxu1 %v5348_v17  ;;  %v5355_v26 = vld [vmem:[#allocation2 + $0x1b8] sm:$0xff]  }
 0x218   : > { %2929 = vmatprep.mubr.bf16.mxu0 %v6430_v42 }
 0x219   : > { %4889 = vmatmul.mubr.bf16.gmra.mrb[68].mxu1 %v6516_v27 }
 0x21a   : > { %4892 = vmatprep.mubr.bf16.mxu1 %v6548_v38  ;;  %4653 = vmatpush3.bf16.msra.mxu1 %v5349_v52 }
 0x21b   : > { %4654 = vmatprep.subr.bf16.mxu1 %v5350_v62 }
 0x21e   : > { %4655 = vmatpush3.bf16.msra.mxu1 %v5351_v10 }
 0x21f   : > { %2930 = vmatmul.mubr.bf16.gmra.mrb[140].mxu0 %v6400_v35  ;;  %4656 = vmatprep.subr.bf16.mxu1 %v5352_v45 }
 0x220   : > { %2937 = vmatprep.mubr.bf16.mxu0 %v6463_v58 }
 0x221   : > { %4893 = vmatmul.mubr.bf16.gmra.mrb[72].mxu1 %v6580_v31 }
 0x222   : > { %4657 = vmatpush3.bf16.msra.mxu1 %v5353_v34  ;;  %3319 = vmatprep.mubr.bf16.mxu1 %v6430_v42  ;;  %v5359_v42 = vld [vmem:[#allocation2 + $0x218] sm:$0xff]  }
 0x223   : > { %4658 = vmatprep.subr.bf16.mxu1 %v5354_v4 }
 0x226   : > { %4659 = vmatpush3.bf16.msra.mxu1 %v5355_v26 }
 0x227   : > { %2938 = vmatmul.mubr.bf16.gmra.mrb[144].mxu0 %v6435_v24  ;;  %4896 = vmatprep.subr.bf16.mxu1 %v5356_v29 }
 0x228   : > { %2945 = vmatprep.mubr.bf16.mxu0 %v6496_v7 }
 0x229   : > { %3320 = vmatmul.mubr.bf16.vlgmr.msra.gmra.mrb[76].mxu1 %v6400_v35  ;;  %v5361_v35 = vld [vmem:[#allocation2 + $0x228] sm:$0xff]  }
 0x22a   : > { %3327 = vmatprep.mubr.bf16.mxu1 %v6463_v58  ;;  %4897 = vmatpush3.bf16.msra.mxu1 %v5356_v29  ;;  %v5362_v58 = vld [vmem:[#allocation2 + $0x230] sm:$0xff]  }
 0x22b   : > { %4898 = vmatprep.subr.bf16.mxu1 %v5357_v49 }
 0x22e   : > { %4899 = vmatpush3.bf16.msra.mxu1 %v5357_v49 }
 0x22f   : > { %2946 = vmatmul.mubr.bf16.gmra.mrb[148].mxu0 %v6470_v9  ;;  %4900 = vmatprep.subr.bf16.mxu1 %v5358_v23 }
 0x230   : > { %2953 = vmatprep.mubr.bf16.mxu0 %v6533_v30 }
 0x231   : > { %3328 = vmatmul.mubr.bf16.gmra.mrb[80].mxu1 %v6435_v24  ;;  %v2082_v24 = vshrl.u32 %v6593_v59, 16 }
 0x232   : > { %3335 = vmatprep.mubr.bf16.mxu1 %v6496_v7  ;;  %4901 = vmatpush3.bf16.msra.mxu1 %v5358_v23  ;;  %v5363_v7 = vld [vmem:[#allocation2 + $0x238] sm:$0xff]  }
 0x233   : > { %4902 = vmatprep.subr.bf16.mxu1 %v5359_v42  ;;  %v2084_v6 = vrot.slane %v2082_v24, 7 }
 0x236   : > { %4903 = vmatpush3.bf16.msra.mxu1 %v5359_v42 }
 0x237   : > { %2954 = vmatmul.mubr.bf16.gmra.mrb[152].mxu0 %v6505_v44  ;;  %4904 = vmatprep.subr.bf16.mxu1 %v5360_v21 }
 0x238   : > { %2961 = vmatprep.mubr.bf16.mxu0 %v6564_v51 }
 0x239   : > { %3336 = vmatmul.mubr.bf16.gmra.mrb[84].mxu1 %v6470_v9  ;;  %v2085_v9 = vshll.u32 %v6593_v59, 16 }
 0x23a   : > { %3343 = vmatprep.mubr.bf16.mxu1 %v6533_v30  ;;  %4905 = vmatpush3.bf16.msra.mxu1 %v5360_v21 }
 0x23b   : > { %4906 = vmatprep.subr.bf16.mxu1 %v5361_v35  ;;  %v2087_v30 = vor.u32 %v2085_v9, %v2084_v6 }
 0x23d   : > { %v2120_v54 = vsel %vm6355_vm13, 0, %v2087_v30 }
 0x23e   : > { %4907 = vmatpush3.bf16.msra.mxu1 %v5361_v35  ;;  %v3078_v63 = vshll.u32 %v2120_v54, 16  ;;  %v3076_v37 = vshrl.u32 %v2120_v54, 16  ;;  %v3090_v25 = vrot.slane %v2120_v54, 1 }
 0x23f   : > { %2962 = vmatmul.mubr.bf16.gmra.mrb[156].mxu0 %v6537_v19  ;;  %4908 = vmatprep.subr.bf16.mxu1 %v5362_v58 }
 0x240   : > { %2969 = vmatprep.mubr.bf16.mxu0 %v6596_v60 }
 0x241   : > { %3344 = vmatmul.mubr.bf16.gmra.mrb[88].mxu1 %v6505_v44  ;;  %v2130_v44 = vsel %vm6355_vm13, %v2084_v6, 0 }
 0x242   : > { %3351 = vmatprep.mubr.bf16.mxu1 %v6564_v51  ;;  %4909 = vmatpush3.bf16.msra.mxu1 %v5362_v58  ;;  %v3080_v51 = vrot.slane %v3078_v63, 1  ;;  %v3083_v46 = vshll.u32 %v2130_v44, 16 }
 0x243   : > { %4910 = vmatprep.subr.bf16.mxu1 %v5363_v7 }
 0x244   : > { %v3081_v59 = vor.u32 %v3080_v51, %v3076_v37  ;;  %v3085_v15 = vrot.slane %v3083_v46, 1 }
 0x246   : > { %4911 = vmatpush3.bf16.msra.mxu1 %v5363_v7 }
 0x247   : > { %2970 = vmatmul.mubr.bf16.gmra.mrb[160].mxu0 %v6568_v40 }
 0x249   : > { %3352 = vmatmul.mubr.bf16.gmra.mrb[92].mxu1 %v6537_v19  ;;  %v3086_v19 = vsel %vm358_vm0, %v3081_v59, %v3085_v15 }
 0x24a   : > { %3359 = vmatprep.mubr.bf16.mxu1 %v6596_v60 }
 0x251   : > { %3360 = vmatmul.mubr.bf16.gmra.mrb[96].mxu1 %v6568_v40  ;;  %v3091_v40 = vrot.slane %v2130_v44, 1 }
 0x252   : > { %3367 = vmatprep.mubr.bf16.mxu1 %v6613_v5 }
 0x253   : > { %v3092_v60 = vsel %vm489_vm1, %v3090_v25, %v3091_v40 }
 0x259   : > { %3368 = vmatmul.mubr.bf16.gmra.mrb[100].mxu1 %v6600_v1 }
 0x25a   : > { %3375 = vmatprep.mubr.bf16.mxu1 %v3086_v19 }
 0x261   : > { %3376 = vmatmul.mubr.bf16.gmra.mrb[104].mxu1 %v2120_v54 }
 0x262   : > { %4912 = vmatprep.mubr.bf16.mxu1 %v6416_v13 }
 0x269   : > { %4913 = vmatmul.mubr.bf16.vlgmr.msra.gmra.mrb[60].mxu1 %v6446_v2 }
 0x26a   : > { %4916 = vmatprep.mubr.bf16.mxu1 %v6481_v55 }
 0x271   : > { %4917 = vmatmul.mubr.bf16.gmra.mrb[64].mxu1 %v6516_v27 }
 0x272   : > { %4920 = vmatprep.mubr.bf16.mxu1 %v6548_v38 }
 0x279   : > { %4921 = vmatmul.mubr.bf16.gmra.mrb[68].mxu1 %v6580_v31 }
 0x27a   : > { %4924 = vmatprep.mubr.bf16.mxu1 %v6607_v18 }
 0x281   : > { %4925 = vmatmul.mubr.bf16.gmra.mrb[72].mxu1 %v3092_v60 }
 0x2a2   : > { %v4500_v1 = vpop.f32.mrb[100].mxu0 }
 0x2a3   : > { %v4501_v61 = vpop.f32.mrb[101].mxu0 }
 0x2a4   : > { %v4502_v13 = vadd.f32 %v4501_v61, %v4500_v1  ;;  %v4503_v22 = vpop.f32.mrb[102].mxu0 }
 0x2a5   : > { %v4504_v2 = vpop.f32.mrb[103].mxu0 }
 0x2a6   : > { %v4505_v41 = vadd.f32 %v4504_v2, %v4503_v22 }
 0x2aa   : > { %v4506_v55 = vpop.f32.mrb[104].mxu0 }
 0x2ab   : > { %v4507_v57 = vpop.f32.mrb[105].mxu0 }
 0x2ac   : > { %v4508_v27 = vadd.f32 %v4507_v57, %v4506_v55  ;;  %v4509_v14 = vpop.f32.mrb[106].mxu0 }
 0x2ad   : > { %v4510_v38 = vpop.f32.mrb[107].mxu0 }
 0x2ae   : > { %v4511_v20 = vadd.f32 %v4510_v38, %v4509_v14 }
 0x2b2   : > { %v4512_v31 = vpop.f32.mrb[108].mxu0 }
 0x2b3   : > { %v4513_v32 = vpop.f32.mrb[109].mxu0 }
 0x2b4   : > { %v4514_v18 = vadd.f32 %v4513_v32, %v4512_v31  ;;  %v4515_v36 = vpop.f32.mrb[110].mxu0 }
 0x2b5   : > { %v4516_v33 = vpop.f32.mrb[111].mxu0 }
 0x2b6   : > { %v4517_v11 = vadd.f32 %v4516_v33, %v4515_v36 }
 0x2ba   : > { %v4518_v56 = vpop.f32.mrb[112].mxu0 }
 0x2bb   : > { %v4519_v3 = vpop.f32.mrb[113].mxu0 }
 0x2bc   : > { %v4520_v50 = vadd.f32 %v4519_v3, %v4518_v56  ;;  %v4521_v8 = vpop.f32.mrb[114].mxu0 }
 0x2bd   : > { %v4522_v5 = vpop.f32.mrb[115].mxu0 }
 0x2be   : > { %v4523_v43 = vadd.f32 %v4522_v5, %v4521_v8 }
 0x2c2   : > { %v4524_v39 = vpop.f32.mrb[116].mxu0 }
 0x2c3   : > { %v4525_v48 = vpop.f32.mrb[117].mxu0 }
 0x2c4   : > { %v6668_v53 = vadd.f32 %v4525_v48, %v4524_v39  ;;  %v4527_v16 = vpop.f32.mrb[118].mxu0 }
 0x2c5   : > { %v4528_v12 = vpop.f32.mrb[119].mxu0 }
 0x2c6   : > { %v6670_v0 = vadd.f32 %v4528_v12, %v4527_v16 }
 0x2ca   : > { %v4530_v28 = vpop.f32.mrb[120].mxu0 }
 0x2cb   : > { %v4531_v47 = vpop.f32.mrb[121].mxu0 }
 0x2cc   : > { %v6672_v17 = vadd.f32 %v4531_v47, %v4530_v28  ;;  %v4533_v52 = vpop.f32.mrb[122].mxu0 }
 0x2cd   : > { %v4534_v62 = vpop.f32.mrb[123].mxu0 }
 0x2ce   : > { %v6674_v10 = vadd.f32 %v4534_v62, %v4533_v52 }
 0x2d2   : > { %v4536_v45 = vpop.f32.mrb[124].mxu0 }
 0x2d3   : > { %v4537_v34 = vpop.f32.mrb[125].mxu0 }
 0x2d4   : > { %v6676_v4 = vadd.f32 %v4537_v34, %v4536_v45  ;;  %v4539_v26 = vpop.f32.mrb[126].mxu0 }
 0x2d5   : > { %v4540_v29 = vpop.f32.mrb[127].mxu0 }
 0x2d6   : > { %v6678_v49 = vadd.f32 %v4540_v29, %v4539_v26 }
 0x2da   : > { %v4542_v23 = vpop.f32.mrb[128].mxu0 }
 0x2db   : > { %v4543_v42 = vpop.f32.mrb[129].mxu0 }
 0x2dc   : > { %v6680_v21 = vadd.f32 %v4543_v42, %v4542_v23  ;;  %v4545_v35 = vpop.f32.mrb[130].mxu0 }
 0x2dd   : > { %v4546_v58 = vpop.f32.mrb[131].mxu0 }
 0x2de   : > { %v6682_v24 = vadd.f32 %v4546_v58, %v4545_v35 }
 0x2e2   : > { %v4580_v7 = vpop.f32.mrb[132].mxu0 }
 0x2e3   : > { %v4581_v6 = vpop.f32.mrb[133].mxu0 }
 0x2e4   : > { %v4582_v9 = vadd.f32 %v4581_v6, %v4580_v7  ;;  %v4583_v30 = vpop.f32.mrb[134].mxu0 }
 0x2e5   : > { %v4584_v54 = vpop.f32.mrb[135].mxu0 }
 0x2e6   : > { %v5011_v63 = vadd.f32 %v4582_v9, %v4502_v13  ;;  %v4585_v44 = vadd.f32 %v4584_v54, %v4583_v30 }
 0x2e8   : > { %v5017_v51 = vadd.f32 %v4585_v44, %v4505_v41 }
 0x2ea   : > { %v4586_v37 = vpop.f32.mrb[136].mxu0 }
 0x2eb   : > { %v4587_v46 = vpop.f32.mrb[137].mxu0 }
 0x2ec   : > { %v4588_v59 = vadd.f32 %v4587_v46, %v4586_v37  ;;  %v4589_v15 = vpop.f32.mrb[138].mxu0 }
 0x2ed   : > { %v4590_v19 = vpop.f32.mrb[139].mxu0 }
 0x2ee   : > { %v5008_v25 = vadd.f32 %v4588_v59, %v4508_v27  ;;  %v4591_v40 = vadd.f32 %v4590_v19, %v4589_v15 }
 0x2f0   : > { %v5014_v60 = vadd.f32 %v4591_v40, %v4511_v20 }
 0x2f2   : > { %v4592_v1 = vpop.f32.mrb[140].mxu0 }
 0x2f3   : > { %v4593_v61 = vpop.f32.mrb[141].mxu0 }
 0x2f4   : > { %v4594_v22 = vadd.f32 %v4593_v61, %v4592_v1  ;;  %v4595_v2 = vpop.f32.mrb[142].mxu0 }
 0x2f5   : > { %v4596_v55 = vpop.f32.mrb[143].mxu0 }
 0x2f6   : > { %v5023_v57 = vadd.f32 %v4594_v22, %v4514_v18  ;;  %v4597_v14 = vadd.f32 %v4596_v55, %v4595_v2 }
 0x2f8   : > { %v5029_v38 = vadd.f32 %v4597_v14, %v4517_v11 }
 0x2fa   : > { %v4598_v31 = vpop.f32.mrb[144].mxu0 }
 0x2fb   : > { %v4599_v13 = vpop.f32.mrb[145].mxu0 }
 0x2fc   : > { %v4600_v32 = vadd.f32 %v4599_v13, %v4598_v31  ;;  %v4601_v41 = vpop.f32.mrb[146].mxu0  ;;  %v4660_v36 = vpop.f32.mrb[76].mxu1 }
 0x2fd   : > { %v4602_v33 = vpop.f32.mrb[147].mxu0  ;;  %v4661_v56 = vpop.f32.mrb[77].mxu1 }
 0x2fe   : > { %v5020_v3 = vadd.f32 %v4600_v32, %v4520_v50  ;;  %v4603_v8 = vadd.f32 %v4602_v33, %v4601_v41  ;;  %v4662_v27 = vadd.f32 %v4661_v56, %v4660_v36  ;;  %v4663_v5 = vpop.f32.mrb[78].mxu1 }
 0x2ff   : > { %v4664_v20 = vpop.f32.mrb[79].mxu1 }
 0x300   : > { %v5026_v39 = vadd.f32 %v4603_v8, %v4523_v43  ;;  %v4665_v48 = vadd.f32 %v4664_v20, %v4663_v5  ;;  %v6684_v16 = vadd.f32 %v5011_v63, %v4662_v27 }
 0x302   : > { %v4604_v12 = vpop.f32.mrb[148].mxu0  ;;  %v6686_v18 = vadd.f32 %v5017_v51, %v4665_v48 }
 0x303   : > { %v4605_v11 = vpop.f32.mrb[149].mxu0 }
 0x304   : > { %v4606_v28 = vadd.f32 %v4605_v11, %v4604_v12  ;;  %v4607_v47 = vpop.f32.mrb[150].mxu0  ;;  %v4666_v52 = vpop.f32.mrb[80].mxu1 }
 0x305   : > { %v4608_v62 = vpop.f32.mrb[151].mxu0  ;;  %v4667_v45 = vpop.f32.mrb[81].mxu1 }
 0x306   : > { %v5035_v34 = vadd.f32 %v4606_v28, %v6668_v53  ;;  %v4609_v50 = vadd.f32 %v4608_v62, %v4607_v47  ;;  %v4668_v26 = vadd.f32 %v4667_v45, %v4666_v52  ;;  %v4669_v29 = vpop.f32.mrb[82].mxu1 }
 0x307   : > { %v4670_v23 = vpop.f32.mrb[83].mxu1 }
 0x308   : > { %v5041_v43 = vadd.f32 %v4609_v50, %v6670_v0  ;;  %v4671_v42 = vadd.f32 %v4670_v23, %v4669_v29  ;;  %v6690_v35 = vadd.f32 %v5008_v25, %v4668_v26 }
 0x30a   : > { %v4610_v58 = vpop.f32.mrb[152].mxu0  ;;  %v6692_v7 = vadd.f32 %v5014_v60, %v4671_v42 }
 0x30b   : > { %v4611_v6 = vpop.f32.mrb[153].mxu0 }
 0x30c   : > { %v4612_v9 = vadd.f32 %v4611_v6, %v4610_v58  ;;  %v4613_v30 = vpop.f32.mrb[154].mxu0  ;;  %v4672_v54 = vpop.f32.mrb[84].mxu1 }
 0x30d   : > { %v4614_v63 = vpop.f32.mrb[155].mxu0  ;;  %v4673_v44 = vpop.f32.mrb[85].mxu1 }
 0x30e   : > { %v5032_v53 = vadd.f32 %v4612_v9, %v6672_v17  ;;  %v4615_v51 = vadd.f32 %v4614_v63, %v4613_v30  ;;  %v4674_v37 = vadd.f32 %v4673_v44, %v4672_v54  ;;  %v4675_v46 = vpop.f32.mrb[86].mxu1  ;;  %v5372_v54 = vld [vmem:[%s5757_s7 + $0x24] sm:$0xff]  }
 0x30f   : > { %v4676_v59 = vpop.f32.mrb[87].mxu1  ;;  %v3500_v63 = vunpack.c.l.bf16 %v5372_v54  ;;  %v3501_v44 = vunpack.c.h.bf16 %v5372_v54 }
 0x310   : > { %v5038_v0 = vadd.f32 %v4615_v51, %v6674_v10  ;;  %v4677_v15 = vadd.f32 %v4676_v59, %v4675_v46  ;;  %v6696_v19 = vadd.f32 %v5023_v57, %v4674_v37  ;;  %v5373_v37 = vld [vmem:[%s5757_s7 + $0x18] sm:$0xff]  }
 0x311   : > { %v3498_v46 = vunpack.c.h.bf16 %v5373_v37 }
 0x312   : > { %v4616_v25 = vpop.f32.mrb[156].mxu0  ;;  %v6698_v40 = vadd.f32 %v5029_v38, %v4677_v15 }
 0x313   : > { %v4617_v60 = vpop.f32.mrb[157].mxu0 }
 0x314   : > { %v4618_v1 = vadd.f32 %v4617_v60, %v4616_v25  ;;  %v4619_v61 = vpop.f32.mrb[158].mxu0  ;;  %v4678_v22 = vpop.f32.mrb[88].mxu1 }
 0x315   : > { %v4620_v2 = vpop.f32.mrb[159].mxu0  ;;  %v4679_v55 = vpop.f32.mrb[89].mxu1 }
 0x316   : > { %v5047_v17 = vadd.f32 %v4618_v1, %v6676_v4  ;;  %v4621_v14 = vadd.f32 %v4620_v2, %v4619_v61  ;;  %v4680_v31 = vadd.f32 %v4679_v55, %v4678_v22  ;;  %v4681_v13 = vpop.f32.mrb[90].mxu1  ;;  %v3567_v61 = vrot.slane %v3500_v63, 1  ;;  %v5381_v63 = vld [vmem:[%s5757_s7 + $0x54] sm:$0xff]  }
 0x317   : > { %v4682_v32 = vpop.f32.mrb[91].mxu1  ;;  %v3568_v22 = vrot.slane %v3501_v44, 1  ;;  %v3512_v44 = vunpack.c.l.bf16 %v5381_v63 }
 0x318   : > { %v5053_v10 = vadd.f32 %v4621_v14, %v6678_v49  ;;  %v4683_v41 = vadd.f32 %v4682_v32, %v4681_v13  ;;  %v6702_v57 = vadd.f32 %v5020_v3, %v4680_v31  ;;  %v5375_v13 = vld [vmem:[%s5757_s7 + $0x20] sm:$0x1] }
 0x319   : > { %v3499_v32 = vunpack.c.l.bf16 %v5375_v13  ;;  %v5383_v13 = vld [vmem:[%s5757_s7 + $0x5c] sm:$0x1] }
 0x31a   : > { %v4622_v36 = vpop.f32.mrb[160].mxu0  ;;  %v6704_v38 = vadd.f32 %v5026_v39, %v4683_v41 }
 0x31b   : > { %v4623_v33 = vpop.f32.mrb[161].mxu0 }
 0x31c   : > { %v4624_v56 = vadd.f32 %v4623_v33, %v4622_v36  ;;  %v4625_v8 = vpop.f32.mrb[162].mxu0  ;;  %v4684_v27 = vpop.f32.mrb[92].mxu1  ;;  %v5377_v33 = vld [vmem:[%s5757_s7 + $0x30] sm:$0xff]  }
 0x31d   : > { %v4626_v5 = vpop.f32.mrb[163].mxu0  ;;  %v4685_v20 = vpop.f32.mrb[93].mxu1 }
 0x31e   : > { %v5044_v4 = vadd.f32 %v4624_v56, %v6680_v21  ;;  %v4627_v48 = vadd.f32 %v4626_v5, %v4625_v8  ;;  %v4686_v12 = vadd.f32 %v4685_v20, %v4684_v27  ;;  %v4687_v11 = vpop.f32.mrb[94].mxu1  ;;  %v3503_v56 = vunpack.c.l.bf16 %v5377_v33  ;;  %v5378_v5 = vld [vmem:[%s5757_s7 + $0x44] sm:$0x1] }
 0x31f   : > { %v4688_v28 = vpop.f32.mrb[95].mxu1  ;;  %v3504_v8 = vunpack.c.h.bf16 %v5377_v33  ;;  %v3508_v20 = vunpack.c.l.bf16 %v5378_v5 }
 0x320   : > { %v5050_v49 = vadd.f32 %v4627_v48, %v6682_v24  ;;  %v4689_v47 = vadd.f32 %v4688_v28, %v4687_v11  ;;  %v6708_v3 = vadd.f32 %v5035_v34, %v4686_v12  ;;  %v3569_v12 = vsel %vm489_vm1, %v3567_v61, %v3568_v22 }
 0x322   : > { %v6710_v52 = vadd.f32 %v5041_v43, %v4689_v47 }
 0x324   : > { %v4690_v39 = vpop.f32.mrb[96].mxu1 }
 0x325   : > { %v4691_v62 = vpop.f32.mrb[97].mxu1 }
 0x326   : > { %v4692_v45 = vadd.f32 %v4691_v62, %v4690_v39  ;;  %v4693_v50 = vpop.f32.mrb[98].mxu1  ;;  %v3565_v39 = vrot.slane %v3499_v32, 1  ;;  %v3514_v32 = vunpack.c.l.bf16 %v5383_v13 }
 0x327   : > { %v4694_v26 = vpop.f32.mrb[99].mxu1 }
 0x328   : > { %v4695_v29 = vadd.f32 %v4694_v26, %v4693_v50  ;;  %v6712_v21 = vadd.f32 %v5032_v53, %v4692_v45  ;;  %v3497_v53 = vunpack.c.l.bf16 %v5373_v37  ;;  %v3572_v26 = vrot.slane %v3503_v56, 1 }
 0x32a   : > { %v6714_v23 = vadd.f32 %v5038_v0, %v4695_v29  ;;  %v5374_v0 = vld [vmem:[%s5757_s7 + $0x2c] sm:$0x1]  ;;  %v3562_v55 = vrot.slane %v3497_v53, 1  ;;  %v3573_v29 = vrot.slane %v3504_v8, 1 }
 0x32b   : > { %v3502_v15 = vunpack.c.l.bf16 %v5374_v0 }
 0x32c   : > { %v4696_v42 = vpop.f32.mrb[100].mxu1 }
 0x32d   : > { %v4697_v24 = vpop.f32.mrb[101].mxu1  ;;  %v3570_v31 = vrot.slane %v3502_v15, 1 }
 0x32e   : > { %v4698_v58 = vadd.f32 %v4697_v24, %v4696_v42  ;;  %v4699_v34 = vpop.f32.mrb[102].mxu1  ;;  %v6739_v42 = vld [vmem:[%s6876_s3] ss:$0 sm:$0xff] }
 0x32f   : > { %v4700_v6 = vpop.f32.mrb[103].mxu1  ;;  %v3571_v47 = vsel %vm489_vm1, %v3568_v22, %v3570_v31 }
 0x330   : > { %v4701_v43 = vadd.f32 %v4700_v6, %v4699_v34  ;;  %v6716_v9 = vadd.f32 %v5047_v17, %v4698_v58  ;;  %v3563_v17 = vrot.slane %v3498_v46, 1  ;;  %v3580_v34 = vrot.slane %v3508_v20, 1  ;;  %v5380_v6 = vld [vmem:[%s5757_s7 + $0x38] sm:$0x1] }
 0x332   : > { %v6718_v30 = vadd.f32 %v5053_v10, %v4701_v43  ;;  %v5376_v10 = vld [vmem:[%s5757_s7 + $0x3c] sm:$0xff]   ;;  %v3564_v11 = vsel %vm489_vm1, %v3562_v55, %v3563_v17  ;;  %v3505_v43 = vunpack.c.l.bf16 %v5380_v6  ;;  %v3566_v46 = vsel %vm489_vm1, %v3563_v17, %v3565_v39  ;;  %v5384_v39 = vld [vmem:[%s5757_s7 + $0x50] sm:$0x1] }
 0x333   : > { %v3506_v41 = vunpack.c.l.bf16 %v5376_v10  ;;  %v3507_v36 = vunpack.c.h.bf16 %v5376_v10  ;;  %v3587_v17 = vrot.slane %v3512_v44, 1 }
 0x334   : > { %v4702_v51 = vpop.f32.mrb[104].mxu1  ;;  %v3575_v22 = vrot.slane %v3505_v43, 1 }
 0x335   : > { %v4703_v59 = vpop.f32.mrb[105].mxu1  ;;  %v3577_v62 = vrot.slane %v3506_v41, 1  ;;  %v3578_v50 = vrot.slane %v3507_v36, 1 }
 0x336   : > { %v4704_v25 = vadd.f32 %v4703_v59, %v4702_v51  ;;  %v4705_v60 = vpop.f32.mrb[106].mxu1  ;;  %v3513_v51 = vunpack.c.h.bf16 %v5381_v63  ;;  %v5385_v63 = vld [vmem:[%s5757_s7 + $0x6c] sm:$0xff]  }
 0x337   : > { %v4706_v1 = vpop.f32.mrb[107].mxu1  ;;  %v3581_v61 = vsel %vm489_vm1, %v3578_v50, %v3580_v34  ;;  %v3518_v44 = vunpack.c.l.bf16 %v5385_v63 }
 0x338   : > { %v4707_v2 = vadd.f32 %v4706_v1, %v4705_v60  ;;  %v6723_v14 = vadd.f32 %v5044_v4, %v4704_v25  ;;  %v3579_v25 = vsel %vm489_vm1, %v3577_v62, %v3578_v50  ;;  %v3574_v1 = vsel %vm489_vm1, %v3572_v26, %v3573_v29 }
 0x339   : > { %v3588_v31 = vrot.slane %v3513_v51, 1  ;;  %v3511_v62 = vunpack.c.l.bf16 %v5384_v39  ;;  %v3590_v50 = vrot.slane %v3514_v32, 1 }
 0x33a   : > { %v6728_v27 = vadd.f32 %v5050_v49, %v4707_v2 }
 0x33b   : > { %v3589_v34 = vsel %vm489_vm1, %v3587_v17, %v3588_v31 }
 0x33c   : > { %v4914_v48 = vpop.f32.mrb[60].mxu1 }
 0x33d   : > { %v5010_v4 = vadd.f32 %v6690_v35, %v4914_v48  ;;  %v3418_v28 = vpop.f32.mrb[61].mxu1 }
 0x33e   : > { %v5013_v49 = vadd.f32 %v6684_v16, %v3418_v28  ;;  %v4915_v45 = vpop.f32.mrb[62].mxu1 }
 0x33f   : > { %v3523_v35 = vadd.f32 %v6739_v42, %v5010_v4  ;;  %v5016_v24 = vadd.f32 %v6692_v7, %v4915_v45  ;;  %v3421_v58 = vpop.f32.mrb[63].mxu1  ;;  %v5382_v7 = vld [vmem:[%s5757_s7 + $0x48] sm:$0xff]  }
 0x340   : > { %v3521_v16 = vadd.f32 %v6739_v42, %v5013_v49  ;;  %v5019_v54 = vadd.f32 %v6686_v18, %v3421_v58  ;;  %v3509_v59 = vunpack.c.l.bf16 %v5382_v7  ;;  %v3510_v60 = vunpack.c.h.bf16 %v5382_v7 }
 0x341   : > { %v3620_v37 = vadd.f32 %v3569_v12, %v3523_v35  ;;  %v3524_v53 = vadd.f32 %v6739_v42, %v5016_v24 }
 0x342   : > { %v3618_v0 = vadd.f32 %v3564_v11, %v3521_v16  ;;  %v3522_v15 = vadd.f32 %v6739_v42, %v5019_v54  ;;  %v3582_v56 = vrot.slane %v3509_v59, 1  ;;  %v3583_v12 = vrot.slane %v3510_v60, 1 }
 0x343   : > { %v3621_v18 = vadd.f32 %v3571_v47, %v3524_v53  ;;  %v3636_v10 = vmax.f32 %v3620_v37, 0.0  ;;  %v3591_v16 = vsel %vm489_vm1, %v3588_v31, %v3590_v50  ;;  %v3585_v54 = vrot.slane %v3511_v62, 1  ;;  %v5387_v31 = vld [vmem:[%s5757_s7 + $0x74] sm:$0x1] }
 0x344   : > { %v3619_v2 = vadd.f32 %v3566_v46, %v3522_v15  ;;  %v4918_v55 = vpop.f32.mrb[64].mxu1  ;;  %v3634_v8 = vmax.f32 %v3618_v0, 0.0  ;;  %v3519_v46 = vunpack.c.h.bf16 %v5385_v63  ;;  %v3520_v13 = vunpack.c.l.bf16 %v5387_v31 }
 0x345   : > { %v3637_v41 = vmax.f32 %v3621_v18, 0.0  ;;  %v5022_v36 = vadd.f32 %v6702_v57, %v4918_v55  ;;  %v3434_v33 = vpop.f32.mrb[65].mxu1 }
 0x346   : > { %v3635_v5 = vmax.f32 %v3619_v2, 0.0  ;;  %v5025_v20 = vadd.f32 %v6696_v19, %v3434_v33  ;;  %v4919_v48 = vpop.f32.mrb[66].mxu1 }
 0x347   : > { %v4163_v11 = vpack.c.bf16 %v3637_v41, %v3636_v10  ;;  %v3527_v4 = vadd.f32 %v6739_v42, %v5022_v36  ;;  %v5028_v28 = vadd.f32 %v6704_v38, %v4919_v48  ;;  %v3437_v47 = vpop.f32.mrb[67].mxu1  ;;  %v3576_v38 = vsel %vm489_vm1, %v3573_v29, %v3575_v22  ;;  %v5388_v41 = vld [vmem:[%s5757_s7 + $0x68] sm:$0x1] }
 0x348   : > { %v4158_v49 = vpack.c.bf16 %v3635_v5, %v3634_v8  ;;  %v3525_v57 = vadd.f32 %v6739_v42, %v5025_v20  ;;  %v5031_v45 = vadd.f32 %v6698_v40, %v3437_v47  ;;  %v3584_v40 = vsel %vm489_vm1, %v3582_v56, %v3583_v12 }
 0x349   : > { %4195 = vst [vmem:[%s6768_s10 + $0x8] sm:$0xff] %v4163_v11   ;;  %v3624_v19 = vadd.f32 %v3579_v25, %v3527_v4  ;;  %v3528_v26 = vadd.f32 %v6739_v42, %v5028_v28  ;;  %v5386_v25 = vld [vmem:[%s5757_s7 + $0x60] sm:$0xff]   ;;  %v3586_v10 = vsel %vm489_vm1, %v3583_v12, %v3585_v54  ;;  %v3517_v36 = vunpack.c.l.bf16 %v5388_v41  ;;  %s4154_s7 = sshll.u32 %s5499_s18, 4 }
 0x34a   : > { %4159 = vst [vmem:[%s6768_s10] sm:$0xff] %v4158_v49   ;;  %v3622_v35 = vadd.f32 %v3574_v1, %v3525_v57  ;;  %v3526_v24 = vadd.f32 %v6739_v42, %v5031_v45  ;;  %v3515_v60 = vunpack.c.l.bf16 %v5386_v25  ;;  %v3597_v56 = vrot.slane %v3518_v44, 1  ;;  %s3744_s18 = sadd.s32 %s4154_s7, %s4133_s14 }
 0x34b   : > { %v3625_v58 = vadd.f32 %v3581_v61, %v3528_v26  ;;  %v3640_v51 = vmax.f32 %v3624_v19, 0.0  ;;  %v3598_v8 = vrot.slane %v3519_v46, 1  ;;  %v3600_v4 = vrot.slane %v3520_v13, 1  ;;  %s4134_s19 = sshll.u32 %s3744_s18, 6 }
 0x34c   : > { %v3623_v6 = vadd.f32 %v3576_v38, %v3526_v24  ;;  %v4922_v43 = vpop.f32.mrb[68].mxu1  ;;  %v3638_v7 = vmax.f32 %v3622_v35, 0.0  ;;  %v3592_v20 = vrot.slane %v3515_v60, 1  ;;  %v3595_v62 = vrot.slane %v3517_v36, 1  ;;  %s6813_s5 = scalar_lea.hbm %s6877_s4, %s4134_s19 }
 0x34d   : > { %v3641_v37 = vmax.f32 %v3625_v58, 0.0  ;;  %v5034_v29 = vadd.f32 %v6712_v21, %v4922_v43  ;;  %v3450_v53 = vpop.f32.mrb[69].mxu1  ;;  %v3516_v21 = vunpack.c.h.bf16 %v5386_v25  ;;  %v3599_v45 = vsel %vm489_vm1, %v3597_v56, %v3598_v8 }
 0x34e   : > { %v3639_v59 = vmax.f32 %v3623_v6, 0.0  ;;  %v5037_v0 = vadd.f32 %v6708_v3, %v3450_v53  ;;  %v4923_v15 = vpop.f32.mrb[70].mxu1 }
 0x34f   : > { %v4173_v18 = vpack.c.bf16 %v3641_v37, %v3640_v51  ;;  %v3531_v1 = vadd.f32 %v6739_v42, %v5034_v29  ;;  %v5040_v61 = vadd.f32 %v6714_v23, %v4923_v15  ;;  %v3453_v22 = vpop.f32.mrb[71].mxu1 }
 0x350   : > { %v4168_v2 = vpack.c.bf16 %v3639_v59, %v3638_v7  ;;  %v3529_v55 = vadd.f32 %v6739_v42, %v5037_v0  ;;  %v5043_v17 = vadd.f32 %v6710_v52, %v3453_v22  ;;  %v3593_v52 = vrot.slane %v3516_v21, 1 }
 0x351   : > { %4197 = vst [vmem:[%s6768_s10 + $0x18] sm:$0xff] %v4173_v18   ;;  %v3628_v3 = vadd.f32 %v3589_v34, %v3531_v1  ;;  %v3532_v32 = vadd.f32 %v6739_v42, %v5040_v61 }
 0x352   : > { %4196 = vst [vmem:[%s6768_s10 + $0x10] sm:$0xff] %v4168_v2   ;;  %v3626_v33 = vadd.f32 %v3584_v40, %v3529_v55  ;;  %v3530_v23 = vadd.f32 %v6739_v42, %v5043_v17  ;;  %v3594_v35 = vsel %vm489_vm1, %v3592_v20, %v3593_v52  ;;  %v3601_v40 = vsel %vm489_vm1, %v3598_v8, %v3600_v4 }
 0x353   : > { %v3629_v5 = vadd.f32 %v3591_v16, %v3532_v32  ;;  %v3644_v28 = vmax.f32 %v3628_v3, 0.0  ;;  %v3596_v16 = vsel %vm489_vm1, %v3593_v52, %v3595_v62 }
 0x354   : > { %v3627_v48 = vadd.f32 %v3586_v10, %v3530_v23  ;;  %v4926_v11 = vpop.f32.mrb[72].mxu1  ;;  %v3642_v49 = vmax.f32 %v3626_v33, 0.0 }
 0x355   : > { %v3645_v47 = vmax.f32 %v3629_v5, 0.0  ;;  %v5046_v12 = vadd.f32 %v6723_v14, %v4926_v11  ;;  %v3466_v39 = vpop.f32.mrb[73].mxu1 }
 0x356   : > { %v3643_v57 = vmax.f32 %v3627_v48, 0.0  ;;  %v5049_v50 = vadd.f32 %v6716_v9, %v3466_v39  ;;  %v4927_v19 = vpop.f32.mrb[74].mxu1 }
 0x357   : > { %v4183_v26 = vpack.c.bf16 %v3645_v47, %v3644_v28  ;;  %v3535_v38 = vadd.f32 %v6739_v42, %v5046_v12  ;;  %v5052_v14 = vadd.f32 %v6728_v27, %v4927_v19  ;;  %v3469_v24 = vpop.f32.mrb[75].mxu1 }
 0x358   : > { %v4178_v58 = vpack.c.bf16 %v3643_v57, %v3642_v49  ;;  %v3533_v34 = vadd.f32 %v6739_v42, %v5049_v50  ;;  %v5055_v9 = vadd.f32 %v6718_v30, %v3469_v24 }
 0x359   : > { %4199 = vst [vmem:[%s6768_s10 + $0x28] sm:$0xff] %v4183_v26   ;;  %v3632_v6 = vadd.f32 %v3599_v45, %v3535_v38  ;;  %v3536_v43 = vadd.f32 %v6739_v42, %v5052_v14 }
 0x35a   : > { %4198 = vst [vmem:[%s6768_s10 + $0x20] sm:$0xff] %v4178_v58   ;;  %v3630_v27 = vadd.f32 %v3594_v35, %v3533_v34  ;;  %v3534_v54 = vadd.f32 %v6739_v42, %v5055_v9 }
 0x35b   : > { %v3633_v63 = vadd.f32 %v3601_v40, %v3536_v43  ;;  %v3648_v30 = vmax.f32 %v3632_v6, 0.0 }
 0x35c   : > { %v3631_v44 = vadd.f32 %v3596_v16, %v3534_v54  ;;  %v3646_v37 = vmax.f32 %v3630_v27, 0.0 }
 0x35d   : > { %v3649_v51 = vmax.f32 %v3633_v63, 0.0 }
 0x35e   : > { %v3647_v29 = vmax.f32 %v3631_v44, 0.0 }
 0x35f   : > { %v4193_v53 = vpack.c.bf16 %v3649_v51, %v3648_v30 }
 0x360   : > { %v4188_v42 = vpack.c.bf16 %v3647_v29, %v3646_v37 }
 0x361   : > { %4201 = vst [vmem:[%s6768_s10 + $0x38] sm:$0xff] %v4193_v53  }
 0x362   : > { %4200 = vst [vmem:[%s6768_s10 + $0x30] sm:$0xff] %v4188_v42  }
 0x363   : > { %5430 = shalt.err (!%p5427_p7)
}
 0x364   : > { %s5431_s28 = scalar_lea.hbm %s6813_s5, 1024  ;;  %s5435_s14 = scalar_lea.hbm %s6877_s4, 4096 }
 0x365   : > { %p5432_p9 = scmp.ne.s32.totalorder %s6813_s5, %s5431_s28  ;;  %p5436_p1 = scmp.lt.u32.totalorder %s6813_s5, %s6877_s4 }
 0x366   : > { %p5437_p4 = scmp.lt.u32.totalorder %s5435_s14, %s5431_s28  ;;  %p5439_p8 = scmp.lt.u32.totalorder %s5431_s28, %s6813_s5 }
 0x367   : > { %p5433_p11 = pnand %p5432_p9, %p6891_p10 }
 0x368   : > { %p5438_p3 = por %p5437_p4, %p5436_p1 }
 0x369   : > { %p5434_p13 = pneg %p5433_p11 }
 0x36a   : > { %p5440_p12 = por %p5439_p8, %p5438_p3 }
 0x36c   : > { %p5441_p0 = pnand %p5440_p12, %p5434_p13 }
 0x36e   : > { %5444 = shalt.err (!%p5441_p0)
}
 0x36f   : > { %s5522_s23 = smov 64   ;;  %s5523_s27 = smov 4  }
 0x370   : > { %5113 = dma.vmem_to_hbm [thread:$0]  (%p6891_p10), %s6815_s24, 1024, %s6813_s5, %s6821_s12, %s5522_s23, %s5522_s23, %s5523_s27  }
 0x371 PF: > { %p5125_p2 = scmp.ge.s32.totalorder %s5515_s22, 2  ;;  %s3762_s13 = sand.u32 1, %s5487_s15  }
 0x372   : > { %p6892_p5 = scmp.ne.s32.totalorder %s6883_s30, 0  ;;  %s3763_s6 = scalar_lea.sflag [#allocation4], %s3762_s13 }
 0x374   : > { %p5120_p6 = pnand %p5125_p2, %p6892_p5 }
 0x376   : > { %5482 = dma.done.wait (!%p5120_p6), %s3763_s6, 1024  }
 0x377   : > { %5484 = vsyncadd (!%p5120_p6), %s3763_s6, 4294966272  ;;  %s18_s22 = sadd.s32 1, %s5515_s22   ;;  %s6893_s15 = smov %s5491_s16 }
 0x378   : > { %p15_p7 = scmp.ge.s32.totalorder %s18_s22, 6   ;;  %s6894_s16 = smov %s5495_s17 }
 0x379   : > { %s6895_s17 = smov %s5628_s9  ;;  %s6896_s18 = smov %s5507_s20 }
 0x37a   : > { %s6897_s19 = smov %s5511_s21  ;;  %s6898_s20 = smov %s6901_s25 }
 0x37b   : > { %s6899_s21 = smov %s6905_s26  ;;  %17 = sbr.rel (!%p15_p7) target bundleno = 6 (0x6), region = 81 }
 0x382   :  { %3768 = vsyncpa [#allocation3], 1 }
 0x383   :  { %3770 = vsyncpa [#allocation3 + $0x1], 1 }
 0x384   :  { %3771 = vsyncpa [#allocation4], 1 }
 0x385   :  { %3773 = vsyncpa [#allocation4 + $0x1], 1 }

// kernel: tpu_custom_call.1
= control target key start
LH: loop header
LB: loop body
LE: loop exit
PB: predicated region body
PF: predicated region fallthrough
CT: control target
= control target key end

     0   :  { %9 = vsyncpa [#allocation3], 0  ;;  %s6873_s0 = inlined_call_operand.vmem [shape: bf16[2,20,18,128], index: 0, kind: input, shape index: {}]   ;;  %s6874_s1 = inlined_call_operand.vmem [shape: bf16[3,384,128], index: 1, kind: input, shape index: {}]   ;;  %s6875_s2 = inlined_call_operand.hbm [shape: bf16[3,384,128], index: 2, kind: input, shape index: {}]   ;;  %s6876_s3 = inlined_call_operand.vmem [shape: f32[1,1,128], index: 3, kind: input, shape index: {}]   ;;  %s6877_s4 = inlined_call_operand.hbm [shape: bf16[2,16,16,128], index: 4, kind: output, shape index: {}]  }
   0x1   :  { %10 = vsyncpa [#allocation4], 0 }
   0x2   :  { %12 = vsyncpa [#allocation4 + $0x1], 0  ;;  %s5549_s15 = smov 0   ;;  %s5551_s16 = smov 0  }
   0x3   :  { %s5553_s17 = smov 0   ;;  %s5555_s18 = smov 0  }
   0x4   :  { %s5557_s19 = smov 0   ;;  %s5559_s20 = smov 0  }
   0x5   :  { %s5561_s21 = smov 0   ;;  %s5563_s22 = smov 0  }
   0x6 LB: > { %s3837_s23 = sadd.s32 4294967295, %s5515_s22   ;;  %s3838_s24 = sadd.s32 4294967294, %s5515_s22   ;;  %s5515_s22 = sphi %s5563_s22, %s18_s22   ;;  %s5511_s21 = sphi %s5561_s21, %s6899_s21   ;;  %s5507_s20 = sphi %s5559_s20, %s6898_s20   ;;  %s5503_s19 = sphi %s5557_s19, %s6897_s19   ;;  %s5499_s18 = sphi %s5555_s18, %s6896_s18   ;;  %s5495_s17 = sphi %s5553_s17, %s6895_s17   ;;  %s5491_s16 = sphi %s5551_s16, %s6894_s16   ;;  %s5487_s15 = sphi %s5549_s15, %s6893_s15  }
   0x7   : > { %s27_s25 = sadd.s32 1, %s5507_s20  ;;  %s30_s26 = sadd.s32 1, %s5511_s21 }
   0x8   : > { %p28_p0 = scmp.ge.s32.totalorder %s27_s25, 2  ;;  %s128_s27 = sadd.s32 1, %s5495_s17 }
   0x9   : > { %p138_p1 = scmp.ne.s32.totalorder %s5495_s17, %s5491_s16  ;;  %p139_p2 = scmp.eq.s32.totalorder %s3837_s23, 3 }
   0xa   : > { %s6901_s25 = smov (%p28_p0, %s27_s25), 0  ;;  %s6903_s26 = smov (!%p28_p0, %s30_s26), %s5511_s21 }
   0xb   : > { %s124_s28 = ssub.s32 %s5507_s20, %s6901_s25  ;;  %p5601_p3 = por %p139_p2, %p138_p1 }
   0xc   : > { %p32_p4 = scmp.ge.s32.totalorder %s6903_s26, 2  ;;  %p144_p5 = scmp.ne.s32.totalorder %s5491_s16, %s5487_s15 }
   0xd   : > { %s6882_s29 = scalar_select %p5601_p3, 1, 0 }
   0xe   : > { %p145_p6 = scmp.eq.s32.totalorder %s3838_s24, 3  ;;  %p3839_p7 = scmp.ge.s32.totalorder %s5515_s22, 1 }
   0xf   : > { %s6905_s26 = smov (%p32_p4, %s6903_s26), 0  ;;  %p152_p9 = scmp.lt.s32.totalorder %s5515_s22, 5 }
  0x10   : > { %p5610_p8 = por %p145_p6, %p144_p5  ;;  %s123_s5 = ssub.s32 %s5511_s21, %s6905_s26 }
  0x11   : > { %s125_s6 = sor.u32 %s124_s28, %s123_s5  ;;  %p5617_p10 = pnand %p3839_p7, %p152_p9 }
  0x12   : > { %s6883_s30 = scalar_select %p5610_p8, 1, 0 }
  0x13   : > { %s6884_s7 = scalar_select %p5617_p10, 1, 0 }
  0x14   : > { %p126_p11 = scmp.eq.s32.totalorder %s125_s6, 0  ;;  %p5621_p12 = scmp.eq.s32.totalorder %s3837_s23, 0 }
  0x15   : > { %p5115_p13 = pneg %p5617_p10  ;;  %s5517_s10 = smov [#allocation2]  }
  0x16   : > { %s6885_s8 = scalar_select %p5621_p12, 1, 0 }
  0x17   : > { %s5628_s9 = scalar_select %p126_p11, %s5495_s17, %s128_s27  }
  0x18   : > { %s167_s11 = sshll.u32 %s5517_s10, 4  ;;  %p5632_p0 = pnand %p5621_p12, %p5115_p13  ;;  %s168_s11 = int_to_ptr.vmem [resolvable:$true] %s167_s11 }
  0x19   : > { %s5389_s23 = scalar_lea.hbm %s6875_s2, 9216 }
  0x1a   : > { %p5390_p1 = scmp.ne.s32.totalorder %s6875_s2, %s5389_s23  ;;  %p5391_p2 = pneg %p5632_p0 }
  0x1b   : > { %p5396_p6 = scmp.lt.u32.totalorder %s5389_s23, %s6875_s2 }
  0x1c   : > { %p5392_p4 = pnand %p5391_p2, %p5390_p1 }
  0x1e   : > { %p5393_p5 = pneg %p5392_p4 }
  0x20   : > { %p5398_p7 = pnand %p5396_p6, %p5393_p5 }
  0x22   : > { %5401 = shalt.err (!%p5398_p7)
}
  0x23   : > { %s5402_s6 = scalar_lea.vmem %s168_s11, 9216  ;;  %p5410_p8 = scmp.lt.s32.totalorder %s168_s11, %s168_s11 }
  0x24   : > { %p5403_p9 = scmp.ne.s32.totalorder %s168_s11, %s5402_s6  ;;  %p5411_p3 = scmp.lt.s32.totalorder %s5402_s6, %s5402_s6 }
  0x26   : > { %p5405_p11 = pnand %p5403_p9, %p5391_p2  ;;  %p5412_p12 = por %p5411_p3, %p5410_p8 }
  0x28   : > { %p5406_p13 = pneg %p5405_p11 }
  0x2a   : > { %p5413_p10 = pnand %p5412_p12, %p5406_p13 }
  0x2c   : > { %5416 = shalt.err (!%p5413_p10)
}
  0x2d   : > { %s5518_s10 = smov 64   ;;  %s5519_s13 = smov 4  }
  0x2e   : > { %5118 = dma.hbm_to_vmem [thread:$0]  (!%p5632_p0), %s6875_s2, 9216, %s168_s11, [#allocation3], %s5518_s10, %s5518_s10, %s5519_s13  }
  0x2f   : > { %p6887_p1 = scmp.ne.s32.totalorder %s6884_s7, 0 }
  0x30   : > { %p6888_p4 = scmp.ne.s32.totalorder (!%p6887_p1), %s6885_s8, 0 }
  0x31   : > { %194 = sbr.rel (%p6887_p1) target bundleno = 881 (0x371), region = 36 }
  0x38   : > { %5478 = dma.done.wait (%p6888_p4), [#allocation3], 9216  }
  0x39   : > { %5480 = vsyncadd (%p6888_p4), [#allocation3], 4294958080  ;;  %v5196_v0 = vld [vmem:[%s6874_s1 + $0x100] sm:$0xff]   ;;  %v5200_v4 = vld [vmem:[%s6874_s1 + $0x108] sm:$0xff]   ;;  %p220_p3 = scmp.lt.s32.totalorder %s5503_s19, 1  ;;  %s4137_s11 = smul.u32 96, %s5499_s18 }
  0x3a   : > { %v5197_v1 = vld [vmem:[%s6874_s1 + $0x40] sm:$0xff]   ;;  %4202 = vmatprep.subr.bf16.mxu0 %v5196_v0  ;;  %v5201_v5 = vld [vmem:[%s6874_s1 + $0x48] sm:$0xff]   ;;  %v5204_v8 = vld [vmem:[%s6874_s1 + $0x110] sm:$0xff]   ;;  %vm358_vm0 = vsmask.f32 7424  ;;  %vm489_vm1 = vcmask 1046528  }
  0x3b   : > { %v5198_v2 = vld [vmem:[%s6874_s1 + $0xc0] sm:$0xff]   ;;  %4296 = vmatprep.subr.bf16.mxu1 %v5197_v1  ;;  %v5202_v6 = vld [vmem:[%s6874_s1 + $0xc8] sm:$0xff]   ;;  %v5205_v9 = vld [vmem:[%s6874_s1 + $0x50] sm:$0xff]   ;;  %s221_s28 = scalar_select %p220_p3, %s5503_s19, 1  ;;  %vm2108_vm10 = vcmask 1040384  }
  0x3c   : > { %v5199_v3 = vld [vmem:[%s6874_s1] sm:$0xff]   ;;  %4203 = vmatpush3.bf16.msra.mxu0 %v5198_v2  ;;  %v5203_v7 = vld [vmem:[%s6874_s1 + $0x8] sm:$0xff]   ;;  %v5206_v10 = vld [vmem:[%s6874_s1 + $0xd0] sm:$0xff]   ;;  %s3846_s5 = sshll.u32 %s5499_s18, 3  ;;  %vm2109_vm11 = vsmask.f32 256 }
  0x3d   : > { %4297 = vmatpush3.bf16.msra.mxu1 %v5199_v3  ;;  %4204 = vmatprep.subr.bf16.mxu0 %v5200_v4  ;;  %v5207_v11 = vld [vmem:[%s6874_s1 + $0x10] sm:$0xff]   ;;  %v5208_v12 = vld [vmem:[%s6874_s1 + $0x118] sm:$0xff]   ;;  %v5212_v16 = vld [vmem:[%s6874_s1 + $0x120] sm:$0xff]   ;;  %s5108_s13 = smul.u32 240, %s221_s28  ;;  %s217_s28 = sand.u32 1, %s5491_s16  }
  0x3e   : > { %4298 = vmatprep.subr.bf16.mxu1 %v5201_v5  ;;  %v5209_v13 = vld [vmem:[%s6874_s1 + $0x58] sm:$0xff]   ;;  %v5213_v17 = vld [vmem:[%s6874_s1 + $0x60] sm:$0xff]   ;;  %v5216_v20 = vld [vmem:[%s6874_s1 + $0x128] sm:$0xff]   ;;  %s6755_s8 = sshll.u32 %s217_s28, 6  ;;  %s4133_s14 = sshll.u32 %s5503_s19, 5 }
  0x3f   : > { %v5210_v14 = vld [vmem:[%s6874_s1 + $0xd8] sm:$0xff]   ;;  %v5214_v18 = vld [vmem:[%s6874_s1 + $0xe0] sm:$0xff]   ;;  %v5217_v21 = vld [vmem:[%s6874_s1 + $0x68] sm:$0xff]   ;;  %s224_s10 = scalar_lea.vmem %s6873_s0, %s5108_s13  ;;  %s6821_s12 = scalar_lea.sflag [#allocation4], %s217_s28 }
  0x40   : > { %4205 = vmatpush3.bf16.msra.mxu0 %v5202_v6  ;;  %v5211_v15 = vld [vmem:[%s6874_s1 + $0x18] sm:$0xff]   ;;  %v5215_v19 = vld [vmem:[%s6874_s1 + $0x20] sm:$0xff]   ;;  %v5218_v22 = vld [vmem:[%s6874_s1 + $0xe8] sm:$0xff]   ;;  %s5757_s7 = scalar_lea.vmem %s224_s10, %s4137_s11  ;;  %s6768_s10 = scalar_lea.vmem [#allocation5], %s6755_s8 }
  0x41   : > { %4299 = vmatpush3.bf16.msra.mxu1 %v5203_v7  ;;  %4206 = vmatprep.subr.bf16.mxu0 %v5204_v8  ;;  %v5219_v23 = vld [vmem:[%s6874_s1 + $0x28] sm:$0xff]   ;;  %v5220_v24 = vld [vmem:[%s6874_s1 + $0x130] sm:$0xff]   ;;  %v5224_v28 = vld [vmem:[%s6874_s1 + $0x138] sm:$0xff]   ;;  %s3747_s24 = sshll.u32 %s6768_s10, 4  ;;  %p6891_p10 = scmp.ne.s32.totalorder %s6882_s29, 0  ;;  %s6815_s24 = int_to_ptr.vmem [resolvable:$true] %s3747_s24 }
  0x42   : > { %4300 = vmatprep.subr.bf16.mxu1 %v5205_v9  ;;  %v5221_v25 = vld [vmem:[%s6874_s1 + $0x70] sm:$0xff]   ;;  %v5225_v29 = vld [vmem:[%s6874_s1 + $0x78] sm:$0xff]   ;;  %v5769_v34 = vld [vmem:[%s5757_s7] sm:$0xff]   ;;  %s5417_s13 = scalar_lea.vmem %s6815_s24, 1024  ;;  %s5521_s6 = smov [#allocation5]  }
  0x43   : > { %v5222_v26 = vld [vmem:[%s6874_s1 + $0xf0] sm:$0xff]   ;;  %v5226_v30 = vld [vmem:[%s6874_s1 + $0xf8] sm:$0xff]   ;;  %v5775_v38 = vld [vmem:[%s5757_s7 + $0x8] ss:$0 sps:$4 sm:$0x11]   ;;  %v360_v39 = vshrl.u32 %v5769_v34, 16  ;;  %p5418_p8 = scmp.ne.s32.totalorder %s6815_s24, %s5417_s13 }
  0x44   : > { %4207 = vmatpush3.bf16.msra.mxu0 %v5206_v10  ;;  %v5223_v27 = vld [vmem:[%s6874_s1 + $0x30] sm:$0xff]   ;;  %v5227_v31 = vld [vmem:[%s6874_s1 + $0x38] sm:$0xff]   ;;  %v362_v40 = vshll.u32 %v5769_v34, 16  ;;  %v367_v43 = vshll.u32 %v5775_v38, 16  ;;  %v5232_v44 = vld [vmem:[%s6874_s1 + $0x140] sm:$0xff]   ;;  %s5421_s11 = sshll.u32 %s5521_s6, 4  ;;  %s5422_s11 = int_to_ptr.vmem [resolvable:$false] %s5421_s11 }
  0x45   : > { %4301 = vmatpush3.bf16.msra.mxu1 %v5207_v11  ;;  %4208 = vmatprep.subr.bf16.mxu0 %v5208_v12  ;;  %v5763_v32 = vld [vmem:[%s5757_s7 + $0xc] sm:$0xff]   ;;  %v5766_v33 = vld [vmem:[%s5757_s7 + $0x14] ss:$0 sps:$4 sm:$0x11]   ;;  %v5784_v45 = vld [vmem:[%s5757_s7 + $0x18] sm:$0xff]   ;;  %p5419_p12 = pnand %p5418_p8, %p6891_p10  ;;  %s5423_s8 = scalar_lea.vmem %s5422_s11, 2048 }
  0x46   : > { %4302 = vmatprep.subr.bf16.mxu1 %v5209_v13  ;;  %v372_v35 = vshrl.u32 %v5763_v32, 16  ;;  %v374_v36 = vshll.u32 %v5763_v32, 16  ;;  %v379_v37 = vshll.u32 %v5766_v33, 16  ;;  %v364_v46 = vrot.slane %v362_v40, 1  ;;  %v240_v47 = vld [vmem:[%s5757_s7 + $0x20] sm:$0x1]  ;;  %vm6355_vm13 = vmand %vm2108_vm10, %vm2109_vm11  ;;  %p5424_p2 = scmp.lt.s32.totalorder %s6815_s24, %s5422_s11  ;;  %p5425_p5 = scmp.lt.s32.totalorder %s5423_s8, %s5417_s13 }
  0x47   : > { %v5788_v48 = vld [vmem:[%s5757_s7 + $0x24] sm:$0xff]   ;;  %v369_v50 = vrot.slane %v367_v43, 1  ;;  %v5790_v51 = vcombine.low %v240_v47, %v240_v47  ;;  %v243_v53 = vld [vmem:[%s5757_s7 + $0x2c] sm:$0x1]  ;;  %v384_v55 = vshrl.u32 %v5784_v45, 16  ;;  %v386_v56 = vshll.u32 %v5784_v45, 16  ;;  %p5420_p0 = pneg %p5419_p12 }
  0x48   : > { %4209 = vmatpush3.bf16.msra.mxu0 %v5210_v14  ;;  %v376_v41 = vrot.slane %v374_v36, 1  ;;  %v381_v42 = vrot.slane %v379_v37, 1  ;;  %v5235_v52 = vld [vmem:[%s6874_s1 + $0x148] sm:$0xff]   ;;  %v365_v54 = vor.u32 %v364_v46, %v360_v39  ;;  %v5798_v57 = vcombine.low %v243_v53, %v243_v53  ;;  %v5805_v62 = vld [vmem:[%s5757_s7 + $0x30] sm:$0xff]   ;;  %v246_v63 = vld [vmem:[%s5757_s7 + $0x38] sm:$0x1]  ;;  %p5426_p6 = por %p5425_p5, %p5424_p2 }
  0x49   : > { %4303 = vmatpush3.bf16.msra.mxu1 %v5211_v15  ;;  %4210 = vmatprep.subr.bf16.mxu0 %v5212_v16  ;;  %v391_v59 = vshll.u32 %v5790_v51, 16  ;;  %v396_v60 = vshrl.u32 %v5788_v48, 16  ;;  %v398_v61 = vshll.u32 %v5788_v48, 16  ;;  %v388_v1 = vrot.slane %v386_v56, 1  ;;  %v5244_v7 = vld [vmem:[%s6874_s1 + $0x80] sm:$0xff]   ;;  %v5238_v10 = vld [vmem:[%s6874_s1 + $0x150] sm:$0xff]  }
  0x4a   : > { %4304 = vmatprep.subr.bf16.mxu1 %v5213_v17  ;;  %v377_v49 = vor.u32 %v376_v41, %v372_v35  ;;  %v370_v0 = vsel %vm358_vm0, %v365_v54, %v369_v50  ;;  %v403_v2 = vshll.u32 %v5798_v57, 16  ;;  %v5812_v6 = vcombine.low %v246_v63, %v246_v63  ;;  %v5825_v13 = vld [vmem:[%s5757_s7 + $0x3c] sm:$0xff]   ;;  %v5248_v14 = vld [vmem:[%s6874_s1 + $0x88] sm:$0xff]   ;;  %v5882_v46 = vld [vmem:[%s5757_s7 + $0x54] sm:$0xff]   ;;  %p5427_p7 = pnand %p5426_p6, %p5420_p0 }
  0x4b   : > { %1199 = vmatprep.mubr.bf16.mxu1 %v370_v0  ;;  %v393_v3 = vrot.slane %v391_v59, 1  ;;  %v400_v4 = vrot.slane %v398_v61, 1  ;;  %v389_v5 = vor.u32 %v388_v1, %v384_v55  ;;  %v410_v11 = vshll.u32 %v5805_v62, 16  ;;  %v5251_v37 = vld [vmem:[%s6874_s1 + $0x168] sm:$0xff]   ;;  %v5259_v39 = vld [vmem:[%s6874_s1 + $0xa0] sm:$0xff]   ;;  %v5255_v47 = vld [vmem:[%s6874_s1 + $0x170] sm:$0xff]  }
  0x4c   : > { %4211 = vmatpush3.bf16.msra.mxu0 %v5214_v18  ;;  %v382_v58 = vsel %vm358_vm0, %v377_v49, %v381_v42  ;;  %v405_v9 = vrot.slane %v403_v2, 1  ;;  %v415_v15 = vshll.u32 %v5812_v6, 16  ;;  %v408_v17 = vshrl.u32 %v5805_v62, 16  ;;  %v5260_v40 = vld [vmem:[%s6874_s1 + $0xa8] sm:$0xff]   ;;  %v255_v49 = vld [vmem:[%s5757_s7 + $0x5c] sm:$0x1] }
  0x4d   : > { %4305 = vmatpush3.bf16.msra.mxu1 %v5215_v19  ;;  %4212 = vmatprep.subr.bf16.mxu0 %v5216_v20  ;;  %v401_v8 = vor.u32 %v400_v4, %v396_v60  ;;  %v5822_v12 = vsel %vm358_vm0, %v389_v5, %v393_v3  ;;  %v412_v18 = vrot.slane %v410_v11, 1  ;;  %v5241_v19 = vld [vmem:[%s6874_s1 + $0x158] sm:$0xff]   ;;  %v249_v20 = vld [vmem:[%s5757_s7 + $0x44] sm:$0x1]  ;;  %v493_v50 = vrot.slane %v5763_v32, 1 }
  0x4e   : > { %4306 = vmatprep.subr.bf16.mxu1 %v5217_v21  ;;  %829 = vmatprep.mubr.bf16.mxu0 %v382_v58  ;;  %v5254_v21 = vld [vmem:[%s6874_s1 + $0x90] sm:$0xff]   ;;  %v494_v53 = vrot.slane %v5766_v33, 1  ;;  %v490_v54 = vrot.slane %v5769_v34, 1  ;;  %v491_v55 = vrot.slane %v5775_v38, 1  ;;  %v5912_v60 = vcombine.low %v255_v49, %v255_v49  ;;  %v5915_v61 = vld [vmem:[%s5757_s7 + $0x60] sm:$0xff]   ;;  %v5265_v63 = vld [vmem:[%s6874_s1 + $0xb8] sm:$0xff]  }
  0x4f   : > { %v5833_v16 = vsel %vm358_vm0, %v401_v8, %v405_v9  ;;  %v5264_v33 = vld [vmem:[%s6874_s1 + $0xb0] sm:$0xff]   ;;  %v446_v2 = vshll.u32 %v5882_v46, 16  ;;  %v5266_v3 = vld [vmem:[%s6874_s1 + $0x1c0] sm:$0xff]   ;;  %v444_v4 = vshrl.u32 %v5882_v46, 16 }
  0x50   : > { %4213 = vmatpush3.bf16.msra.mxu0 %v5218_v22  ;;  %v417_v22 = vrot.slane %v415_v15, 1  ;;  %v5907_v38 = vsel %vm489_vm1, %v490_v54, %v491_v55  ;;  %v451_v5 = vshll.u32 %v5912_v60, 16  ;;  %v5933_v9 = vld [vmem:[%s6874_s1 + $0x200] sm:$0xff]   ;;  %v499_v54 = vrot.slane %v5788_v48, 1 }
  0x51   : > { %4307 = vmatpush3.bf16.msra.mxu1 %v5219_v23  ;;  %4214 = vmatprep.subr.bf16.mxu0 %v5220_v24  ;;  %v5847_v23 = vld [vmem:[%s5757_s7 + $0x48] sm:$0xff]   ;;  %v413_v24 = vor.u32 %v412_v18, %v408_v17  ;;  %v448_v8 = vrot.slane %v446_v2, 1  ;;  %v458_v17 = vshll.u32 %v5915_v61, 16  ;;  %v500_v55 = vrot.slane %v5798_v57, 1 }
  0x52   : > { %4308 = vmatprep.subr.bf16.mxu1 %v5221_v25  ;;  %v5850_v25 = vcombine.low %v249_v20, %v249_v20  ;;  %v453_v11 = vrot.slane %v451_v5, 1  ;;  %v5944_v18 = vld [vmem:[%s5757_s7 + $0x6c] sm:$0xff]   ;;  %v456_v20 = vshrl.u32 %v5915_v61, 16  ;;  %v512_v2 = vrot.slane %v5912_v60, 1 }
  0x53   : > { %v5269_v5 = vld [vmem:[%s6874_s1 + $0x188] sm:$0xff]  }
  0x54   : > { %4215 = vmatpush3.bf16.msra.mxu0 %v5222_v26  ;;  %v422_v26 = vshll.u32 %v5825_v13, 16  ;;  %v427_v36 = vshll.u32 %v5850_v25, 16  ;;  %v506_v57 = vrot.slane %v5850_v25, 1  ;;  %v5267_v25 = vld [vmem:[%s6874_s1 + $0x180] sm:$0xff]  }
  0x55   : > { %4309 = vmatpush3.bf16.msra.mxu1 %v5223_v27  ;;  %4216 = vmatprep.subr.bf16.mxu0 %v5224_v28  ;;  %v5256_v27 = vld [vmem:[%s6874_s1 + $0x98] sm:$0xff]   ;;  %v5247_v28 = vld [vmem:[%s6874_s1 + $0x160] sm:$0xff]  }
  0x56   : > { %4310 = vmatprep.subr.bf16.mxu1 %v5225_v29  ;;  %v252_v29 = vld [vmem:[%s5757_s7 + $0x50] sm:$0x1]  ;;  %v424_v35 = vrot.slane %v422_v26, 1  ;;  %v429_v42 = vrot.slane %v427_v36, 1 }
  0x57   : > { %v5878_v43 = vcombine.low %v252_v29, %v252_v29  ;;  %v470_v29 = vshll.u32 %v5944_v18, 16 }
  0x58   : > { %4217 = vmatpush3.bf16.msra.mxu0 %v5226_v30  ;;  %v5861_v30 = vsel %vm358_vm0, %v413_v24, %v417_v22  ;;  %v460_v24 = vrot.slane %v458_v17, 1  ;;  %v5278_v17 = vld [vmem:[%s6874_s1 + $0x218] sm:$0xff]  }
  0x59   : > { %4311 = vmatpush3.bf16.msra.mxu1 %v5227_v31  ;;  %4724 = vmatprep.subr.bf16.mxu0 %v5232_v44  ;;  %v420_v31 = vshrl.u32 %v5825_v13, 16  ;;  %v439_v59 = vshll.u32 %v5878_v43, 16 }
  0x5a   : > { %4760 = vmatprep.subr.bf16.mxu1 %v5244_v7 }
  0x5b   : > { %830 = vmatmul.mubr.bf16.vlgmr.msra.gmra.mrb[0].mxu0 %v5763_v32  ;;  %v425_v41 = vor.u32 %v424_v35, %v420_v31  ;;  %v441_v1 = vrot.slane %v439_v59, 1  ;;  %v461_v31 = vor.u32 %v460_v24, %v456_v20  ;;  %v503_v59 = vrot.slane %v5812_v6, 1  ;;  %v5277_v20 = vld [vmem:[%s6874_s1 + $0x1e0] sm:$0xff]  }
  0x5c   : > { %1200 = vmatmul.mubr.bf16.vlgmr.msra.gmra.mrb[0].mxu1 %v5769_v34  ;;  %4725 = vmatpush3.bf16.msra.mxu0 %v5232_v44  ;;  %v434_v44 = vshll.u32 %v5847_v23, 16  ;;  %v5904_v34 = vsel %vm489_vm1, %v493_v50, %v494_v53  ;;  %v497_v53 = vrot.slane %v5790_v51, 1  ;;  %v505_v51 = vrot.slane %v5825_v13, 1  ;;  %v5280_v24 = vld [vmem:[%s6874_s1 + $0x220] sm:$0xff]  }
  0x5d   : > { %1207 = vmatprep.mubr.bf16.mxu1 %v382_v58  ;;  %4726 = vmatprep.subr.bf16.mxu0 %v5235_v52  ;;  %v5894_v56 = vsel %vm358_vm0, %v425_v41, %v429_v42  ;;  %v472_v41 = vrot.slane %v470_v29, 1 }
  0x5e   : > { %837 = vmatprep.mubr.bf16.mxu0 %v5822_v12  ;;  %4761 = vmatpush3.bf16.msra.mxu1 %v5244_v7  ;;  %v436_v58 = vrot.slane %v434_v44, 1 }
  0x5f   : > { %4762 = vmatprep.subr.bf16.mxu1 %v5248_v14 }
  0x60   : > { %4727 = vmatpush3.bf16.msra.mxu0 %v5235_v52  ;;  %v432_v52 = vshrl.u32 %v5847_v23, 16 }
  0x61   : > { %4728 = vmatprep.subr.bf16.mxu0 %v5238_v10 }
  0x62   : > { %4763 = vmatpush3.bf16.msra.mxu1 %v5248_v14  ;;  %v437_v0 = vor.u32 %v436_v58, %v432_v52  ;;  %v449_v14 = vor.u32 %v448_v8, %v444_v4  ;;  %v496_v52 = vrot.slane %v5784_v45, 1  ;;  %v502_v58 = vrot.slane %v5805_v62, 1  ;;  %v5273_v4 = vld [vmem:[%s6874_s1 + $0x208] sm:$0xff]   ;;  %v5271_v8 = vld [vmem:[%s6874_s1 + $0x1d0] sm:$0xff]  }
  0x63   : > { %838 = vmatmul.mubr.bf16.gmra.mrb[4].mxu0 %v5784_v45  ;;  %4764 = vmatprep.subr.bf16.mxu1 %v5254_v21 }
  0x64   : > { %1208 = vmatmul.mubr.bf16.gmra.mrb[4].mxu1 %v5763_v32  ;;  %845 = vmatprep.mubr.bf16.mxu0 %v5833_v16  ;;  %v5261_v32 = vld [vmem:[%s6874_s1 + $0x178] sm:$0xff]   ;;  %v5928_v7 = vsel %vm358_vm0, %v437_v0, %v441_v1  ;;  %v5953_v22 = vsel %vm358_vm0, %v449_v14, %v453_v11  ;;  %v509_v0 = vrot.slane %v5878_v43, 1  ;;  %v511_v1 = vrot.slane %v5882_v46, 1  ;;  %v5268_v43 = vld [vmem:[%s6874_s1 + $0x1c8] sm:$0xff]   ;;  %v5272_v11 = vld [vmem:[%s6874_s1 + $0x190] sm:$0xff]  }
  0x65   : > { %1215 = vmatprep.mubr.bf16.mxu1 %v5822_v12  ;;  %4729 = vmatpush3.bf16.msra.mxu0 %v5238_v10  ;;  %v258_v10 = vld [vmem:[%s5757_s7 + $0x68] sm:$0x1]  ;;  %v6015_v60 = vsel %vm489_vm1, %v496_v52, %v497_v53  ;;  %v5274_v14 = vld [vmem:[%s6874_s1 + $0x1d8] sm:$0xff]   ;;  %v5285_v52 = vld [vmem:[%s6874_s1 + $0x1b0] sm:$0xff]  }
  0x66   : > { %4730 = vmatprep.subr.bf16.mxu0 %v5241_v19  ;;  %4765 = vmatpush3.bf16.msra.mxu1 %v5254_v21  ;;  %v5940_v15 = vcombine.low %v258_v10, %v258_v10  ;;  %v5950_v21 = vld [vmem:[%s5757_s7 + $0x80] ss:$0 sps:$4 sm:$0x11]   ;;  %v5276_v10 = vld [vmem:[%s6874_s1 + $0x210] sm:$0xff]   ;;  %v5289_v53 = vld [vmem:[%s6874_s1 + $0x238] sm:$0xff]  }
  0x67   : > { %4766 = vmatprep.subr.bf16.mxu1 %v5256_v27 }
  0x68   : > { %v463_v26 = vshll.u32 %v5940_v15, 16 }
  0x69   : > { %4731 = vmatpush3.bf16.msra.mxu0 %v5241_v19  ;;  %v261_v19 = vld [vmem:[%s5757_s7 + $0x74] sm:$0x1] }
  0x6a   : > { %4732 = vmatprep.subr.bf16.mxu0 %v5247_v28  ;;  %4767 = vmatpush3.bf16.msra.mxu1 %v5256_v27  ;;  %v5956_v27 = vcombine.low %v261_v19, %v261_v19  ;;  %v465_v35 = vrot.slane %v463_v26, 1  ;;  %v5275_v19 = vld [vmem:[%s6874_s1 + $0x198] sm:$0xff]   ;;  %v5279_v26 = vld [vmem:[%s6874_s1 + $0x1a0] sm:$0xff]  }
  0x6b   : > { %846 = vmatmul.mubr.bf16.gmra.mrb[8].mxu0 %v5788_v48  ;;  %4768 = vmatprep.subr.bf16.mxu1 %v5259_v39 }
  0x6c   : > { %1216 = vmatmul.mubr.bf16.gmra.mrb[8].mxu1 %v5784_v45  ;;  %853 = vmatprep.mubr.bf16.mxu0 %v5861_v30  ;;  %v475_v36 = vshll.u32 %v5956_v27, 16  ;;  %v5971_v42 = vsel %vm358_vm0, %v461_v31, %v465_v35  ;;  %v5281_v31 = vld [vmem:[%s6874_s1 + $0x1e8] sm:$0xff]  }
  0x6d   : > { %1223 = vmatprep.mubr.bf16.mxu1 %v5833_v16  ;;  %4733 = vmatpush3.bf16.msra.mxu0 %v5247_v28  ;;  %v5959_v28 = vld [vmem:[%s5757_s7 + $0x78] sm:$0xff]   ;;  %v5283_v35 = vld [vmem:[%s6874_s1 + $0x228] sm:$0xff]  }
  0x6e   : > { %4734 = vmatprep.subr.bf16.mxu0 %v5251_v37  ;;  %4769 = vmatpush3.bf16.msra.mxu1 %v5259_v39  ;;  %v595_v39 = vshll.u32 %v5950_v21, 16  ;;  %v477_v44 = vrot.slane %v475_v36, 1  ;;  %v513_v36 = vsel %vm489_vm1, %v511_v1, %v512_v2  ;;  %v5295_v2 = vld [vmem:[#allocation2 + $0x108] sm:$0xff]  }
  0x6f   : > { %4770 = vmatprep.subr.bf16.mxu1 %v5260_v40 }
  0x70   : > { %v597_v50 = vrot.slane %v595_v39, 1  ;;  %v515_v39 = vrot.slane %v5940_v15, 1  ;;  %v5286_v15 = vld [vmem:[%s6874_s1 + $0x230] sm:$0xff]  }
  0x71   : > { %4735 = vmatpush3.bf16.msra.mxu0 %v5251_v37  ;;  %v590_v37 = vshll.u32 %v5959_v28, 16 }
  0x72   : > { %4736 = vmatprep.subr.bf16.mxu0 %v5255_v47  ;;  %4771 = vmatpush3.bf16.msra.mxu1 %v5260_v40  ;;  %v468_v40 = vshrl.u32 %v5944_v18, 16 }
  0x73   : > { %854 = vmatmul.mubr.bf16.gmra.mrb[12].mxu0 %v5805_v62  ;;  %4772 = vmatprep.subr.bf16.mxu1 %v5264_v33  ;;  %v592_v49 = vrot.slane %v590_v37, 1  ;;  %v514_v37 = vrot.slane %v5915_v61, 1 }
  0x74   : > { %1224 = vmatmul.mubr.bf16.gmra.mrb[12].mxu1 %v5788_v48  ;;  %861 = vmatprep.mubr.bf16.mxu0 %v5894_v56 }
  0x75   : > { %1231 = vmatprep.mubr.bf16.mxu1 %v5861_v30  ;;  %4737 = vmatpush3.bf16.msra.mxu0 %v5255_v47  ;;  %v588_v47 = vshrl.u32 %v5959_v28, 16 }
  0x76   : > { %4738 = vmatprep.subr.bf16.mxu0 %v5261_v32  ;;  %4773 = vmatpush3.bf16.msra.mxu1 %v5264_v33 }
  0x77   : > { %4774 = vmatprep.subr.bf16.mxu1 %v5265_v63  ;;  %v593_v6 = vor.u32 %v592_v49, %v588_v47  ;;  %v518_v47 = vrot.slane %v5956_v27, 1  ;;  %v516_v49 = vsel %vm489_vm1, %v514_v37, %v515_v39  ;;  %v5287_v27 = vld [vmem:[%s6874_s1 + $0x1f8] sm:$0xff]   ;;  %v5304_v37 = vld [vmem:[#allocation2 + $0x120] sm:$0xff]  }
  0x79   : > { %4739 = vmatpush3.bf16.msra.mxu0 %v5261_v32  ;;  %v473_v32 = vor.u32 %v472_v41, %v468_v40  ;;  %v5282_v40 = vld [vmem:[%s6874_s1 + $0x1a8] sm:$0xff]   ;;  %v5284_v41 = vld [vmem:[%s6874_s1 + $0x1f0] sm:$0xff]  }
  0x7a   : > { %4390 = vmatprep.subr.bf16.mxu0 %v5266_v3  ;;  %4775 = vmatpush3.bf16.msra.mxu1 %v5265_v63  ;;  %v508_v63 = vrot.slane %v5847_v23, 1  ;;  %v5998_v3 = vsel %vm358_vm0, %v593_v6, %v597_v50 }
  0x7b   : > { %862 = vmatmul.mubr.bf16.gmra.mrb[16].mxu0 %v5825_v13  ;;  %4796 = vmatprep.subr.bf16.mxu1 %v5933_v9  ;;  %v5985_v33 = vsel %vm358_vm0, %v473_v32, %v477_v44  ;;  %v517_v44 = vrot.slane %v5944_v18, 1 }
  0x7c   : > { %1232 = vmatmul.mubr.bf16.gmra.mrb[16].mxu1 %v5805_v62  ;;  %869 = vmatprep.mubr.bf16.mxu0 %v5928_v7  ;;  %v510_v29 = vsel %vm489_vm1, %v508_v63, %v509_v0  ;;  %v5294_v63 = vld [vmem:[#allocation2 + $0x140] sm:$0xff]  }
  0x7d   : > { %1239 = vmatprep.mubr.bf16.mxu1 %v5894_v56  ;;  %v519_v50 = vsel %vm489_vm1, %v517_v44, %v518_v47 }
  0x83   : > { %870 = vmatmul.mubr.bf16.gmra.mrb[20].mxu0 %v5847_v23 }
  0x84   : > { %1240 = vmatmul.mubr.bf16.gmra.mrb[20].mxu1 %v5825_v13  ;;  %877 = vmatprep.mubr.bf16.mxu0 %v5953_v22 }
  0x85   : > { %1247 = vmatprep.mubr.bf16.mxu1 %v5928_v7 }
  0x8b   : > { %878 = vmatmul.mubr.bf16.gmra.mrb[24].mxu0 %v5882_v46 }
  0x8c   : > { %1248 = vmatmul.mubr.bf16.gmra.mrb[24].mxu1 %v5847_v23  ;;  %885 = vmatprep.mubr.bf16.mxu0 %v5971_v42 }
  0x8d   : > { %1255 = vmatprep.mubr.bf16.mxu1 %v5953_v22 }
  0x93   : > { %886 = vmatmul.mubr.bf16.gmra.mrb[28].mxu0 %v5915_v61 }
  0x94   : > { %1256 = vmatmul.mubr.bf16.gmra.mrb[28].mxu1 %v5882_v46  ;;  %893 = vmatprep.mubr.bf16.mxu0 %v5985_v33 }
  0x95   : > { %1263 = vmatprep.mubr.bf16.mxu1 %v5971_v42 }
  0x9b   : > { %894 = vmatmul.mubr.bf16.gmra.mrb[32].mxu0 %v5944_v18 }
  0x9c   : > { %1264 = vmatmul.mubr.bf16.gmra.mrb[32].mxu1 %v5915_v61  ;;  %901 = vmatprep.mubr.bf16.mxu0 %v5998_v3 }
  0x9d   : > { %1271 = vmatprep.mubr.bf16.mxu1 %v5985_v33 }
  0xa3   : > { %902 = vmatmul.mubr.bf16.gmra.mrb[36].mxu0 %v5959_v28 }
  0xa4   : > { %1272 = vmatmul.mubr.bf16.gmra.mrb[36].mxu1 %v5944_v18  ;;  %4740 = vmatprep.mubr.bf16.mxu0 %v5904_v34 }
  0xa5   : > { %4776 = vmatprep.mubr.bf16.mxu1 %v5907_v38  ;;  %v6024_v38 = vsel %vm489_vm1, %v499_v54, %v500_v55  ;;  %v600_v54 = vrot.slane %v5959_v28, 1  ;;  %v601_v55 = vrot.slane %v5950_v21, 1 }
  0xab   : > { %4741 = vmatmul.mubr.bf16.vlgmr.msra.gmra.mrb[40].mxu0 %v6015_v60 }
  0xac   : > { %4777 = vmatmul.mubr.bf16.vlgmr.msra.gmra.mrb[40].mxu1 %v5904_v34  ;;  %4391 = vmatpush3.bf16.msra.mxu0 %v5267_v25  ;;  %v6041_v34 = vsel %vm489_vm1, %v502_v58, %v503_v59  ;;  %v5288_v58 = vld [vmem:[%s6874_s1 + $0x1b8] sm:$0xff]   ;;  %v602_v59 = vsel %vm489_vm1, %v600_v54, %v601_v55  ;;  %v5296_v25 = vld [vmem:[#allocation2 + $0xc8] sm:$0xff]  }
  0xad   : > { %4392 = vmatprep.subr.bf16.mxu0 %v5268_v43  ;;  %4744 = vmatprep.mubr.bf16.mxu0 %v6024_v38  ;;  %v5307_v54 = vld [vmem:[#allocation2 + $0x128] sm:$0xff]  }
  0xae   : > { %4780 = vmatprep.mubr.bf16.mxu1 %v6015_v60  ;;  %4797 = vmatpush3.bf16.msra.mxu1 %v5933_v9  ;;  %v6050_v9 = vsel %vm489_vm1, %v505_v51, %v506_v57 }
  0xaf   : > { %4798 = vmatprep.subr.bf16.mxu1 %v5273_v4 }
  0xb0   : > { %4393 = vmatpush3.bf16.msra.mxu0 %v5269_v5 }
  0xb1   : > { %4394 = vmatprep.subr.bf16.mxu0 %v5271_v8 }
  0xb2   : > { %4799 = vmatpush3.bf16.msra.mxu1 %v5273_v4  ;;  %v5298_v4 = vld [vmem:[#allocation2 + $0x110] sm:$0xff]  }
  0xb3   : > { %4745 = vmatmul.mubr.bf16.gmra.mrb[44].mxu0 %v6041_v34  ;;  %4800 = vmatprep.subr.bf16.mxu1 %v5276_v10 }
  0xb4   : > { %4781 = vmatmul.mubr.bf16.gmra.mrb[44].mxu1 %v6024_v38  ;;  %4395 = vmatpush3.bf16.msra.mxu0 %v5272_v11 }
  0xb5   : > { %4748 = vmatprep.mubr.bf16.mxu0 %v6050_v9  ;;  %4784 = vmatprep.mubr.bf16.mxu1 %v6041_v34 }
  0xb6   : > { %4396 = vmatprep.subr.bf16.mxu0 %v5274_v14  ;;  %4801 = vmatpush3.bf16.msra.mxu1 %v5276_v10 }
  0xb7   : > { %4802 = vmatprep.subr.bf16.mxu1 %v5278_v17 }
  0xb8   : > { %4397 = vmatpush3.bf16.msra.mxu0 %v5275_v19 }
  0xb9   : > { %4398 = vmatprep.subr.bf16.mxu0 %v5277_v20 }
  0xba   : > { %4803 = vmatpush3.bf16.msra.mxu1 %v5278_v17  ;;  %v5300_v17 = vld [vmem:[#allocation2 + $0x150] sm:$0xff]  }
  0xbb   : > { %4749 = vmatmul.mubr.bf16.gmra.mrb[48].mxu0 %v510_v29  ;;  %4804 = vmatprep.subr.bf16.mxu1 %v5280_v24 }
  0xbc   : > { %4785 = vmatmul.mubr.bf16.gmra.mrb[48].mxu1 %v6050_v9  ;;  %4399 = vmatpush3.bf16.msra.mxu0 %v5279_v26 }
  0xbd   : > { %4752 = vmatprep.mubr.bf16.mxu0 %v513_v36  ;;  %4788 = vmatprep.mubr.bf16.mxu1 %v510_v29 }
  0xbe   : > { %4400 = vmatprep.subr.bf16.mxu0 %v5281_v31  ;;  %4805 = vmatpush3.bf16.msra.mxu1 %v5280_v24  ;;  %v5301_v24 = vld [vmem:[#allocation2 + $0x118] sm:$0xff]  }
  0xbf   : > { %4806 = vmatprep.subr.bf16.mxu1 %v5283_v35  ;;  %v5302_v31 = vld [vmem:[#allocation2 + $0xd8] sm:$0xff]  }
  0xc0   : > { %4401 = vmatpush3.bf16.msra.mxu0 %v5282_v40  ;;  %v5305_v40 = vld [vmem:[#allocation2 + $0xe0] sm:$0xff]  }
  0xc1   : > { %4402 = vmatprep.subr.bf16.mxu0 %v5284_v41 }
  0xc2   : > { %4807 = vmatpush3.bf16.msra.mxu1 %v5283_v35 }
  0xc3   : > { %4753 = vmatmul.mubr.bf16.gmra.mrb[52].mxu0 %v516_v49  ;;  %4808 = vmatprep.subr.bf16.mxu1 %v5286_v15 }
  0xc4   : > { %4789 = vmatmul.mubr.bf16.gmra.mrb[52].mxu1 %v513_v36  ;;  %4756 = vmatprep.mubr.bf16.mxu0 %v519_v50 }
  0xc5   : > { %4792 = vmatprep.mubr.bf16.mxu1 %v516_v49  ;;  %4403 = vmatpush3.bf16.msra.mxu0 %v5285_v52 }
  0xc6   : > { %4809 = vmatpush3.bf16.msra.mxu1 %v5286_v15  ;;  %4404 = vmatprep.subr.bf16.mxu0 %v5287_v27 }
  0xc7   : > { %4810 = vmatprep.subr.bf16.mxu1 %v5289_v53 }
  0xc9   : > { %4405 = vmatpush3.bf16.msra.mxu0 %v5288_v58 }
  0xca   : > { %4811 = vmatpush3.bf16.msra.mxu1 %v5289_v53 }
  0xcb   : > { %4757 = vmatmul.mubr.bf16.gmra.mrb[56].mxu0 %v602_v59  ;;  %4832 = vmatprep.subr.bf16.mxu1 %v5294_v63 }
  0xcc   : > { %4793 = vmatmul.mubr.bf16.gmra.mrb[56].mxu1 %v519_v50  ;;  %1644 = vmatprep.mubr.bf16.mxu0 %v5822_v12  ;;  %v5291_v12 = vld [vmem:[%s5757_s7 + $0x8c] ss:$0 sps:$4 sm:$0x11]  }
  0xcd   : > { %4812 = vmatprep.mubr.bf16.mxu1 %v6015_v60  ;;  %v5297_v60 = vld [vmem:[#allocation2 + $0x148] sm:$0xff]  }
  0xd3   : > { %1645 = vmatmul.mubr.bf16.vlgmr.msra.gmra.mrb[60].mxu0 %v5784_v45  ;;  %v5290_v45 = vld [vmem:[%s5757_s7 + $0x84] sm:$0xff]  }
  0xd4   : > { %4813 = vmatmul.mubr.bf16.vlgmr.msra.gmra.mrb[40].mxu1 %v6024_v38  ;;  %1652 = vmatprep.mubr.bf16.mxu0 %v5833_v16  ;;  %v1416_v16 = vrot.slane %v5291_v12, 1  ;;  %v5299_v38 = vld [vmem:[#allocation2 + $0xd0] sm:$0xff]  }
  0xd5   : > { %4816 = vmatprep.mubr.bf16.mxu1 %v6041_v34  ;;  %4833 = vmatpush3.bf16.msra.mxu1 %v5294_v63  ;;  %v5315_v63 = vld [vmem:[#allocation2 + $0x178] sm:$0xff]  }
  0xd6   : > { %4834 = vmatprep.subr.bf16.mxu1 %v5297_v60 }
  0xd9   : > { %4835 = vmatpush3.bf16.msra.mxu1 %v5297_v60 }
  0xda   : > { %4836 = vmatprep.subr.bf16.mxu1 %v5300_v17 }
  0xdb   : > { %1653 = vmatmul.mubr.bf16.gmra.mrb[64].mxu0 %v5788_v48  ;;  %v1415_v48 = vrot.slane %v5290_v45, 1 }
  0xdc   : > { %4817 = vmatmul.mubr.bf16.gmra.mrb[44].mxu1 %v6050_v9  ;;  %1660 = vmatprep.mubr.bf16.mxu0 %v5861_v30 }
  0xdd   : > { %4820 = vmatprep.mubr.bf16.mxu1 %v510_v29  ;;  %v1417_v21 = vsel %vm489_vm1, %v1415_v48, %v1416_v16  ;;  %4837 = vmatpush3.bf16.msra.mxu1 %v5300_v17  ;;  %v5310_v48 = vld [vmem:[#allocation2 + $0x130] sm:$0xff]  }
  0xe3   : > { %1661 = vmatmul.mubr.bf16.gmra.mrb[68].mxu0 %v5805_v62  ;;  %v1405_v62 = vshll.u32 %v5290_v45, 16 }
  0xe4   : > { %4821 = vmatmul.mubr.bf16.gmra.mrb[48].mxu1 %v513_v36  ;;  %1668 = vmatprep.mubr.bf16.mxu0 %v5894_v56  ;;  %v1410_v56 = vshll.u32 %v5291_v12, 16  ;;  %v5303_v36 = vld [vmem:[#allocation2 + $0x158] sm:$0xff]   ;;  %v5309_v12 = vld [vmem:[#allocation2 + $0x168] sm:$0xff]  }
  0xe5   : > { %4824 = vmatprep.mubr.bf16.mxu1 %v516_v49  ;;  %v1407_v30 = vrot.slane %v1405_v62, 1  ;;  %4838 = vmatprep.subr.bf16.mxu1 %v5303_v36 }
  0xe6   : > { %4839 = vmatpush3.bf16.msra.mxu1 %v5303_v36 }
  0xeb   : > { %1669 = vmatmul.mubr.bf16.gmra.mrb[72].mxu0 %v5825_v13  ;;  %v1403_v13 = vshrl.u32 %v5290_v45, 16 }
  0xec   : > { %4825 = vmatmul.mubr.bf16.gmra.mrb[52].mxu1 %v519_v50  ;;  %1676 = vmatprep.mubr.bf16.mxu0 %v5928_v7  ;;  %v1412_v7 = vrot.slane %v1410_v56, 1  ;;  %v5306_v50 = vld [vmem:[#allocation2 + $0x160] sm:$0xff]  }
  0xed   : > { %4828 = vmatprep.mubr.bf16.mxu1 %v602_v59  ;;  %4840 = vmatprep.subr.bf16.mxu1 %v5306_v50  ;;  %v5308_v59 = vld [vmem:[#allocation2 + $0xe8] sm:$0xff]  }
  0xee   : > { %4841 = vmatpush3.bf16.msra.mxu1 %v5306_v50 }
  0xef   : > { %4842 = vmatprep.subr.bf16.mxu1 %v5309_v12 }
  0xf2   : > { %4843 = vmatpush3.bf16.msra.mxu1 %v5309_v12 }
  0xf3   : > { %1677 = vmatmul.mubr.bf16.gmra.mrb[76].mxu0 %v5847_v23  ;;  %v1408_v23 = vor.u32 %v1407_v30, %v1403_v13 }
  0xf4   : > { %4829 = vmatmul.mubr.bf16.gmra.mrb[56].mxu1 %v1417_v21  ;;  %1684 = vmatprep.mubr.bf16.mxu0 %v5953_v22  ;;  %v5311_v21 = vld [vmem:[#allocation2 + $0xf0] sm:$0xff]  }
  0xf5   : > { %v1413_v22 = vsel %vm358_vm0, %v1408_v23, %v1412_v7  ;;  %v5312_v7 = vld [vmem:[#allocation2 + $0x170] sm:$0xff]  }
  0xf6   : > { %4844 = vmatprep.subr.bf16.mxu1 %v5312_v7 }
  0xf7   : > { %4845 = vmatpush3.bf16.msra.mxu1 %v5312_v7 }
  0xf8   : > { %4846 = vmatprep.subr.bf16.mxu1 %v5315_v63 }
  0xfb   : > { %1685 = vmatmul.mubr.bf16.gmra.mrb[80].mxu0 %v5882_v46  ;;  %v5292_v46 = vld [vmem:[#allocation2 + $0x100] sm:$0xff]   ;;  %4847 = vmatpush3.bf16.msra.mxu1 %v5315_v63 }
  0xfc   : > { %1692 = vmatprep.mubr.bf16.mxu0 %v5971_v42  ;;  %v5293_v42 = vld [vmem:[#allocation2 + $0xc0] sm:$0xff]   ;;  %4484 = vmatprep.subr.bf16.mxu0 %v5292_v46 }
  0xfd   : > { %4485 = vmatpush3.bf16.msra.mxu0 %v5293_v42  ;;  %v5313_v42 = vld [vmem:[#allocation2 + $0x138] sm:$0xff]  }
  0xfe   : > { %4486 = vmatprep.subr.bf16.mxu0 %v5295_v2 }
 0x101   : > { %4487 = vmatpush3.bf16.msra.mxu0 %v5296_v25 }
 0x102   : > { %4488 = vmatprep.subr.bf16.mxu0 %v5298_v4 }
 0x103   : > { %1693 = vmatmul.mubr.bf16.gmra.mrb[84].mxu0 %v5915_v61 }
 0x104   : > { %1700 = vmatprep.mubr.bf16.mxu0 %v5985_v33 }
 0x105   : > { %4489 = vmatpush3.bf16.msra.mxu0 %v5299_v38 }
 0x106   : > { %4490 = vmatprep.subr.bf16.mxu0 %v5301_v24 }
 0x109   : > { %4491 = vmatpush3.bf16.msra.mxu0 %v5302_v31 }
 0x10a   : > { %4492 = vmatprep.subr.bf16.mxu0 %v5304_v37 }
 0x10b   : > { %1701 = vmatmul.mubr.bf16.gmra.mrb[88].mxu0 %v5944_v18 }
 0x10c   : > { %1708 = vmatprep.mubr.bf16.mxu0 %v5998_v3 }
 0x10d   : > { %4493 = vmatpush3.bf16.msra.mxu0 %v5305_v40 }
 0x10e   : > { %4494 = vmatprep.subr.bf16.mxu0 %v5307_v54 }
 0x111   : > { %4495 = vmatpush3.bf16.msra.mxu0 %v5308_v59 }
 0x112   : > { %4496 = vmatprep.subr.bf16.mxu0 %v5310_v48 }
 0x113   : > { %1709 = vmatmul.mubr.bf16.gmra.mrb[92].mxu0 %v5959_v28 }
 0x114   : > { %1716 = vmatprep.mubr.bf16.mxu0 %v1413_v22 }
 0x115   : > { %4497 = vmatpush3.bf16.msra.mxu0 %v5311_v21  ;;  %v1904_v21 = vlaneseq }
 0x116   : > { %4498 = vmatprep.subr.bf16.mxu0 %v5313_v42  ;;  %v6193_v42 = vld [vmem:[#allocation2 + $0x80] sm:$0xff]  }
 0x117   : > { %4864 = vmatprep.subr.bf16.mxu1 %v6193_v42 }
 0x11b   : > { %1717 = vmatmul.mubr.bf16.gmra.mrb[96].mxu0 %v5290_v45 }
 0x12e   : > { %v4218_v61 = vpop.f32.mrb[0].mxu0 }
 0x12f   : > { %v4219_v32 = vpop.f32.mrb[1].mxu0  ;;  %v4312_v33 = vpop.f32.mrb[0].mxu1 }
 0x130   : > { %v6133_v51 = vadd.f32 %v4219_v32, %v4218_v61  ;;  %v4221_v57 = vpop.f32.mrb[2].mxu0  ;;  %v4313_v18 = vpop.f32.mrb[1].mxu1 }
 0x131   : > { %v4222_v0 = vpop.f32.mrb[3].mxu0  ;;  %v6135_v6 = vadd.f32 %v4313_v18, %v4312_v33  ;;  %v4315_v1 = vpop.f32.mrb[2].mxu1 }
 0x132   : > { %v6137_v28 = vadd.f32 %v4222_v0, %v4221_v57  ;;  %v4316_v3 = vpop.f32.mrb[3].mxu1  ;;  %v5314_v57 = vld [vmem:[#allocation2 + $0xf8] sm:$0xff]  }
 0x133   : > { %v6139_v43 = vadd.f32 %v4316_v3, %v4315_v1  ;;  %4499 = vmatpush3.bf16.msra.mxu0 %v5314_v57 }
 0x136   : > { %v4224_v5 = vpop.f32.mrb[4].mxu0 }
 0x137   : > { %v4225_v8 = vpop.f32.mrb[5].mxu0  ;;  %v4318_v10 = vpop.f32.mrb[4].mxu1 }
 0x138   : > { %v6141_v11 = vadd.f32 %v4225_v8, %v4224_v5  ;;  %v4227_v34 = vpop.f32.mrb[6].mxu0  ;;  %v4319_v14 = vpop.f32.mrb[5].mxu1 }
 0x139   : > { %v4228_v9 = vpop.f32.mrb[7].mxu0  ;;  %v6143_v19 = vadd.f32 %v4319_v14, %v4318_v10  ;;  %v4321_v20 = vpop.f32.mrb[6].mxu1 }
 0x13a   : > { %v6145_v26 = vadd.f32 %v4228_v9, %v4227_v34  ;;  %v4322_v29 = vpop.f32.mrb[7].mxu1 }
 0x13b   : > { %v6147_v35 = vadd.f32 %v4322_v29, %v4321_v20 }
 0x13e   : > { %v4230_v39 = vpop.f32.mrb[8].mxu0 }
 0x13f   : > { %v4231_v41 = vpop.f32.mrb[9].mxu0  ;;  %v4324_v44 = vpop.f32.mrb[8].mxu1 }
 0x140   : > { %v6149_v47 = vadd.f32 %v4231_v41, %v4230_v39  ;;  %v4233_v15 = vpop.f32.mrb[10].mxu0  ;;  %v4325_v49 = vpop.f32.mrb[9].mxu1 }
 0x141   : > { %v4234_v52 = vpop.f32.mrb[11].mxu0  ;;  %v6151_v27 = vadd.f32 %v4325_v49, %v4324_v44  ;;  %v4327_v53 = vpop.f32.mrb[10].mxu1 }
 0x142   : > { %v6153_v55 = vadd.f32 %v4234_v52, %v4233_v15  ;;  %v4328_v58 = vpop.f32.mrb[11].mxu1 }
 0x143   : > { %v6155_v45 = vadd.f32 %v4328_v58, %v4327_v53 }
 0x146   : > { %v4236_v16 = vpop.f32.mrb[12].mxu0 }
 0x147   : > { %v4237_v62 = vpop.f32.mrb[13].mxu0  ;;  %v4330_v13 = vpop.f32.mrb[12].mxu1 }
 0x148   : > { %v6157_v30 = vadd.f32 %v4237_v62, %v4236_v16  ;;  %v4239_v56 = vpop.f32.mrb[14].mxu0  ;;  %v4331_v23 = vpop.f32.mrb[13].mxu1 }
 0x149   : > { %v4240_v22 = vpop.f32.mrb[15].mxu0  ;;  %v6159_v46 = vadd.f32 %v4331_v23, %v4330_v13  ;;  %v4333_v61 = vpop.f32.mrb[14].mxu1  ;;  %v6189_v23 = vshrl.u32 %v1904_v21, 7 }
 0x14a   : > { %v6161_v32 = vadd.f32 %v4240_v22, %v4239_v56  ;;  %v4334_v33 = vpop.f32.mrb[15].mxu1 }
 0x14b   : > { %v6163_v18 = vadd.f32 %v4334_v33, %v4333_v61 }
 0x14e   : > { %v4242_v0 = vpop.f32.mrb[16].mxu0 }
 0x14f   : > { %v4243_v1 = vpop.f32.mrb[17].mxu0  ;;  %v4336_v2 = vpop.f32.mrb[16].mxu1 }
 0x150   : > { %v6165_v3 = vadd.f32 %v4243_v1, %v4242_v0  ;;  %v4245_v25 = vpop.f32.mrb[18].mxu0  ;;  %v4337_v60 = vpop.f32.mrb[17].mxu1  ;;  %v1906_v0 = vadd.s32 8, %v6189_v23 }
 0x151   : > { %v4246_v4 = vpop.f32.mrb[19].mxu0  ;;  %v6167_v5 = vadd.f32 %v4337_v60, %v4336_v2  ;;  %v4339_v38 = vpop.f32.mrb[18].mxu1  ;;  %v6204_v60 = vstv %s3846_s5 }
 0x152   : > { %v6169_v8 = vadd.f32 %v4246_v4, %v4245_v25  ;;  %v4340_v10 = vpop.f32.mrb[19].mxu1  ;;  %v1909_v4 = vadd.s32 %v6204_v60, %v1906_v0 }
 0x153   : > { %v6171_v34 = vadd.f32 %v4340_v10, %v4339_v38  ;;  %v5318_v38 = vld [vmem:[#allocation2 + $0x40] sm:$0xff]  }
 0x154   : > { %4564 = vmatprep.subr.bf16.mxu0 %v5318_v38  ;;  %vm1911_vm2 = vcmp.ge.s32.totalorder %v1909_v4, 1  ;;  %vm1913_vm3 = vcmp.le.s32.totalorder %v1909_v4, 16 }
 0x155   : > { %vm1915_vm4 = vmand %vm1911_vm2, %vm1913_vm3 }
 0x156   : > { %v4248_v14 = vpop.f32.mrb[20].mxu0 }
 0x157   : > { %v4249_v17 = vpop.f32.mrb[21].mxu0  ;;  %v4342_v9 = vpop.f32.mrb[20].mxu1 }
 0x158   : > { %v6173_v20 = vadd.f32 %v4249_v17, %v4248_v14  ;;  %v4251_v24 = vpop.f32.mrb[22].mxu0  ;;  %v4343_v29 = vpop.f32.mrb[21].mxu1 }
 0x159   : > { %v4252_v31 = vpop.f32.mrb[23].mxu0  ;;  %v6175_v36 = vadd.f32 %v4343_v29, %v4342_v9  ;;  %v4345_v37 = vpop.f32.mrb[22].mxu1 }
 0x15a   : > { %v6177_v39 = vadd.f32 %v4252_v31, %v4251_v24  ;;  %v4346_v40 = vpop.f32.mrb[23].mxu1 }
 0x15b   : > { %v6179_v41 = vadd.f32 %v4346_v40, %v4345_v37 }
 0x15e   : > { %v4254_v44 = vpop.f32.mrb[24].mxu0 }
 0x15f   : > { %v4255_v15 = vpop.f32.mrb[25].mxu0  ;;  %v4348_v49 = vpop.f32.mrb[24].mxu1 }
 0x160   : > { %v6181_v50 = vadd.f32 %v4255_v15, %v4254_v44  ;;  %v4257_v52 = vpop.f32.mrb[26].mxu0  ;;  %v4349_v53 = vpop.f32.mrb[25].mxu1 }
 0x161   : > { %v4258_v54 = vpop.f32.mrb[27].mxu0  ;;  %v6183_v58 = vadd.f32 %v4349_v53, %v4348_v49  ;;  %v4351_v59 = vpop.f32.mrb[26].mxu1  ;;  %v1924_v53 = vsub.s32 1, %v6189_v23 }
 0x162   : > { %v6185_v12 = vadd.f32 %v4258_v54, %v4257_v52  ;;  %v4352_v48 = vpop.f32.mrb[27].mxu1 }
 0x163   : > { %v6187_v16 = vadd.f32 %v4352_v48, %v4351_v59  ;;  %v5520_v48 = vmov 0  }
 0x164   : > { %v6217_v21 = vsel %vm1915_vm4, 1, %v5520_v48 }
 0x166   : > { %v4260_v62 = vpop.f32.mrb[28].mxu0 }
 0x167   : > { %v4261_v13 = vpop.f32.mrb[29].mxu0  ;;  %v4354_v56 = vpop.f32.mrb[28].mxu1 }
 0x168   : > { %v6191_v7 = vadd.f32 %v4261_v13, %v4260_v62  ;;  %v4263_v22 = vpop.f32.mrb[30].mxu0  ;;  %v4355_v61 = vpop.f32.mrb[29].mxu1 }
 0x169   : > { %v4264_v33 = vpop.f32.mrb[31].mxu0  ;;  %v6195_v57 = vadd.f32 %v4355_v61, %v4354_v56  ;;  %v4357_v63 = vpop.f32.mrb[30].mxu1 }
 0x16a   : > { %v6199_v1 = vadd.f32 %v4264_v33, %v4263_v22  ;;  %v4358_v2 = vpop.f32.mrb[31].mxu1  ;;  %v6222_v22 = vrot.slane %v6217_v21, %v1924_v53 }
 0x16b   : > { %v6202_v25 = vadd.f32 %v4358_v2, %v4357_v63 }
 0x16e   : > { %v4266_v10 = vpop.f32.mrb[32].mxu0 }
 0x16f   : > { %v4267_v14 = vpop.f32.mrb[33].mxu0  ;;  %v4360_v17 = vpop.f32.mrb[32].mxu1 }
 0x170   : > { %v6207_v9 = vadd.f32 %v4267_v14, %v4266_v10  ;;  %v4269_v24 = vpop.f32.mrb[34].mxu0  ;;  %v4361_v29 = vpop.f32.mrb[33].mxu1 }
 0x171   : > { %v4270_v31 = vpop.f32.mrb[35].mxu0  ;;  %v6209_v37 = vadd.f32 %v4361_v29, %v4360_v17  ;;  %v4363_v40 = vpop.f32.mrb[34].mxu1 }
 0x172   : > { %v6211_v44 = vadd.f32 %v4270_v31, %v4269_v24  ;;  %v4364_v15 = vpop.f32.mrb[35].mxu1 }
 0x173   : > { %v6213_v49 = vadd.f32 %v4364_v15, %v4363_v40 }
 0x176   : > { %v4272_v52 = vpop.f32.mrb[36].mxu0 }
 0x177   : > { %v4273_v54 = vpop.f32.mrb[37].mxu0  ;;  %v4366_v59 = vpop.f32.mrb[36].mxu1 }
 0x178   : > { %v4274_v62 = vadd.f32 %v4273_v54, %v4272_v52  ;;  %v4275_v13 = vpop.f32.mrb[38].mxu0  ;;  %v4367_v56 = vpop.f32.mrb[37].mxu1 }
 0x179   : > { %v4276_v61 = vpop.f32.mrb[39].mxu0  ;;  %v4368_v33 = vadd.f32 %v4367_v56, %v4366_v59  ;;  %v4369_v63 = vpop.f32.mrb[38].mxu1 }
 0x17a   : > { %v4277_v0 = vadd.f32 %v4276_v61, %v4275_v13  ;;  %v4370_v2 = vpop.f32.mrb[39].mxu1 }
 0x17b   : > { %v4371_v4 = vadd.f32 %v4370_v2, %v4369_v63 }
 0x17e   : > { %v4742_v38 = vpop.f32.mrb[40].mxu0 }
 0x17f   : > { %v953_v10 = vadd.f32 %v4742_v38, %v6141_v11  ;;  %v944_v14 = vpop.f32.mrb[41].mxu0 }
 0x180   : > { %v945_v17 = vadd.f32 %v6133_v51, %v944_v14  ;;  %v4743_v24 = vpop.f32.mrb[42].mxu0 }
 0x181   : > { %v6227_v29 = vadd.f32 %v6143_v19, %v953_v10  ;;  %v956_v31 = vadd.f32 %v4743_v24, %v6145_v26  ;;  %v947_v40 = vpop.f32.mrb[43].mxu0 }
 0x182   : > { %v6231_v15 = vadd.f32 %v6135_v6, %v945_v17  ;;  %v948_v52 = vadd.f32 %v6137_v28, %v947_v40 }
 0x183   : > { %v6235_v54 = vadd.f32 %v6147_v35, %v956_v31 }
 0x184   : > { %v6238_v11 = vadd.f32 %v6139_v43, %v948_v52 }
 0x186   : > { %v4746_v59 = vpop.f32.mrb[44].mxu0 }
 0x187   : > { %v969_v51 = vadd.f32 %v4746_v59, %v6157_v30  ;;  %v960_v13 = vpop.f32.mrb[45].mxu0 }
 0x188   : > { %v961_v19 = vadd.f32 %v6149_v47, %v960_v13  ;;  %v4747_v56 = vpop.f32.mrb[46].mxu0 }
 0x189   : > { %v6243_v26 = vadd.f32 %v6159_v46, %v969_v51  ;;  %v972_v6 = vadd.f32 %v4747_v56, %v6161_v32  ;;  %v963_v61 = vpop.f32.mrb[47].mxu0 }
 0x18a   : > { %v6247_v28 = vadd.f32 %v6151_v27, %v961_v19  ;;  %v964_v35 = vadd.f32 %v6153_v55, %v963_v61 }
 0x18b   : > { %v6251_v43 = vadd.f32 %v6163_v18, %v972_v6  ;;  %v1920_v6 = vsub.s32 0, %v6189_v23 }
 0x18c   : > { %v6254_v30 = vadd.f32 %v6155_v45, %v964_v35 }
 0x18e   : > { %v4750_v63 = vpop.f32.mrb[48].mxu0 }
 0x18f   : > { %v985_v47 = vadd.f32 %v4750_v63, %v6173_v20  ;;  %v976_v2 = vpop.f32.mrb[49].mxu0  ;;  %v6310_v63 = vld [vmem:[%s6876_s3] ss:$0 sm:$0xff] }
 0x190   : > { %v977_v46 = vadd.f32 %v6165_v3, %v976_v2  ;;  %v4751_v38 = vpop.f32.mrb[50].mxu0 }
 0x191   : > { %v6259_v32 = vadd.f32 %v6175_v36, %v985_v47  ;;  %v988_v27 = vadd.f32 %v4751_v38, %v6177_v39  ;;  %v979_v10 = vpop.f32.mrb[51].mxu0 }
 0x192   : > { %v6263_v55 = vadd.f32 %v6167_v5, %v977_v46  ;;  %v980_v18 = vadd.f32 %v6169_v8, %v979_v10 }
 0x193   : > { %v6267_v45 = vadd.f32 %v6179_v41, %v988_v27 }
 0x194   : > { %v6270_v20 = vadd.f32 %v6171_v34, %v980_v18 }
 0x196   : > { %v4754_v14 = vpop.f32.mrb[52].mxu0 }
 0x197   : > { %v1001_v3 = vadd.f32 %v4754_v14, %v6191_v7  ;;  %v992_v17 = vpop.f32.mrb[53].mxu0 }
 0x198   : > { %v993_v36 = vadd.f32 %v6181_v50, %v992_v17  ;;  %v4755_v24 = vpop.f32.mrb[54].mxu0 }
 0x199   : > { %v6275_v39 = vadd.f32 %v6195_v57, %v1001_v3  ;;  %v1004_v5 = vadd.f32 %v4755_v24, %v6199_v1  ;;  %v995_v31 = vpop.f32.mrb[55].mxu0  ;;  %v1908_v1 = vadd.s32 %v6204_v60, %v6189_v23 }
 0x19a   : > { %v6279_v8 = vadd.f32 %v6183_v58, %v993_v36  ;;  %v996_v41 = vadd.f32 %v6185_v12, %v995_v31 }
 0x19b   : > { %v6283_v34 = vadd.f32 %v6202_v25, %v1004_v5  ;;  %vm1910_vm5 = vcmp.ge.s32.totalorder %v1908_v1, 1  ;;  %vm1912_vm6 = vcmp.le.s32.totalorder %v1908_v1, 16 }
 0x19c   : > { %v6286_v7 = vadd.f32 %v6187_v16, %v996_v41  ;;  %vm1914_vm7 = vmand %vm1910_vm5, %vm1912_vm6  ;;  %vm1967_vm6 = vcmp.ne.s32.totalorder %v6222_v22, 0 }
 0x19e   : > { %v4758_v40 = vpop.f32.mrb[56].mxu0 }
 0x19f   : > { %v1017_v50 = vadd.f32 %v4758_v40, %v4274_v62  ;;  %v1008_v52 = vpop.f32.mrb[57].mxu0 }
 0x1a0   : > { %v1009_v57 = vadd.f32 %v6207_v9, %v1008_v52  ;;  %v4759_v59 = vpop.f32.mrb[58].mxu0 }
 0x1a1   : > { %v6291_v51 = vadd.f32 %v4368_v33, %v1017_v50  ;;  %v1020_v58 = vadd.f32 %v4759_v59, %v4277_v0  ;;  %v1011_v13 = vpop.f32.mrb[59].mxu0 }
 0x1a2   : > { %v6294_v12 = vadd.f32 %v6209_v37, %v1009_v57  ;;  %v1012_v25 = vadd.f32 %v6211_v44, %v1011_v13 }
 0x1a3   : > { %v6297_v16 = vadd.f32 %v4371_v4, %v1020_v58  ;;  %v6305_v4 = vsel %vm1914_vm7, 1, %v5520_v48 }
 0x1a4   : > { %v6300_v62 = vadd.f32 %v6213_v49, %v1012_v25  ;;  %v1921_v46 = vrot.slane %v6305_v4, %v1920_v6  ;;  %v1925_v58 = vrot.slane %v6305_v4, %v1924_v53 }
 0x1a6   : > { %v4406_v9 = vpop.f32.mrb[60].mxu0  ;;  %vm1958_vm8 = vcmp.ne.s32.totalorder %v1921_v46, 0  ;;  %vm1959_vm9 = vcmp.ne.s32.totalorder %v1925_v58, 0 }
 0x1a7   : > { %v4814_v19 = vpop.f32.mrb[40].mxu1  ;;  %v4407_v56 = vpop.f32.mrb[61].mxu0 }
 0x1a8   : > { %v4408_v60 = vadd.f32 %v4407_v56, %v4406_v9  ;;  %v1759_v33 = vpop.f32.mrb[41].mxu1  ;;  %v4409_v0 = vpop.f32.mrb[62].mxu0 }
 0x1a9   : > { %v4815_v37 = vpop.f32.mrb[42].mxu1  ;;  %v4410_v61 = vpop.f32.mrb[63].mxu0 }
 0x1aa   : > { %v4934_v44 = vadd.f32 %v4408_v60, %v6231_v15  ;;  %v4411_v49 = vadd.f32 %v4410_v61, %v4409_v0  ;;  %v1762_v35 = vpop.f32.mrb[43].mxu1  ;;  %v1928_v61 = vsub.s32 2, %v6189_v23 }
 0x1ac   : > { %v4935_v47 = vadd.f32 %v4934_v44, %v1759_v33  ;;  %v4942_v2 = vadd.f32 %v4411_v49, %v6238_v11 }
 0x1ae   : > { %v1864_v38 = vadd.f32 %v4935_v47, %v6310_v63  ;;  %v4943_v15 = vadd.f32 %v4942_v2, %v1762_v35  ;;  %v4412_v27 = vpop.f32.mrb[64].mxu0 }
 0x1af   : > { %v6317_v48 = vpop.f32.mrb[44].mxu1  ;;  %v4413_v10 = vpop.f32.mrb[65].mxu0 }
 0x1b0   : > { %v1884_v18 = vmax.f32 %v1864_v38, 0.0  ;;  %v1865_v14 = vadd.f32 %v4943_v15, %v6310_v63  ;;  %v4414_v3 = vadd.f32 %v4413_v10, %v4412_v27  ;;  %v1775_v17 = vpop.f32.mrb[45].mxu1  ;;  %v4415_v36 = vpop.f32.mrb[66].mxu0  ;;  %v1929_v10 = vrot.slane %v6305_v4, %v1928_v61 }
 0x1b1   : > { %v6320_v24 = vpop.f32.mrb[46].mxu1  ;;  %v4416_v11 = vpop.f32.mrb[67].mxu0 }
 0x1b2   : > { %v1885_v5 = vmax.f32 %v1865_v14, 0.0  ;;  %v4930_v31 = vadd.f32 %v4414_v3, %v6227_v29  ;;  %v4417_v41 = vadd.f32 %v4416_v11, %v4415_v36  ;;  %v1778_v40 = vpop.f32.mrb[47].mxu1  ;;  %v1988_v50 = vsel %vm1958_vm8, %v1884_v18, 0.0 }
 0x1b3   : > { %v1932_v18 = vsub.s32 3, %v6189_v23  ;;  %vm1960_vm12 = vcmp.ne.s32.totalorder %v1929_v10, 0 }
 0x1b4   : > { %v1989_v52 = vsel %vm1958_vm8, %v1885_v5, 0.0  ;;  %v4931_v57 = vadd.f32 %v4930_v31, %v4814_v19  ;;  %v4938_v59 = vadd.f32 %v4417_v41, %v6235_v54 }
 0x1b5   : > { %v6324_v1 = vpack.c.bf16 %v1989_v52, %v1988_v50 }
 0x1b6   : > { %v1866_v13 = vadd.f32 %v4931_v57, %v6310_v63  ;;  %v4939_v25 = vadd.f32 %v4938_v59, %v4815_v37  ;;  %v4418_v9 = vpop.f32.mrb[68].mxu0  ;;  %v1933_v57 = vrot.slane %v6305_v4, %v1932_v18 }
 0x1b7   : > { %v6330_v56 = vpop.f32.mrb[48].mxu1  ;;  %v4419_v29 = vpop.f32.mrb[69].mxu0 }
 0x1b8   : > { %v1886_v60 = vmax.f32 %v1866_v13, 0.0  ;;  %v1867_v33 = vadd.f32 %v4939_v25, %v6310_v63  ;;  %v4420_v0 = vadd.f32 %v4419_v29, %v4418_v9  ;;  %v6333_v19 = vpop.f32.mrb[49].mxu1  ;;  %v4421_v54 = vpop.f32.mrb[70].mxu0  ;;  %vm1961_vm14 = vcmp.ne.s32.totalorder %v1933_v57, 0 }
 0x1b9   : > { %v6336_v44 = vpop.f32.mrb[50].mxu1  ;;  %v4422_v53 = vpop.f32.mrb[71].mxu0 }
 0x1ba   : > { %v1887_v49 = vmax.f32 %v1867_v33, 0.0  ;;  %v4950_v37 = vadd.f32 %v4420_v0, %v6247_v28  ;;  %v4423_v35 = vadd.f32 %v4422_v53, %v4421_v54  ;;  %v6339_v47 = vpop.f32.mrb[51].mxu1  ;;  %v1990_v2 = vsel %vm1959_vm9, %v1886_v60, 0.0 }
 0x1bc   : > { %v1991_v46 = vsel %vm1959_vm9, %v1887_v49, 0.0  ;;  %v4951_v38 = vadd.f32 %v4950_v37, %v1775_v17  ;;  %v4958_v15 = vadd.f32 %v4423_v35, %v6254_v30  ;;  %v1936_v35 = vsub.s32 4, %v6189_v23 }
 0x1bd   : > { %v2009_v27 = vpack.c.bf16 %v1991_v46, %v1990_v2 }
 0x1be   : > { %v1868_v14 = vadd.f32 %v4951_v38, %v6310_v63  ;;  %v4959_v3 = vadd.f32 %v4958_v15, %v1778_v40  ;;  %v4424_v36 = vpop.f32.mrb[72].mxu0 }
 0x1bf   : > { %v6345_v28 = vpop.f32.mrb[52].mxu1  ;;  %v4425_v11 = vpop.f32.mrb[73].mxu0  ;;  %v2026_v5 = vshrl.u32 %v2009_v27, 16  ;;  %v2029_v52 = vshll.u32 %v2009_v27, 16 }
 0x1c0   : > { %v1888_v31 = vmax.f32 %v1868_v14, 0.0  ;;  %v1869_v17 = vadd.f32 %v4959_v3, %v6310_v63  ;;  %v4426_v41 = vadd.f32 %v4425_v11, %v4424_v36  ;;  %v6348_v30 = vpop.f32.mrb[53].mxu1  ;;  %v4427_v50 = vpop.f32.mrb[74].mxu0  ;;  %v1940_v3 = vsub.s32 5, %v6189_v23 }
 0x1c1   : > { %v6351_v59 = vpop.f32.mrb[54].mxu1  ;;  %v4428_v40 = vpop.f32.mrb[75].mxu0  ;;  %v2028_v58 = vrot.slane %v2026_v5, 7 }
 0x1c2   : > { %v1889_v13 = vmax.f32 %v1869_v17, 0.0  ;;  %v4946_v9 = vadd.f32 %v4426_v41, %v6243_v26  ;;  %v4429_v29 = vadd.f32 %v4428_v40, %v4427_v50  ;;  %v6360_v60 = vpop.f32.mrb[55].mxu1  ;;  %v1992_v54 = vsel %vm1960_vm12, %v1888_v31, 0.0 }
 0x1c3   : > { %v2031_v33 = vor.u32 %v2029_v52, %v2028_v58  ;;  %v2122_v0 = vsel %vm6355_vm13, %v2028_v58, 0 }
 0x1c4   : > { %v1993_v61 = vsel %vm1960_vm12, %v1889_v13, 0.0  ;;  %v4947_v53 = vadd.f32 %v4946_v9, %v6317_v48  ;;  %v4954_v49 = vadd.f32 %v4429_v29, %v6251_v43  ;;  %v2255_v27 = vrot.slane %v2122_v0, 1 }
 0x1c5   : > { %v2010_v37 = vpack.c.bf16 %v1993_v61, %v1992_v54  ;;  %v6369_v26 = vsel %vm6355_vm13, 0, %v2031_v33  ;;  %v2151_v14 = vshll.u32 %v2122_v0, 16  ;;  %v1937_v33 = vrot.slane %v6305_v4, %v1936_v35 }
 0x1c6   : > { %v1870_v2 = vadd.f32 %v4947_v53, %v6310_v63  ;;  %v4955_v46 = vadd.f32 %v4954_v49, %v6320_v24  ;;  %v4430_v38 = vpop.f32.mrb[76].mxu0  ;;  %v2254_v15 = vrot.slane %v6369_v26, 1  ;;  %v2146_v18 = vshll.u32 %v6369_v26, 16 }
 0x1c7   : > { %v2033_v10 = vshrl.u32 %v2010_v37, 16  ;;  %v6374_v48 = vpop.f32.mrb[56].mxu1  ;;  %v4431_v43 = vpop.f32.mrb[77].mxu0  ;;  %v2036_v50 = vshll.u32 %v2010_v37, 16  ;;  %v2144_v58 = vshrl.u32 %v6369_v26, 16  ;;  %v2153_v49 = vrot.slane %v2151_v14, 1 }
 0x1c8   : > { %v1890_v36 = vmax.f32 %v1870_v2, 0.0  ;;  %v1871_v11 = vadd.f32 %v4955_v46, %v6310_v63  ;;  %v4432_v5 = vadd.f32 %v4431_v43, %v4430_v38  ;;  %v6379_v31 = vpop.f32.mrb[57].mxu1  ;;  %v4433_v24 = vpop.f32.mrb[78].mxu0  ;;  %v6382_v17 = vsel %vm489_vm1, %v2254_v15, %v2255_v27 }
 0x1c9   : > { %v2035_v41 = vrot.slane %v2033_v10, 7  ;;  %v6384_v52 = vpop.f32.mrb[58].mxu1  ;;  %v4434_v40 = vpop.f32.mrb[79].mxu0  ;;  %4848 = vmatprep.mubr.bf16.mxu1 %v6382_v17  ;;  %v2148_v13 = vrot.slane %v2146_v18, 1  ;;  %v6406_v43 = vrot.slane %v6305_v4, %v1940_v3  ;;  %v5321_v18 = vld [vmem:[#allocation2 + $0x48] sm:$0xff]   ;;  %vm1962_vm15 = vcmp.ne.s32.totalorder %v1937_v33, 0 }
 0x1ca   : > { %v1891_v9 = vmax.f32 %v1871_v11, 0.0  ;;  %v4966_v29 = vadd.f32 %v4432_v5, %v6263_v55  ;;  %v4435_v0 = vadd.f32 %v4434_v40, %v4433_v24  ;;  %v6390_v54 = vpop.f32.mrb[59].mxu1  ;;  %v1994_v2 = vsel %vm1961_vm14, %v1890_v36, 0.0  ;;  %v5319_v55 = vld [vmem:[#allocation2] sm:$0xff]  }
 0x1cb   : > { %v2038_v61 = vor.u32 %v2036_v50, %v2035_v41  ;;  %v2149_v53 = vor.u32 %v2148_v13, %v2144_v58  ;;  %v2123_v37 = vsel %vm6355_vm13, %v2035_v41, 0  ;;  %v5317_v41 = vld [vmem:[#allocation2 + $0x88] sm:$0xff]   ;;  %vm1963_vm2 = vcmp.ne.s32.totalorder %v6406_v43, 0 }
 0x1cc   : > { %v1995_v46 = vsel %vm1961_vm14, %v1891_v9, 0.0  ;;  %v4967_v38 = vadd.f32 %v4966_v29, %v6333_v19  ;;  %v4974_v15 = vadd.f32 %v4435_v0, %v6270_v20  ;;  %v2258_v36 = vrot.slane %v2123_v37, 1  ;;  %v5322_v9 = vld [vmem:[#allocation2 + $0x8] sm:$0xff]  }
 0x1cd   : > { %v6400_v35 = vsel %vm6355_vm13, 0, %v2038_v61  ;;  %v2011_v27 = vpack.c.bf16 %v1995_v46, %v1994_v2  ;;  %v6403_v10 = vsel %vm358_vm0, %v2149_v53, %v2153_v49  ;;  %v2163_v24 = vshll.u32 %v2123_v37, 16  ;;  %v5324_v37 = vld [vmem:[#allocation2 + $0x50] sm:$0xff]   ;;  %v5333_v43 = vld [vmem:[#allocation2 + $0x68] sm:$0xff]  }
 0x1ce   : > { %v1872_v57 = vadd.f32 %v4967_v38, %v6310_v63  ;;  %v4975_v14 = vadd.f32 %v4974_v15, %v6339_v47  ;;  %2575 = vmatprep.mubr.bf16.mxu0 %v6403_v10  ;;  %v4436_v20 = vpop.f32.mrb[80].mxu0  ;;  %v2257_v19 = vrot.slane %v6400_v35, 1  ;;  %v2158_v5 = vshll.u32 %v6400_v35, 16 }
 0x1cf   : > { %2576 = vmatmul.mubr.bf16.vlgmr.msra.gmra.mrb[100].mxu0 %v6369_v26  ;;  %v4437_v11 = vpop.f32.mrb[81].mxu0  ;;  %v2040_v3 = vshrl.u32 %v2011_v27, 16  ;;  %v2043_v29 = vshll.u32 %v2011_v27, 16  ;;  %v2156_v61 = vshrl.u32 %v6400_v35, 16 }
 0x1d0   : > { %v1892_v50 = vmax.f32 %v1872_v57, 0.0  ;;  %v1873_v40 = vadd.f32 %v4975_v14, %v6310_v63  ;;  %v4438_v58 = vadd.f32 %v4437_v11, %v4436_v20  ;;  %v4439_v47 = vpop.f32.mrb[82].mxu0  ;;  %v6416_v13 = vsel %vm489_vm1, %v2257_v19, %v2258_v36  ;;  %4565 = vmatpush3.bf16.msra.mxu0 %v5319_v55  ;;  %v5320_v14 = vld [vmem:[#allocation2 + $0x90] sm:$0xff]  }
 0x1d1   : > { %v4440_v0 = vpop.f32.mrb[83].mxu0  ;;  %4849 = vmatmul.mubr.bf16.vlgmr.msra.gmra.mrb[60].mxu1 %v6416_v13  ;;  %v2160_v53 = vrot.slane %v2158_v5, 1  ;;  %v2042_v49 = vrot.slane %v2040_v3, 7  ;;  %4566 = vmatprep.subr.bf16.mxu0 %v5321_v18  ;;  %v2165_v55 = vrot.slane %v2163_v24, 1  ;;  %v5325_v36 = vld [vmem:[#allocation2 + $0x10] sm:$0xff]   ;;  %v1944_v5 = vsub.s32 6, %v6189_v23 }
 0x1d2   : > { %v1893_v2 = vmax.f32 %v1873_v40, 0.0  ;;  %v4962_v46 = vadd.f32 %v4438_v58, %v6259_v32  ;;  %v4441_v38 = vadd.f32 %v4440_v0, %v4439_v47  ;;  %4865 = vmatpush3.bf16.msra.mxu1 %v6193_v42  ;;  %v1996_v20 = vsel %vm1962_vm15, %v1892_v50, 0.0  ;;  %v5327_v3 = vld [vmem:[#allocation2 + $0x58] sm:$0xff]  }
 0x1d3   : > { %v2161_v15 = vor.u32 %v2160_v53, %v2156_v61  ;;  %v2045_v27 = vor.u32 %v2043_v29, %v2042_v49  ;;  %v2124_v57 = vsel %vm6355_vm13, %v2042_v49, 0  ;;  %4866 = vmatprep.subr.bf16.mxu1 %v5317_v41  ;;  %v1948_v29 = vsub.s32 7, %v6189_v23  ;;  %v5323_v61 = vld [vmem:[#allocation2 + $0x98] sm:$0xff]  }
 0x1d4   : > { %v1997_v18 = vsel %vm1962_vm15, %v1893_v2, 0.0  ;;  %v4963_v19 = vadd.f32 %v4962_v46, %v6330_v56  ;;  %v4970_v32 = vadd.f32 %v4441_v38, %v6267_v45  ;;  %4567 = vmatpush3.bf16.msra.mxu0 %v5322_v9  ;;  %v2261_v40 = vrot.slane %v2124_v57, 1 }
 0x1d5   : > { %v2012_v11 = vpack.c.bf16 %v1997_v18, %v1996_v20  ;;  %v6430_v42 = vsel %vm358_vm0, %v2161_v15, %v2165_v55  ;;  %v6435_v24 = vsel %vm6355_vm13, 0, %v2045_v27  ;;  %4568 = vmatprep.subr.bf16.mxu0 %v5324_v37  ;;  %v2175_v9 = vshll.u32 %v2124_v57, 16  ;;  %v5330_v57 = vld [vmem:[#allocation2 + $0x60] sm:$0xff]  }
 0x1d6   : > { %v1874_v33 = vadd.f32 %v4963_v19, %v6310_v63  ;;  %v4971_v56 = vadd.f32 %v4970_v32, %v6336_v44  ;;  %2583 = vmatprep.mubr.bf16.mxu0 %v6430_v42  ;;  %v4442_v45 = vpop.f32.mrb[84].mxu0  ;;  %v2260_v50 = vrot.slane %v6435_v24, 1  ;;  %4867 = vmatpush3.bf16.msra.mxu1 %v5317_v41  ;;  %v2170_v47 = vshll.u32 %v6435_v24, 16  ;;  %v5328_v41 = vld [vmem:[#allocation2 + $0x18] sm:$0xff]  }
 0x1d7   : > { %2584 = vmatmul.mubr.bf16.gmra.mrb[104].mxu0 %v6400_v35  ;;  %v4443_v58 = vpop.f32.mrb[85].mxu0  ;;  %v2047_v0 = vshrl.u32 %v2012_v11, 16  ;;  %4868 = vmatprep.subr.bf16.mxu1 %v5320_v14  ;;  %v2050_v46 = vshll.u32 %v2012_v11, 16  ;;  %v2168_v15 = vshrl.u32 %v6435_v24, 16  ;;  %v6452_v19 = vrot.slane %v6305_v4, %v1944_v5 }
 0x1d8   : > { %v1894_v53 = vmax.f32 %v1874_v33, 0.0  ;;  %v1875_v44 = vadd.f32 %v4971_v56, %v6310_v63  ;;  %v4444_v49 = vadd.f32 %v4443_v58, %v4442_v45  ;;  %v4445_v37 = vpop.f32.mrb[86].mxu0  ;;  %v6446_v2 = vsel %vm489_vm1, %v2260_v50, %v2261_v40  ;;  %4569 = vmatpush3.bf16.msra.mxu0 %v5325_v36  ;;  %v5326_v45 = vld [vmem:[#allocation2 + $0xa0] sm:$0xff]  }
 0x1d9   : > { %v4446_v38 = vpop.f32.mrb[87].mxu0  ;;  %4852 = vmatprep.mubr.bf16.mxu1 %v6446_v2  ;;  %v2172_v55 = vrot.slane %v2170_v47, 1  ;;  %v2049_v27 = vrot.slane %v2047_v0, 7  ;;  %4570 = vmatprep.subr.bf16.mxu0 %v5327_v3  ;;  %v2177_v33 = vrot.slane %v2175_v9, 1  ;;  %v6466_v47 = vrot.slane %v6305_v4, %v1948_v29 }
 0x1da   : > { %v1895_v20 = vmax.f32 %v1875_v44, 0.0  ;;  %v4982_v18 = vadd.f32 %v4444_v49, %v6279_v8  ;;  %v4447_v32 = vadd.f32 %v4446_v38, %v4445_v37  ;;  %4869 = vmatpush3.bf16.msra.mxu1 %v5320_v14  ;;  %v1998_v3 = vsel %vm1963_vm2, %v1894_v53, 0.0  ;;  %v5331_v14 = vld [vmem:[#allocation2 + $0x20] sm:$0xff]  }
 0x1db   : > { %v2173_v36 = vor.u32 %v2172_v55, %v2168_v15  ;;  %v2052_v11 = vor.u32 %v2050_v46, %v2049_v27  ;;  %v2125_v56 = vsel %vm6355_vm13, %v2049_v27, 0  ;;  %4870 = vmatprep.subr.bf16.mxu1 %v5323_v61  ;;  %vm1964_vm3 = vcmp.ne.s32.totalorder %v6452_v19, 0  ;;  %v5339_v19 = vld [vmem:[#allocation2 + $0x78] sm:$0xff]  }
 0x1dc   : > { %v1999_v50 = vsel %vm1963_vm2, %v1895_v20, 0.0  ;;  %v4983_v8 = vadd.f32 %v4982_v18, %v6348_v30  ;;  %v4990_v5 = vadd.f32 %v4447_v32, %v6286_v7  ;;  %4571 = vmatpush3.bf16.msra.mxu0 %v5328_v41  ;;  %v2264_v44 = vrot.slane %v2125_v56, 1  ;;  %v5329_v41 = vld [vmem:[#allocation2 + $0xa8] sm:$0xff]  }
 0x1dd   : > { %v2013_v40 = vpack.c.bf16 %v1999_v50, %v1998_v3  ;;  %v6463_v58 = vsel %vm358_vm0, %v2173_v36, %v2177_v33  ;;  %v6470_v9 = vsel %vm6355_vm13, 0, %v2052_v11  ;;  %4572 = vmatprep.subr.bf16.mxu0 %v5330_v57  ;;  %v2187_v49 = vshll.u32 %v2125_v56, 16  ;;  %v5336_v36 = vld [vmem:[#allocation2 + $0x70] sm:$0xff]  }
 0x1de   : > { %v1876_v0 = vadd.f32 %v4983_v8, %v6310_v63  ;;  %v4991_v30 = vadd.f32 %v4990_v5, %v6360_v60  ;;  %2591 = vmatprep.mubr.bf16.mxu0 %v6463_v58  ;;  %v4448_v7 = vpop.f32.mrb[88].mxu0  ;;  %v2263_v53 = vrot.slane %v6470_v9, 1  ;;  %4871 = vmatpush3.bf16.msra.mxu1 %v5323_v61  ;;  %v2182_v29 = vshll.u32 %v6470_v9, 16  ;;  %v5334_v61 = vld [vmem:[#allocation2 + $0x28] sm:$0xff]  }
 0x1df   : > { %2592 = vmatmul.mubr.bf16.gmra.mrb[108].mxu0 %v6435_v24  ;;  %v4449_v4 = vpop.f32.mrb[89].mxu0  ;;  %v2054_v37 = vshrl.u32 %v2013_v40, 16  ;;  %4872 = vmatprep.subr.bf16.mxu1 %v5326_v45  ;;  %v2057_v27 = vshll.u32 %v2013_v40, 16  ;;  %v2180_v20 = vshrl.u32 %v6470_v9, 16  ;;  %vm1965_vm4 = vcmp.ne.s32.totalorder %v6466_v47, 0 }
 0x1e0   : > { %v1896_v46 = vmax.f32 %v1876_v0, 0.0  ;;  %v1877_v60 = vadd.f32 %v4991_v30, %v6310_v63  ;;  %v4450_v38 = vadd.f32 %v4449_v4, %v4448_v7  ;;  %v4451_v15 = vpop.f32.mrb[90].mxu0  ;;  %v6481_v55 = vsel %vm489_vm1, %v2263_v53, %v2264_v44  ;;  %4573 = vmatpush3.bf16.msra.mxu0 %v5331_v14  ;;  %v5332_v14 = vld [vmem:[#allocation2 + $0xb0] sm:$0xff]  }
 0x1e1   : > { %v4452_v57 = vpop.f32.mrb[91].mxu0  ;;  %4853 = vmatmul.mubr.bf16.gmra.mrb[64].mxu1 %v6481_v55  ;;  %v2184_v18 = vrot.slane %v2182_v29, 1  ;;  %v2056_v32 = vrot.slane %v2054_v37, 7  ;;  %4574 = vmatprep.subr.bf16.mxu0 %v5333_v43  ;;  %v2189_v50 = vrot.slane %v2187_v49, 1  ;;  %v6501_v53 = vrot.slane %v6217_v21, %v1920_v6 }
 0x1e2   : > { %v1897_v33 = vmax.f32 %v1877_v60, 0.0  ;;  %v4978_v11 = vadd.f32 %v4450_v38, %v6275_v39  ;;  %v4453_v56 = vadd.f32 %v4452_v57, %v4451_v15  ;;  %4873 = vmatpush3.bf16.msra.mxu1 %v5326_v45  ;;  %v2000_v40 = vsel %vm1964_vm3, %v1896_v46, 0.0  ;;  %v5337_v45 = vld [vmem:[#allocation2 + $0x30] sm:$0xff]   ;;  %v5335_v60 = vld [vmem:[#allocation2 + $0xb8] sm:$0xff]  }
 0x1e3   : > { %v2185_v3 = vor.u32 %v2184_v18, %v2180_v20  ;;  %v2059_v8 = vor.u32 %v2057_v27, %v2056_v32  ;;  %v2126_v5 = vsel %vm6355_vm13, %v2056_v32, 0  ;;  %4874 = vmatprep.subr.bf16.mxu1 %v5329_v41  ;;  %v2019_v23 = vshrl.u32 %v6324_v1, 16 }
 0x1e4   : > { %v2001_v43 = vsel %vm1964_vm3, %v1897_v33, 0.0  ;;  %v4979_v39 = vadd.f32 %v4978_v11, %v6345_v28  ;;  %v4986_v0 = vadd.f32 %v4453_v56, %v6283_v34  ;;  %4575 = vmatpush3.bf16.msra.mxu0 %v5334_v61  ;;  %v2267_v49 = vrot.slane %v2126_v5, 1 }
 0x1e5   : > { %v2014_v30 = vpack.c.bf16 %v2001_v43, %v2000_v40  ;;  %v6496_v7 = vsel %vm358_vm0, %v2185_v3, %v2189_v50  ;;  %v6505_v44 = vsel %vm6355_vm13, 0, %v2059_v8  ;;  %4576 = vmatprep.subr.bf16.mxu0 %v5336_v36  ;;  %v2199_v37 = vshll.u32 %v2126_v5, 16  ;;  %v5338_v40 = vld [vmem:[#allocation2 + $0x1c0] sm:$0xff]  }
 0x1e6   : > { %v1878_v28 = vadd.f32 %v4979_v39, %v6310_v63  ;;  %v4987_v34 = vadd.f32 %v4986_v0, %v6351_v59  ;;  %2599 = vmatprep.mubr.bf16.mxu0 %v6496_v7  ;;  %v4454_v4 = vpop.f32.mrb[92].mxu0  ;;  %v2266_v29 = vrot.slane %v6505_v44, 1  ;;  %4875 = vmatpush3.bf16.msra.mxu1 %v5329_v41  ;;  %v2194_v6 = vshll.u32 %v6505_v44, 16  ;;  %v5341_v41 = vld [vmem:[#allocation2 + $0x38] sm:$0xff]  }
 0x1e7   : > { %2600 = vmatmul.mubr.bf16.gmra.mrb[112].mxu0 %v6470_v9  ;;  %v4455_v21 = vpop.f32.mrb[93].mxu0  ;;  %v2061_v46 = vshrl.u32 %v2014_v30, 16  ;;  %4876 = vmatprep.subr.bf16.mxu1 %v5332_v14  ;;  %v2064_v57 = vshll.u32 %v2014_v30, 16  ;;  %v2192_v18 = vshrl.u32 %v6505_v44, 16  ;;  %vm1966_vm5 = vcmp.ne.s32.totalorder %v6501_v53, 0 }
 0x1e8   : > { %v1898_v38 = vmax.f32 %v1878_v28, 0.0  ;;  %v1879_v59 = vadd.f32 %v4987_v34, %v6310_v63  ;;  %v4456_v15 = vadd.f32 %v4455_v21, %v4454_v4  ;;  %v4457_v61 = vpop.f32.mrb[94].mxu0  ;;  %v6516_v27 = vsel %vm489_vm1, %v2266_v29, %v2267_v49  ;;  %4577 = vmatpush3.bf16.msra.mxu0 %v5337_v45 }
 0x1e9   : > { %v4458_v20 = vpop.f32.mrb[95].mxu0  ;;  %4856 = vmatprep.mubr.bf16.mxu1 %v6516_v27  ;;  %v2196_v32 = vrot.slane %v2194_v6, 1  ;;  %v2063_v36 = vrot.slane %v2061_v46, 7  ;;  %4578 = vmatprep.subr.bf16.mxu0 %v5339_v19  ;;  %v2201_v50 = vrot.slane %v2199_v37, 1  ;;  %v2022_v4 = vshll.u32 %v6324_v1, 16 }
 0x1ea   : > { %v1899_v33 = vmax.f32 %v1879_v59, 0.0  ;;  %v4998_v11 = vadd.f32 %v4456_v15, %v6294_v12  ;;  %v4459_v56 = vadd.f32 %v4458_v20, %v4457_v61  ;;  %4877 = vmatpush3.bf16.msra.mxu1 %v5332_v14  ;;  %v2002_v43 = vsel %vm1965_vm4, %v1898_v38, 0.0 }
 0x1eb   : > { %v2197_v3 = vor.u32 %v2196_v32, %v2192_v18  ;;  %v2066_v8 = vor.u32 %v2064_v57, %v2063_v36  ;;  %v2127_v5 = vsel %vm6355_vm13, %v2063_v36, 0  ;;  %4878 = vmatprep.subr.bf16.mxu1 %v5335_v60  ;;  %v6530_v14 = vrot.slane %v2019_v23, 7 }
 0x1ec   : > { %v2003_v39 = vsel %vm1965_vm4, %v1899_v33, 0.0  ;;  %v4999_v12 = vadd.f32 %v4998_v11, %v6379_v31  ;;  %v5006_v0 = vadd.f32 %v4459_v56, %v6300_v62  ;;  %4579 = vmatpush3.bf16.msra.mxu0 %v5341_v41  ;;  %v2270_v34 = vrot.slane %v2127_v5, 1 }
 0x1ed   : > { %v2015_v45 = vpack.c.bf16 %v2003_v39, %v2002_v43  ;;  %v6533_v30 = vsel %vm358_vm0, %v2197_v3, %v2201_v50  ;;  %v6537_v19 = vsel %vm6355_vm13, 0, %v2066_v8  ;;  %v2211_v23 = vshll.u32 %v2127_v5, 16 }
 0x1ee   : > { %v1880_v28 = vadd.f32 %v4999_v12, %v6310_v63  ;;  %v5007_v47 = vadd.f32 %v5006_v0, %v6390_v54  ;;  %2607 = vmatprep.mubr.bf16.mxu0 %v6533_v30  ;;  %v4460_v31 = vpop.f32.mrb[96].mxu0  ;;  %v2269_v62 = vrot.slane %v6537_v19, 1  ;;  %4879 = vmatpush3.bf16.msra.mxu1 %v5335_v60  ;;  %v2206_v49 = vshll.u32 %v6537_v19, 16 }
 0x1ef   : > { %2608 = vmatmul.mubr.bf16.gmra.mrb[116].mxu0 %v6505_v44  ;;  %v4461_v29 = vpop.f32.mrb[97].mxu0  ;;  %v2068_v21 = vshrl.u32 %v2015_v45, 16  ;;  %4644 = vmatprep.subr.bf16.mxu1 %v5338_v40  ;;  %v2071_v59 = vshll.u32 %v2015_v45, 16  ;;  %v2204_v1 = vshrl.u32 %v6537_v19, 16  ;;  %v2024_v41 = vor.u32 %v2022_v4, %v6530_v14 }
 0x1f0   : > { %v1900_v6 = vmax.f32 %v1880_v28, 0.0  ;;  %v1881_v54 = vadd.f32 %v5007_v47, %v6310_v63  ;;  %v4462_v37 = vadd.f32 %v4461_v29, %v4460_v31  ;;  %v4463_v46 = vpop.f32.mrb[98].mxu0  ;;  %v6548_v38 = vsel %vm489_vm1, %v2269_v62, %v2270_v34 }
 0x1f1   : > { %v4464_v60 = vpop.f32.mrb[99].mxu0  ;;  %4857 = vmatmul.mubr.bf16.gmra.mrb[68].mxu1 %v6548_v38  ;;  %v2208_v15 = vrot.slane %v2206_v49, 1  ;;  %v2070_v61 = vrot.slane %v2068_v21, 7  ;;  %v2213_v36 = vrot.slane %v2211_v23, 1  ;;  %v2111_v45 = vsel %vm6355_vm13, 0, %v2024_v41 }
 0x1f2   : > { %v1901_v57 = vmax.f32 %v1881_v54, 0.0  ;;  %v4994_v20 = vadd.f32 %v4462_v37, %v6291_v51  ;;  %v4465_v18 = vadd.f32 %v4464_v60, %v4463_v46  ;;  %v2004_v56 = vsel %vm1966_vm5, %v1900_v6, 0.0 }
 0x1f3   : > { %v2209_v32 = vor.u32 %v2208_v15, %v2204_v1  ;;  %v2073_v33 = vor.u32 %v2071_v59, %v2070_v61  ;;  %v2128_v11 = vsel %vm6355_vm13, %v2070_v61, 0  ;;  %v2134_v23 = vshll.u32 %v2111_v45, 16 }
 0x1f4   : > { %v2005_v3 = vsel %vm1966_vm5, %v1901_v57, 0.0  ;;  %v4995_v50 = vadd.f32 %v4994_v20, %v6374_v48  ;;  %v5002_v8 = vadd.f32 %v4465_v18, %v6297_v16  ;;  %v2273_v53 = vrot.slane %v2128_v11, 1 }
 0x1f5   : > { %v2016_v5 = vpack.c.bf16 %v2005_v3, %v2004_v56  ;;  %v6564_v51 = vsel %vm358_vm0, %v2209_v32, %v2213_v36  ;;  %v6568_v40 = vsel %vm6355_vm13, 0, %v2073_v33  ;;  %v2223_v12 = vshll.u32 %v2128_v11, 16 }
 0x1f6   : > { %v1882_v43 = vadd.f32 %v4995_v50, %v6310_v63  ;;  %v5003_v39 = vadd.f32 %v5002_v8, %v6384_v52  ;;  %2615 = vmatprep.mubr.bf16.mxu0 %v6564_v51  ;;  %v2272_v48 = vrot.slane %v6568_v40, 1  ;;  %v2218_v16 = vshll.u32 %v6568_v40, 16 }
 0x1f7   : > { %2616 = vmatmul.mubr.bf16.gmra.mrb[120].mxu0 %v6537_v19  ;;  %v2075_v0 = vshrl.u32 %v2016_v5, 16  ;;  %v2078_v52 = vshll.u32 %v2016_v5, 16  ;;  %v2216_v62 = vshrl.u32 %v6568_v40, 16  ;;  %v2225_v6 = vrot.slane %v2223_v12, 1  ;;  %v5344_v12 = vld [vmem:[#allocation2 + $0x1d0] sm:$0xff]  }
 0x1f8   : > { %v1902_v28 = vmax.f32 %v1882_v43, 0.0  ;;  %v1883_v47 = vadd.f32 %v5003_v39, %v6310_v63  ;;  %v6580_v31 = vsel %vm489_vm1, %v2272_v48, %v2273_v53  ;;  %v2220_v34 = vrot.slane %v2218_v16, 1  ;;  %v5340_v39 = vld [vmem:[#allocation2 + $0x180] sm:$0xff]   ;;  %v5342_v53 = vld [vmem:[#allocation2 + $0x1c8] sm:$0xff]  }
 0x1f9   : > { %4860 = vmatprep.mubr.bf16.mxu1 %v6580_v31  ;;  %v2077_v4 = vrot.slane %v2075_v0, 7  ;;  %v2121_v46 = vsel %vm6355_vm13, %v6530_v14, 0  ;;  %v2251_v15 = vrot.slane %v2111_v45, 1  ;;  %v2136_v20 = vrot.slane %v2134_v23, 1  ;;  %v5343_v16 = vld [vmem:[#allocation2 + $0x188] sm:$0xff]   ;;  %v5345_v0 = vld [vmem:[#allocation2 + $0x190] sm:$0xff]  }
 0x1fa   : > { %v2006_v29 = vsel %vm1967_vm6, %v1902_v28, 0.0  ;;  %v1903_v49 = vmax.f32 %v1883_v47, 0.0  ;;  %v2221_v21 = vor.u32 %v2220_v34, %v2216_v62  ;;  %v2252_v14 = vrot.slane %v2121_v46, 1  ;;  %v5346_v28 = vld [vmem:[#allocation2 + $0x1d8] sm:$0xff]   ;;  %v5350_v62 = vld [vmem:[#allocation2 + $0x1e8] sm:$0xff]   ;;  %v5353_v34 = vld [vmem:[#allocation2 + $0x1b0] sm:$0xff]  }
 0x1fb   : > { %v2080_v54 = vor.u32 %v2078_v52, %v2077_v4  ;;  %v2129_v63 = vsel %vm6355_vm13, %v2077_v4, 0  ;;  %v2132_v11 = vshrl.u32 %v2111_v45, 16  ;;  %v2139_v56 = vshll.u32 %v2121_v46, 16  ;;  %v5347_v47 = vld [vmem:[#allocation2 + $0x198] sm:$0xff]   ;;  %v5349_v52 = vld [vmem:[#allocation2 + $0x1a0] sm:$0xff]   ;;  %v5358_v23 = vld [vmem:[#allocation2 + $0x210] sm:$0xff]  }
 0x1fc   : > { %v2007_v37 = vsel %vm1967_vm6, %v1903_v49, 0.0  ;;  %v6596_v60 = vsel %vm358_vm0, %v2221_v21, %v2225_v6  ;;  %v2347_v22 = vrot.slane %v2129_v63, 1  ;;  %v2339_v57 = vshll.u32 %v2129_v63, 16  ;;  %v5354_v4 = vld [vmem:[#allocation2 + $0x1f8] sm:$0xff]   ;;  %v5357_v49 = vld [vmem:[#allocation2 + $0x208] sm:$0xff]   ;;  %v5360_v21 = vld [vmem:[#allocation2 + $0x220] sm:$0xff]  }
 0x1fd   : > { %v6593_v59 = vpack.c.bf16 %v2007_v37, %v2006_v29  ;;  %v6600_v1 = vsel %vm6355_vm13, 0, %v2080_v54  ;;  %2623 = vmatprep.mubr.bf16.mxu0 %v6596_v60  ;;  %v2253_v33 = vsel %vm489_vm1, %v2251_v15, %v2252_v14  ;;  %v2137_v8 = vor.u32 %v2136_v20, %v2132_v11  ;;  %v5356_v29 = vld [vmem:[#allocation2 + $0x200] sm:$0xff]  }
 0x1fe   : > { %v2346_v61 = vrot.slane %v6600_v1, 1  ;;  %v2334_v41 = vshll.u32 %v6600_v1, 16  ;;  %v2332_v32 = vshrl.u32 %v6600_v1, 16  ;;  %v2341_v50 = vrot.slane %v2339_v57, 1 }
 0x1ff   : > { %2624 = vmatmul.mubr.bf16.gmra.mrb[124].mxu0 %v6568_v40  ;;  %v2141_v43 = vrot.slane %v2139_v56, 1 }
 0x200   : > { %v6607_v18 = vsel %vm489_vm1, %v2346_v61, %v2347_v22  ;;  %v2336_v36 = vrot.slane %v2334_v41, 1 }
 0x201   : > { %4861 = vmatmul.mubr.bf16.gmra.mrb[72].mxu1 %v6607_v18  ;;  %v2142_v48 = vsel %vm358_vm0, %v2137_v8, %v2141_v43 }
 0x202   : > { %4880 = vmatprep.mubr.bf16.mxu1 %v2253_v33  ;;  %v2337_v3 = vor.u32 %v2336_v36, %v2332_v32 }
 0x204   : > { %v6613_v5 = vsel %vm358_vm0, %v2337_v3, %v2341_v50 }
 0x205   : > { %2631 = vmatprep.mubr.bf16.mxu0 %v6613_v5 }
 0x207   : > { %2632 = vmatmul.mubr.bf16.gmra.mrb[128].mxu0 %v6600_v1 }
 0x208   : > { %2913 = vmatprep.mubr.bf16.mxu0 %v2142_v48 }
 0x209   : > { %4881 = vmatmul.mubr.bf16.vlgmr.msra.gmra.mrb[60].mxu1 %v6382_v17  ;;  %v5348_v17 = vld [vmem:[#allocation2 + $0x1e0] sm:$0xff]  }
 0x20a   : > { %4884 = vmatprep.mubr.bf16.mxu1 %v6416_v13  ;;  %4645 = vmatpush3.bf16.msra.mxu1 %v5340_v39 }
 0x20b   : > { %4646 = vmatprep.subr.bf16.mxu1 %v5342_v53 }
 0x20e   : > { %4647 = vmatpush3.bf16.msra.mxu1 %v5343_v16 }
 0x20f   : > { %2914 = vmatmul.mubr.bf16.vlgmr.msra.gmra.mrb[132].mxu0 %v2111_v45  ;;  %4648 = vmatprep.subr.bf16.mxu1 %v5344_v12  ;;  %v5352_v45 = vld [vmem:[#allocation2 + $0x1f0] sm:$0xff]  }
 0x210   : > { %2921 = vmatprep.mubr.bf16.mxu0 %v6403_v10  ;;  %v5351_v10 = vld [vmem:[#allocation2 + $0x1a8] sm:$0xff]  }
 0x211   : > { %4885 = vmatmul.mubr.bf16.gmra.mrb[64].mxu1 %v6446_v2 }
 0x212   : > { %4888 = vmatprep.mubr.bf16.mxu1 %v6481_v55  ;;  %4649 = vmatpush3.bf16.msra.mxu1 %v5345_v0 }
 0x213   : > { %4650 = vmatprep.subr.bf16.mxu1 %v5346_v28 }
 0x216   : > { %4651 = vmatpush3.bf16.msra.mxu1 %v5347_v47 }
 0x217   : > { %2922 = vmatmul.mubr.bf16.gmra.mrb[136].mxu0 %v6369_v26  ;;  %4652 = vmatprep.subr.bf16.mxu1 %v5348_v17  ;;  %v5355_v26 = vld [vmem:[#allocation2 + $0x1b8] sm:$0xff]  }
 0x218   : > { %2929 = vmatprep.mubr.bf16.mxu0 %v6430_v42 }
 0x219   : > { %4889 = vmatmul.mubr.bf16.gmra.mrb[68].mxu1 %v6516_v27 }
 0x21a   : > { %4892 = vmatprep.mubr.bf16.mxu1 %v6548_v38  ;;  %4653 = vmatpush3.bf16.msra.mxu1 %v5349_v52 }
 0x21b   : > { %4654 = vmatprep.subr.bf16.mxu1 %v5350_v62 }
 0x21e   : > { %4655 = vmatpush3.bf16.msra.mxu1 %v5351_v10 }
 0x21f   : > { %2930 = vmatmul.mubr.bf16.gmra.mrb[140].mxu0 %v6400_v35  ;;  %4656 = vmatprep.subr.bf16.mxu1 %v5352_v45 }
 0x220   : > { %2937 = vmatprep.mubr.bf16.mxu0 %v6463_v58 }
 0x221   : > { %4893 = vmatmul.mubr.bf16.gmra.mrb[72].mxu1 %v6580_v31 }
 0x222   : > { %4657 = vmatpush3.bf16.msra.mxu1 %v5353_v34  ;;  %3319 = vmatprep.mubr.bf16.mxu1 %v6430_v42  ;;  %v5359_v42 = vld [vmem:[#allocation2 + $0x218] sm:$0xff]  }
 0x223   : > { %4658 = vmatprep.subr.bf16.mxu1 %v5354_v4 }
 0x226   : > { %4659 = vmatpush3.bf16.msra.mxu1 %v5355_v26 }
 0x227   : > { %2938 = vmatmul.mubr.bf16.gmra.mrb[144].mxu0 %v6435_v24  ;;  %4896 = vmatprep.subr.bf16.mxu1 %v5356_v29 }
 0x228   : > { %2945 = vmatprep.mubr.bf16.mxu0 %v6496_v7 }
 0x229   : > { %3320 = vmatmul.mubr.bf16.vlgmr.msra.gmra.mrb[76].mxu1 %v6400_v35  ;;  %v5361_v35 = vld [vmem:[#allocation2 + $0x228] sm:$0xff]  }
 0x22a   : > { %3327 = vmatprep.mubr.bf16.mxu1 %v6463_v58  ;;  %4897 = vmatpush3.bf16.msra.mxu1 %v5356_v29  ;;  %v5362_v58 = vld [vmem:[#allocation2 + $0x230] sm:$0xff]  }
 0x22b   : > { %4898 = vmatprep.subr.bf16.mxu1 %v5357_v49 }
 0x22e   : > { %4899 = vmatpush3.bf16.msra.mxu1 %v5357_v49 }
 0x22f   : > { %2946 = vmatmul.mubr.bf16.gmra.mrb[148].mxu0 %v6470_v9  ;;  %4900 = vmatprep.subr.bf16.mxu1 %v5358_v23 }
 0x230   : > { %2953 = vmatprep.mubr.bf16.mxu0 %v6533_v30 }
 0x231   : > { %3328 = vmatmul.mubr.bf16.gmra.mrb[80].mxu1 %v6435_v24  ;;  %v2082_v24 = vshrl.u32 %v6593_v59, 16 }
 0x232   : > { %3335 = vmatprep.mubr.bf16.mxu1 %v6496_v7  ;;  %4901 = vmatpush3.bf16.msra.mxu1 %v5358_v23  ;;  %v5363_v7 = vld [vmem:[#allocation2 + $0x238] sm:$0xff]  }
 0x233   : > { %4902 = vmatprep.subr.bf16.mxu1 %v5359_v42  ;;  %v2084_v6 = vrot.slane %v2082_v24, 7 }
 0x236   : > { %4903 = vmatpush3.bf16.msra.mxu1 %v5359_v42 }
 0x237   : > { %2954 = vmatmul.mubr.bf16.gmra.mrb[152].mxu0 %v6505_v44  ;;  %4904 = vmatprep.subr.bf16.mxu1 %v5360_v21 }
 0x238   : > { %2961 = vmatprep.mubr.bf16.mxu0 %v6564_v51 }
 0x239   : > { %3336 = vmatmul.mubr.bf16.gmra.mrb[84].mxu1 %v6470_v9  ;;  %v2085_v9 = vshll.u32 %v6593_v59, 16 }
 0x23a   : > { %3343 = vmatprep.mubr.bf16.mxu1 %v6533_v30  ;;  %4905 = vmatpush3.bf16.msra.mxu1 %v5360_v21 }
 0x23b   : > { %4906 = vmatprep.subr.bf16.mxu1 %v5361_v35  ;;  %v2087_v30 = vor.u32 %v2085_v9, %v2084_v6 }
 0x23d   : > { %v2120_v54 = vsel %vm6355_vm13, 0, %v2087_v30 }
 0x23e   : > { %4907 = vmatpush3.bf16.msra.mxu1 %v5361_v35  ;;  %v3078_v63 = vshll.u32 %v2120_v54, 16  ;;  %v3076_v37 = vshrl.u32 %v2120_v54, 16  ;;  %v3090_v25 = vrot.slane %v2120_v54, 1 }
 0x23f   : > { %2962 = vmatmul.mubr.bf16.gmra.mrb[156].mxu0 %v6537_v19  ;;  %4908 = vmatprep.subr.bf16.mxu1 %v5362_v58 }
 0x240   : > { %2969 = vmatprep.mubr.bf16.mxu0 %v6596_v60 }
 0x241   : > { %3344 = vmatmul.mubr.bf16.gmra.mrb[88].mxu1 %v6505_v44  ;;  %v2130_v44 = vsel %vm6355_vm13, %v2084_v6, 0 }
 0x242   : > { %3351 = vmatprep.mubr.bf16.mxu1 %v6564_v51  ;;  %4909 = vmatpush3.bf16.msra.mxu1 %v5362_v58  ;;  %v3080_v51 = vrot.slane %v3078_v63, 1  ;;  %v3083_v46 = vshll.u32 %v2130_v44, 16 }
 0x243   : > { %4910 = vmatprep.subr.bf16.mxu1 %v5363_v7 }
 0x244   : > { %v3081_v59 = vor.u32 %v3080_v51, %v3076_v37  ;;  %v3085_v15 = vrot.slane %v3083_v46, 1 }
 0x246   : > { %4911 = vmatpush3.bf16.msra.mxu1 %v5363_v7 }
 0x247   : > { %2970 = vmatmul.mubr.bf16.gmra.mrb[160].mxu0 %v6568_v40 }
 0x249   : > { %3352 = vmatmul.mubr.bf16.gmra.mrb[92].mxu1 %v6537_v19  ;;  %v3086_v19 = vsel %vm358_vm0, %v3081_v59, %v3085_v15 }
 0x24a   : > { %3359 = vmatprep.mubr.bf16.mxu1 %v6596_v60 }
 0x251   : > { %3360 = vmatmul.mubr.bf16.gmra.mrb[96].mxu1 %v6568_v40  ;;  %v3091_v40 = vrot.slane %v2130_v44, 1 }
 0x252   : > { %3367 = vmatprep.mubr.bf16.mxu1 %v6613_v5 }
 0x253   : > { %v3092_v60 = vsel %vm489_vm1, %v3090_v25, %v3091_v40 }
 0x259   : > { %3368 = vmatmul.mubr.bf16.gmra.mrb[100].mxu1 %v6600_v1 }
 0x25a   : > { %3375 = vmatprep.mubr.bf16.mxu1 %v3086_v19 }
 0x261   : > { %3376 = vmatmul.mubr.bf16.gmra.mrb[104].mxu1 %v2120_v54 }
 0x262   : > { %4912 = vmatprep.mubr.bf16.mxu1 %v6416_v13 }
 0x269   : > { %4913 = vmatmul.mubr.bf16.vlgmr.msra.gmra.mrb[60].mxu1 %v6446_v2 }
 0x26a   : > { %4916 = vmatprep.mubr.bf16.mxu1 %v6481_v55 }
 0x271   : > { %4917 = vmatmul.mubr.bf16.gmra.mrb[64].mxu1 %v6516_v27 }
 0x272   : > { %4920 = vmatprep.mubr.bf16.mxu1 %v6548_v38 }
 0x279   : > { %4921 = vmatmul.mubr.bf16.gmra.mrb[68].mxu1 %v6580_v31 }
 0x27a   : > { %4924 = vmatprep.mubr.bf16.mxu1 %v6607_v18 }
 0x281   : > { %4925 = vmatmul.mubr.bf16.gmra.mrb[72].mxu1 %v3092_v60 }
 0x2a2   : > { %v4500_v1 = vpop.f32.mrb[100].mxu0 }
 0x2a3   : > { %v4501_v61 = vpop.f32.mrb[101].mxu0 }
 0x2a4   : > { %v4502_v13 = vadd.f32 %v4501_v61, %v4500_v1  ;;  %v4503_v22 = vpop.f32.mrb[102].mxu0 }
 0x2a5   : > { %v4504_v2 = vpop.f32.mrb[103].mxu0 }
 0x2a6   : > { %v4505_v41 = vadd.f32 %v4504_v2, %v4503_v22 }
 0x2aa   : > { %v4506_v55 = vpop.f32.mrb[104].mxu0 }
 0x2ab   : > { %v4507_v57 = vpop.f32.mrb[105].mxu0 }
 0x2ac   : > { %v4508_v27 = vadd.f32 %v4507_v57, %v4506_v55  ;;  %v4509_v14 = vpop.f32.mrb[106].mxu0 }
 0x2ad   : > { %v4510_v38 = vpop.f32.mrb[107].mxu0 }
 0x2ae   : > { %v4511_v20 = vadd.f32 %v4510_v38, %v4509_v14 }
 0x2b2   : > { %v4512_v31 = vpop.f32.mrb[108].mxu0 }
 0x2b3   : > { %v4513_v32 = vpop.f32.mrb[109].mxu0 }
 0x2b4   : > { %v4514_v18 = vadd.f32 %v4513_v32, %v4512_v31  ;;  %v4515_v36 = vpop.f32.mrb[110].mxu0 }
 0x2b5   : > { %v4516_v33 = vpop.f32.mrb[111].mxu0 }
 0x2b6   : > { %v4517_v11 = vadd.f32 %v4516_v33, %v4515_v36 }
 0x2ba   : > { %v4518_v56 = vpop.f32.mrb[112].mxu0 }
 0x2bb   : > { %v4519_v3 = vpop.f32.mrb[113].mxu0 }
 0x2bc   : > { %v4520_v50 = vadd.f32 %v4519_v3, %v4518_v56  ;;  %v4521_v8 = vpop.f32.mrb[114].mxu0 }
 0x2bd   : > { %v4522_v5 = vpop.f32.mrb[115].mxu0 }
 0x2be   : > { %v4523_v43 = vadd.f32 %v4522_v5, %v4521_v8 }
 0x2c2   : > { %v4524_v39 = vpop.f32.mrb[116].mxu0 }
 0x2c3   : > { %v4525_v48 = vpop.f32.mrb[117].mxu0 }
 0x2c4   : > { %v6668_v53 = vadd.f32 %v4525_v48, %v4524_v39  ;;  %v4527_v16 = vpop.f32.mrb[118].mxu0 }
 0x2c5   : > { %v4528_v12 = vpop.f32.mrb[119].mxu0 }
 0x2c6   : > { %v6670_v0 = vadd.f32 %v4528_v12, %v4527_v16 }
 0x2ca   : > { %v4530_v28 = vpop.f32.mrb[120].mxu0 }
 0x2cb   : > { %v4531_v47 = vpop.f32.mrb[121].mxu0 }
 0x2cc   : > { %v6672_v17 = vadd.f32 %v4531_v47, %v4530_v28  ;;  %v4533_v52 = vpop.f32.mrb[122].mxu0 }
 0x2cd   : > { %v4534_v62 = vpop.f32.mrb[123].mxu0 }
 0x2ce   : > { %v6674_v10 = vadd.f32 %v4534_v62, %v4533_v52 }
 0x2d2   : > { %v4536_v45 = vpop.f32.mrb[124].mxu0 }
 0x2d3   : > { %v4537_v34 = vpop.f32.mrb[125].mxu0 }
 0x2d4   : > { %v6676_v4 = vadd.f32 %v4537_v34, %v4536_v45  ;;  %v4539_v26 = vpop.f32.mrb[126].mxu0 }
 0x2d5   : > { %v4540_v29 = vpop.f32.mrb[127].mxu0 }
 0x2d6   : > { %v6678_v49 = vadd.f32 %v4540_v29, %v4539_v26 }
 0x2da   : > { %v4542_v23 = vpop.f32.mrb[128].mxu0 }
 0x2db   : > { %v4543_v42 = vpop.f32.mrb[129].mxu0 }
 0x2dc   : > { %v6680_v21 = vadd.f32 %v4543_v42, %v4542_v23  ;;  %v4545_v35 = vpop.f32.mrb[130].mxu0 }
 0x2dd   : > { %v4546_v58 = vpop.f32.mrb[131].mxu0 }
 0x2de   : > { %v6682_v24 = vadd.f32 %v4546_v58, %v4545_v35 }
 0x2e2   : > { %v4580_v7 = vpop.f32.mrb[132].mxu0 }
 0x2e3   : > { %v4581_v6 = vpop.f32.mrb[133].mxu0 }
 0x2e4   : > { %v4582_v9 = vadd.f32 %v4581_v6, %v4580_v7  ;;  %v4583_v30 = vpop.f32.mrb[134].mxu0 }
 0x2e5   : > { %v4584_v54 = vpop.f32.mrb[135].mxu0 }
 0x2e6   : > { %v5011_v63 = vadd.f32 %v4582_v9, %v4502_v13  ;;  %v4585_v44 = vadd.f32 %v4584_v54, %v4583_v30 }
 0x2e8   : > { %v5017_v51 = vadd.f32 %v4585_v44, %v4505_v41 }
 0x2ea   : > { %v4586_v37 = vpop.f32.mrb[136].mxu0 }
 0x2eb   : > { %v4587_v46 = vpop.f32.mrb[137].mxu0 }
 0x2ec   : > { %v4588_v59 = vadd.f32 %v4587_v46, %v4586_v37  ;;  %v4589_v15 = vpop.f32.mrb[138].mxu0 }
 0x2ed   : > { %v4590_v19 = vpop.f32.mrb[139].mxu0 }
 0x2ee   : > { %v5008_v25 = vadd.f32 %v4588_v59, %v4508_v27  ;;  %v4591_v40 = vadd.f32 %v4590_v19, %v4589_v15 }
 0x2f0   : > { %v5014_v60 = vadd.f32 %v4591_v40, %v4511_v20 }
 0x2f2   : > { %v4592_v1 = vpop.f32.mrb[140].mxu0 }
 0x2f3   : > { %v4593_v61 = vpop.f32.mrb[141].mxu0 }
 0x2f4   : > { %v4594_v22 = vadd.f32 %v4593_v61, %v4592_v1  ;;  %v4595_v2 = vpop.f32.mrb[142].mxu0 }
 0x2f5   : > { %v4596_v55 = vpop.f32.mrb[143].mxu0 }
 0x2f6   : > { %v5023_v57 = vadd.f32 %v4594_v22, %v4514_v18  ;;  %v4597_v14 = vadd.f32 %v4596_v55, %v4595_v2 }
 0x2f8   : > { %v5029_v38 = vadd.f32 %v4597_v14, %v4517_v11 }
 0x2fa   : > { %v4598_v31 = vpop.f32.mrb[144].mxu0 }
 0x2fb   : > { %v4599_v13 = vpop.f32.mrb[145].mxu0 }
 0x2fc   : > { %v4600_v32 = vadd.f32 %v4599_v13, %v4598_v31  ;;  %v4601_v41 = vpop.f32.mrb[146].mxu0  ;;  %v4660_v36 = vpop.f32.mrb[76].mxu1 }
 0x2fd   : > { %v4602_v33 = vpop.f32.mrb[147].mxu0  ;;  %v4661_v56 = vpop.f32.mrb[77].mxu1 }
 0x2fe   : > { %v5020_v3 = vadd.f32 %v4600_v32, %v4520_v50  ;;  %v4603_v8 = vadd.f32 %v4602_v33, %v4601_v41  ;;  %v4662_v27 = vadd.f32 %v4661_v56, %v4660_v36  ;;  %v4663_v5 = vpop.f32.mrb[78].mxu1 }
 0x2ff   : > { %v4664_v20 = vpop.f32.mrb[79].mxu1 }
 0x300   : > { %v5026_v39 = vadd.f32 %v4603_v8, %v4523_v43  ;;  %v4665_v48 = vadd.f32 %v4664_v20, %v4663_v5  ;;  %v6684_v16 = vadd.f32 %v5011_v63, %v4662_v27 }
 0x302   : > { %v4604_v12 = vpop.f32.mrb[148].mxu0  ;;  %v6686_v18 = vadd.f32 %v5017_v51, %v4665_v48 }
 0x303   : > { %v4605_v11 = vpop.f32.mrb[149].mxu0 }
 0x304   : > { %v4606_v28 = vadd.f32 %v4605_v11, %v4604_v12  ;;  %v4607_v47 = vpop.f32.mrb[150].mxu0  ;;  %v4666_v52 = vpop.f32.mrb[80].mxu1 }
 0x305   : > { %v4608_v62 = vpop.f32.mrb[151].mxu0  ;;  %v4667_v45 = vpop.f32.mrb[81].mxu1 }
 0x306   : > { %v5035_v34 = vadd.f32 %v4606_v28, %v6668_v53  ;;  %v4609_v50 = vadd.f32 %v4608_v62, %v4607_v47  ;;  %v4668_v26 = vadd.f32 %v4667_v45, %v4666_v52  ;;  %v4669_v29 = vpop.f32.mrb[82].mxu1 }
 0x307   : > { %v4670_v23 = vpop.f32.mrb[83].mxu1 }
 0x308   : > { %v5041_v43 = vadd.f32 %v4609_v50, %v6670_v0  ;;  %v4671_v42 = vadd.f32 %v4670_v23, %v4669_v29  ;;  %v6690_v35 = vadd.f32 %v5008_v25, %v4668_v26 }
 0x30a   : > { %v4610_v58 = vpop.f32.mrb[152].mxu0  ;;  %v6692_v7 = vadd.f32 %v5014_v60, %v4671_v42 }
 0x30b   : > { %v4611_v6 = vpop.f32.mrb[153].mxu0 }
 0x30c   : > { %v4612_v9 = vadd.f32 %v4611_v6, %v4610_v58  ;;  %v4613_v30 = vpop.f32.mrb[154].mxu0  ;;  %v4672_v54 = vpop.f32.mrb[84].mxu1 }
 0x30d   : > { %v4614_v63 = vpop.f32.mrb[155].mxu0  ;;  %v4673_v44 = vpop.f32.mrb[85].mxu1 }
 0x30e   : > { %v5032_v53 = vadd.f32 %v4612_v9, %v6672_v17  ;;  %v4615_v51 = vadd.f32 %v4614_v63, %v4613_v30  ;;  %v4674_v37 = vadd.f32 %v4673_v44, %v4672_v54  ;;  %v4675_v46 = vpop.f32.mrb[86].mxu1  ;;  %v5372_v54 = vld [vmem:[%s5757_s7 + $0x24] sm:$0xff]  }
 0x30f   : > { %v4676_v59 = vpop.f32.mrb[87].mxu1  ;;  %v3500_v63 = vunpack.c.l.bf16 %v5372_v54  ;;  %v3501_v44 = vunpack.c.h.bf16 %v5372_v54 }
 0x310   : > { %v5038_v0 = vadd.f32 %v4615_v51, %v6674_v10  ;;  %v4677_v15 = vadd.f32 %v4676_v59, %v4675_v46  ;;  %v6696_v19 = vadd.f32 %v5023_v57, %v4674_v37  ;;  %v5373_v37 = vld [vmem:[%s5757_s7 + $0x18] sm:$0xff]  }
 0x311   : > { %v3498_v46 = vunpack.c.h.bf16 %v5373_v37 }
 0x312   : > { %v4616_v25 = vpop.f32.mrb[156].mxu0  ;;  %v6698_v40 = vadd.f32 %v5029_v38, %v4677_v15 }
 0x313   : > { %v4617_v60 = vpop.f32.mrb[157].mxu0 }
 0x314   : > { %v4618_v1 = vadd.f32 %v4617_v60, %v4616_v25  ;;  %v4619_v61 = vpop.f32.mrb[158].mxu0  ;;  %v4678_v22 = vpop.f32.mrb[88].mxu1 }
 0x315   : > { %v4620_v2 = vpop.f32.mrb[159].mxu0  ;;  %v4679_v55 = vpop.f32.mrb[89].mxu1 }
 0x316   : > { %v5047_v17 = vadd.f32 %v4618_v1, %v6676_v4  ;;  %v4621_v14 = vadd.f32 %v4620_v2, %v4619_v61  ;;  %v4680_v31 = vadd.f32 %v4679_v55, %v4678_v22  ;;  %v4681_v13 = vpop.f32.mrb[90].mxu1  ;;  %v3567_v61 = vrot.slane %v3500_v63, 1  ;;  %v5381_v63 = vld [vmem:[%s5757_s7 + $0x54] sm:$0xff]  }
 0x317   : > { %v4682_v32 = vpop.f32.mrb[91].mxu1  ;;  %v3568_v22 = vrot.slane %v3501_v44, 1  ;;  %v3512_v44 = vunpack.c.l.bf16 %v5381_v63 }
 0x318   : > { %v5053_v10 = vadd.f32 %v4621_v14, %v6678_v49  ;;  %v4683_v41 = vadd.f32 %v4682_v32, %v4681_v13  ;;  %v6702_v57 = vadd.f32 %v5020_v3, %v4680_v31  ;;  %v5375_v13 = vld [vmem:[%s5757_s7 + $0x20] sm:$0x1] }
 0x319   : > { %v3499_v32 = vunpack.c.l.bf16 %v5375_v13  ;;  %v5383_v13 = vld [vmem:[%s5757_s7 + $0x5c] sm:$0x1] }
 0x31a   : > { %v4622_v36 = vpop.f32.mrb[160].mxu0  ;;  %v6704_v38 = vadd.f32 %v5026_v39, %v4683_v41 }
 0x31b   : > { %v4623_v33 = vpop.f32.mrb[161].mxu0 }
 0x31c   : > { %v4624_v56 = vadd.f32 %v4623_v33, %v4622_v36  ;;  %v4625_v8 = vpop.f32.mrb[162].mxu0  ;;  %v4684_v27 = vpop.f32.mrb[92].mxu1  ;;  %v5377_v33 = vld [vmem:[%s5757_s7 + $0x30] sm:$0xff]  }
 0x31d   : > { %v4626_v5 = vpop.f32.mrb[163].mxu0  ;;  %v4685_v20 = vpop.f32.mrb[93].mxu1 }
 0x31e   : > { %v5044_v4 = vadd.f32 %v4624_v56, %v6680_v21  ;;  %v4627_v48 = vadd.f32 %v4626_v5, %v4625_v8  ;;  %v4686_v12 = vadd.f32 %v4685_v20, %v4684_v27  ;;  %v4687_v11 = vpop.f32.mrb[94].mxu1  ;;  %v3503_v56 = vunpack.c.l.bf16 %v5377_v33  ;;  %v5378_v5 = vld [vmem:[%s5757_s7 + $0x44] sm:$0x1] }
 0x31f   : > { %v4688_v28 = vpop.f32.mrb[95].mxu1  ;;  %v3504_v8 = vunpack.c.h.bf16 %v5377_v33  ;;  %v3508_v20 = vunpack.c.l.bf16 %v5378_v5 }
 0x320   : > { %v5050_v49 = vadd.f32 %v4627_v48, %v6682_v24  ;;  %v4689_v47 = vadd.f32 %v4688_v28, %v4687_v11  ;;  %v6708_v3 = vadd.f32 %v5035_v34, %v4686_v12  ;;  %v3569_v12 = vsel %vm489_vm1, %v3567_v61, %v3568_v22 }
 0x322   : > { %v6710_v52 = vadd.f32 %v5041_v43, %v4689_v47 }
 0x324   : > { %v4690_v39 = vpop.f32.mrb[96].mxu1 }
 0x325   : > { %v4691_v62 = vpop.f32.mrb[97].mxu1 }
 0x326   : > { %v4692_v45 = vadd.f32 %v4691_v62, %v4690_v39  ;;  %v4693_v50 = vpop.f32.mrb[98].mxu1  ;;  %v3565_v39 = vrot.slane %v3499_v32, 1  ;;  %v3514_v32 = vunpack.c.l.bf16 %v5383_v13 }
 0x327   : > { %v4694_v26 = vpop.f32.mrb[99].mxu1 }
 0x328   : > { %v4695_v29 = vadd.f32 %v4694_v26, %v4693_v50  ;;  %v6712_v21 = vadd.f32 %v5032_v53, %v4692_v45  ;;  %v3497_v53 = vunpack.c.l.bf16 %v5373_v37  ;;  %v3572_v26 = vrot.slane %v3503_v56, 1 }
 0x32a   : > { %v6714_v23 = vadd.f32 %v5038_v0, %v4695_v29  ;;  %v5374_v0 = vld [vmem:[%s5757_s7 + $0x2c] sm:$0x1]  ;;  %v3562_v55 = vrot.slane %v3497_v53, 1  ;;  %v3573_v29 = vrot.slane %v3504_v8, 1 }
 0x32b   : > { %v3502_v15 = vunpack.c.l.bf16 %v5374_v0 }
 0x32c   : > { %v4696_v42 = vpop.f32.mrb[100].mxu1 }
 0x32d   : > { %v4697_v24 = vpop.f32.mrb[101].mxu1  ;;  %v3570_v31 = vrot.slane %v3502_v15, 1 }
 0x32e   : > { %v4698_v58 = vadd.f32 %v4697_v24, %v4696_v42  ;;  %v4699_v34 = vpop.f32.mrb[102].mxu1  ;;  %v6739_v42 = vld [vmem:[%s6876_s3] ss:$0 sm:$0xff] }
 0x32f   : > { %v4700_v6 = vpop.f32.mrb[103].mxu1  ;;  %v3571_v47 = vsel %vm489_vm1, %v3568_v22, %v3570_v31 }
 0x330   : > { %v4701_v43 = vadd.f32 %v4700_v6, %v4699_v34  ;;  %v6716_v9 = vadd.f32 %v5047_v17, %v4698_v58  ;;  %v3563_v17 = vrot.slane %v3498_v46, 1  ;;  %v3580_v34 = vrot.slane %v3508_v20, 1  ;;  %v5380_v6 = vld [vmem:[%s5757_s7 + $0x38] sm:$0x1] }
 0x332   : > { %v6718_v30 = vadd.f32 %v5053_v10, %v4701_v43  ;;  %v5376_v10 = vld [vmem:[%s5757_s7 + $0x3c] sm:$0xff]   ;;  %v3564_v11 = vsel %vm489_vm1, %v3562_v55, %v3563_v17  ;;  %v3505_v43 = vunpack.c.l.bf16 %v5380_v6  ;;  %v3566_v46 = vsel %vm489_vm1, %v3563_v17, %v3565_v39  ;;  %v5384_v39 = vld [vmem:[%s5757_s7 + $0x50] sm:$0x1] }
 0x333   : > { %v3506_v41 = vunpack.c.l.bf16 %v5376_v10  ;;  %v3507_v36 = vunpack.c.h.bf16 %v5376_v10  ;;  %v3587_v17 = vrot.slane %v3512_v44, 1 }
 0x334   : > { %v4702_v51 = vpop.f32.mrb[104].mxu1  ;;  %v3575_v22 = vrot.slane %v3505_v43, 1 }
 0x335   : > { %v4703_v59 = vpop.f32.mrb[105].mxu1  ;;  %v3577_v62 = vrot.slane %v3506_v41, 1  ;;  %v3578_v50 = vrot.slane %v3507_v36, 1 }
 0x336   : > { %v4704_v25 = vadd.f32 %v4703_v59, %v4702_v51  ;;  %v4705_v60 = vpop.f32.mrb[106].mxu1  ;;  %v3513_v51 = vunpack.c.h.bf16 %v5381_v63  ;;  %v5385_v63 = vld [vmem:[%s5757_s7 + $0x6c] sm:$0xff]  }
 0x337   : > { %v4706_v1 = vpop.f32.mrb[107].mxu1  ;;  %v3581_v61 = vsel %vm489_vm1, %v3578_v50, %v3580_v34  ;;  %v3518_v44 = vunpack.c.l.bf16 %v5385_v63 }
 0x338   : > { %v4707_v2 = vadd.f32 %v4706_v1, %v4705_v60  ;;  %v6723_v14 = vadd.f32 %v5044_v4, %v4704_v25  ;;  %v3579_v25 = vsel %vm489_vm1, %v3577_v62, %v3578_v50  ;;  %v3574_v1 = vsel %vm489_vm1, %v3572_v26, %v3573_v29 }
 0x339   : > { %v3588_v31 = vrot.slane %v3513_v51, 1  ;;  %v3511_v62 = vunpack.c.l.bf16 %v5384_v39  ;;  %v3590_v50 = vrot.slane %v3514_v32, 1 }
 0x33a   : > { %v6728_v27 = vadd.f32 %v5050_v49, %v4707_v2 }
 0x33b   : > { %v3589_v34 = vsel %vm489_vm1, %v3587_v17, %v3588_v31 }
 0x33c   : > { %v4914_v48 = vpop.f32.mrb[60].mxu1 }
 0x33d   : > { %v5010_v4 = vadd.f32 %v6690_v35, %v4914_v48  ;;  %v3418_v28 = vpop.f32.mrb[61].mxu1 }
 0x33e   : > { %v5013_v49 = vadd.f32 %v6684_v16, %v3418_v28  ;;  %v4915_v45 = vpop.f32.mrb[62].mxu1 }
 0x33f   : > { %v3523_v35 = vadd.f32 %v6739_v42, %v5010_v4  ;;  %v5016_v24 = vadd.f32 %v6692_v7, %v4915_v45  ;;  %v3421_v58 = vpop.f32.mrb[63].mxu1  ;;  %v5382_v7 = vld [vmem:[%s5757_s7 + $0x48] sm:$0xff]  }
 0x340   : > { %v3521_v16 = vadd.f32 %v6739_v42, %v5013_v49  ;;  %v5019_v54 = vadd.f32 %v6686_v18, %v3421_v58  ;;  %v3509_v59 = vunpack.c.l.bf16 %v5382_v7  ;;  %v3510_v60 = vunpack.c.h.bf16 %v5382_v7 }
 0x341   : > { %v3620_v37 = vadd.f32 %v3569_v12, %v3523_v35  ;;  %v3524_v53 = vadd.f32 %v6739_v42, %v5016_v24 }
 0x342   : > { %v3618_v0 = vadd.f32 %v3564_v11, %v3521_v16  ;;  %v3522_v15 = vadd.f32 %v6739_v42, %v5019_v54  ;;  %v3582_v56 = vrot.slane %v3509_v59, 1  ;;  %v3583_v12 = vrot.slane %v3510_v60, 1 }
 0x343   : > { %v3621_v18 = vadd.f32 %v3571_v47, %v3524_v53  ;;  %v3636_v10 = vmax.f32 %v3620_v37, 0.0  ;;  %v3591_v16 = vsel %vm489_vm1, %v3588_v31, %v3590_v50  ;;  %v3585_v54 = vrot.slane %v3511_v62, 1  ;;  %v5387_v31 = vld [vmem:[%s5757_s7 + $0x74] sm:$0x1] }
 0x344   : > { %v3619_v2 = vadd.f32 %v3566_v46, %v3522_v15  ;;  %v4918_v55 = vpop.f32.mrb[64].mxu1  ;;  %v3634_v8 = vmax.f32 %v3618_v0, 0.0  ;;  %v3519_v46 = vunpack.c.h.bf16 %v5385_v63  ;;  %v3520_v13 = vunpack.c.l.bf16 %v5387_v31 }
 0x345   : > { %v3637_v41 = vmax.f32 %v3621_v18, 0.0  ;;  %v5022_v36 = vadd.f32 %v6702_v57, %v4918_v55  ;;  %v3434_v33 = vpop.f32.mrb[65].mxu1 }
 0x346   : > { %v3635_v5 = vmax.f32 %v3619_v2, 0.0  ;;  %v5025_v20 = vadd.f32 %v6696_v19, %v3434_v33  ;;  %v4919_v48 = vpop.f32.mrb[66].mxu1 }
 0x347   : > { %v4163_v11 = vpack.c.bf16 %v3637_v41, %v3636_v10  ;;  %v3527_v4 = vadd.f32 %v6739_v42, %v5022_v36  ;;  %v5028_v28 = vadd.f32 %v6704_v38, %v4919_v48  ;;  %v3437_v47 = vpop.f32.mrb[67].mxu1  ;;  %v3576_v38 = vsel %vm489_vm1, %v3573_v29, %v3575_v22  ;;  %v5388_v41 = vld [vmem:[%s5757_s7 + $0x68] sm:$0x1] }
 0x348   : > { %v4158_v49 = vpack.c.bf16 %v3635_v5, %v3634_v8  ;;  %v3525_v57 = vadd.f32 %v6739_v42, %v5025_v20  ;;  %v5031_v45 = vadd.f32 %v6698_v40, %v3437_v47  ;;  %v3584_v40 = vsel %vm489_vm1, %v3582_v56, %v3583_v12 }
 0x349   : > { %4195 = vst [vmem:[%s6768_s10 + $0x8] sm:$0xff] %v4163_v11   ;;  %v3624_v19 = vadd.f32 %v3579_v25, %v3527_v4  ;;  %v3528_v26 = vadd.f32 %v6739_v42, %v5028_v28  ;;  %v5386_v25 = vld [vmem:[%s5757_s7 + $0x60] sm:$0xff]   ;;  %v3586_v10 = vsel %vm489_vm1, %v3583_v12, %v3585_v54  ;;  %v3517_v36 = vunpack.c.l.bf16 %v5388_v41  ;;  %s4154_s7 = sshll.u32 %s5499_s18, 4 }
 0x34a   : > { %4159 = vst [vmem:[%s6768_s10] sm:$0xff] %v4158_v49   ;;  %v3622_v35 = vadd.f32 %v3574_v1, %v3525_v57  ;;  %v3526_v24 = vadd.f32 %v6739_v42, %v5031_v45  ;;  %v3515_v60 = vunpack.c.l.bf16 %v5386_v25  ;;  %v3597_v56 = vrot.slane %v3518_v44, 1  ;;  %s3744_s18 = sadd.s32 %s4154_s7, %s4133_s14 }
 0x34b   : > { %v3625_v58 = vadd.f32 %v3581_v61, %v3528_v26  ;;  %v3640_v51 = vmax.f32 %v3624_v19, 0.0  ;;  %v3598_v8 = vrot.slane %v3519_v46, 1  ;;  %v3600_v4 = vrot.slane %v3520_v13, 1  ;;  %s4134_s19 = sshll.u32 %s3744_s18, 6 }
 0x34c   : > { %v3623_v6 = vadd.f32 %v3576_v38, %v3526_v24  ;;  %v4922_v43 = vpop.f32.mrb[68].mxu1  ;;  %v3638_v7 = vmax.f32 %v3622_v35, 0.0  ;;  %v3592_v20 = vrot.slane %v3515_v60, 1  ;;  %v3595_v62 = vrot.slane %v3517_v36, 1  ;;  %s6813_s5 = scalar_lea.hbm %s6877_s4, %s4134_s19 }
 0x34d   : > { %v3641_v37 = vmax.f32 %v3625_v58, 0.0  ;;  %v5034_v29 = vadd.f32 %v6712_v21, %v4922_v43  ;;  %v3450_v53 = vpop.f32.mrb[69].mxu1  ;;  %v3516_v21 = vunpack.c.h.bf16 %v5386_v25  ;;  %v3599_v45 = vsel %vm489_vm1, %v3597_v56, %v3598_v8 }
 0x34e   : > { %v3639_v59 = vmax.f32 %v3623_v6, 0.0  ;;  %v5037_v0 = vadd.f32 %v6708_v3, %v3450_v53  ;;  %v4923_v15 = vpop.f32.mrb[70].mxu1 }
 0x34f   : > { %v4173_v18 = vpack.c.bf16 %v3641_v37, %v3640_v51  ;;  %v3531_v1 = vadd.f32 %v6739_v42, %v5034_v29  ;;  %v5040_v61 = vadd.f32 %v6714_v23, %v4923_v15  ;;  %v3453_v22 = vpop.f32.mrb[71].mxu1 }
 0x350   : > { %v4168_v2 = vpack.c.bf16 %v3639_v59, %v3638_v7  ;;  %v3529_v55 = vadd.f32 %v6739_v42, %v5037_v0  ;;  %v5043_v17 = vadd.f32 %v6710_v52, %v3453_v22  ;;  %v3593_v52 = vrot.slane %v3516_v21, 1 }
 0x351   : > { %4197 = vst [vmem:[%s6768_s10 + $0x18] sm:$0xff] %v4173_v18   ;;  %v3628_v3 = vadd.f32 %v3589_v34, %v3531_v1  ;;  %v3532_v32 = vadd.f32 %v6739_v42, %v5040_v61 }
 0x352   : > { %4196 = vst [vmem:[%s6768_s10 + $0x10] sm:$0xff] %v4168_v2   ;;  %v3626_v33 = vadd.f32 %v3584_v40, %v3529_v55  ;;  %v3530_v23 = vadd.f32 %v6739_v42, %v5043_v17  ;;  %v3594_v35 = vsel %vm489_vm1, %v3592_v20, %v3593_v52  ;;  %v3601_v40 = vsel %vm489_vm1, %v3598_v8, %v3600_v4 }
 0x353   : > { %v3629_v5 = vadd.f32 %v3591_v16, %v3532_v32  ;;  %v3644_v28 = vmax.f32 %v3628_v3, 0.0  ;;  %v3596_v16 = vsel %vm489_vm1, %v3593_v52, %v3595_v62 }
 0x354   : > { %v3627_v48 = vadd.f32 %v3586_v10, %v3530_v23  ;;  %v4926_v11 = vpop.f32.mrb[72].mxu1  ;;  %v3642_v49 = vmax.f32 %v3626_v33, 0.0 }
 0x355   : > { %v3645_v47 = vmax.f32 %v3629_v5, 0.0  ;;  %v5046_v12 = vadd.f32 %v6723_v14, %v4926_v11  ;;  %v3466_v39 = vpop.f32.mrb[73].mxu1 }
 0x356   : > { %v3643_v57 = vmax.f32 %v3627_v48, 0.0  ;;  %v5049_v50 = vadd.f32 %v6716_v9, %v3466_v39  ;;  %v4927_v19 = vpop.f32.mrb[74].mxu1 }
 0x357   : > { %v4183_v26 = vpack.c.bf16 %v3645_v47, %v3644_v28  ;;  %v3535_v38 = vadd.f32 %v6739_v42, %v5046_v12  ;;  %v5052_v14 = vadd.f32 %v6728_v27, %v4927_v19  ;;  %v3469_v24 = vpop.f32.mrb[75].mxu1 }
 0x358   : > { %v4178_v58 = vpack.c.bf16 %v3643_v57, %v3642_v49  ;;  %v3533_v34 = vadd.f32 %v6739_v42, %v5049_v50  ;;  %v5055_v9 = vadd.f32 %v6718_v30, %v3469_v24 }
 0x359   : > { %4199 = vst [vmem:[%s6768_s10 + $0x28] sm:$0xff] %v4183_v26   ;;  %v3632_v6 = vadd.f32 %v3599_v45, %v3535_v38  ;;  %v3536_v43 = vadd.f32 %v6739_v42, %v5052_v14 }
 0x35a   : > { %4198 = vst [vmem:[%s6768_s10 + $0x20] sm:$0xff] %v4178_v58   ;;  %v3630_v27 = vadd.f32 %v3594_v35, %v3533_v34  ;;  %v3534_v54 = vadd.f32 %v6739_v42, %v5055_v9 }
 0x35b   : > { %v3633_v63 = vadd.f32 %v3601_v40, %v3536_v43  ;;  %v3648_v30 = vmax.f32 %v3632_v6, 0.0 }
 0x35c   : > { %v3631_v44 = vadd.f32 %v3596_v16, %v3534_v54  ;;  %v3646_v37 = vmax.f32 %v3630_v27, 0.0 }
 0x35d   : > { %v3649_v51 = vmax.f32 %v3633_v63, 0.0 }
 0x35e   : > { %v3647_v29 = vmax.f32 %v3631_v44, 0.0 }
 0x35f   : > { %v4193_v53 = vpack.c.bf16 %v3649_v51, %v3648_v30 }
 0x360   : > { %v4188_v42 = vpack.c.bf16 %v3647_v29, %v3646_v37 }
 0x361   : > { %4201 = vst [vmem:[%s6768_s10 + $0x38] sm:$0xff] %v4193_v53  }
 0x362   : > { %4200 = vst [vmem:[%s6768_s10 + $0x30] sm:$0xff] %v4188_v42  }
 0x363   : > { %5430 = shalt.err (!%p5427_p7)
}
 0x364   : > { %s5431_s28 = scalar_lea.hbm %s6813_s5, 1024  ;;  %s5435_s14 = scalar_lea.hbm %s6877_s4, 4096 }
 0x365   : > { %p5432_p9 = scmp.ne.s32.totalorder %s6813_s5, %s5431_s28  ;;  %p5436_p1 = scmp.lt.u32.totalorder %s6813_s5, %s6877_s4 }
 0x366   : > { %p5437_p4 = scmp.lt.u32.totalorder %s5435_s14, %s5431_s28  ;;  %p5439_p8 = scmp.lt.u32.totalorder %s5431_s28, %s6813_s5 }
 0x367   : > { %p5433_p11 = pnand %p5432_p9, %p6891_p10 }
 0x368   : > { %p5438_p3 = por %p5437_p4, %p5436_p1 }
 0x369   : > { %p5434_p13 = pneg %p5433_p11 }
 0x36a   : > { %p5440_p12 = por %p5439_p8, %p5438_p3 }
 0x36c   : > { %p5441_p0 = pnand %p5440_p12, %p5434_p13 }
 0x36e   : > { %5444 = shalt.err (!%p5441_p0)
}
 0x36f   : > { %s5522_s23 = smov 64   ;;  %s5523_s27 = smov 4  }
 0x370   : > { %5113 = dma.vmem_to_hbm [thread:$0]  (%p6891_p10), %s6815_s24, 1024, %s6813_s5, %s6821_s12, %s5522_s23, %s5522_s23, %s5523_s27  }
 0x371 PF: > { %p5125_p2 = scmp.ge.s32.totalorder %s5515_s22, 2  ;;  %s3762_s13 = sand.u32 1, %s5487_s15  }
 0x372   : > { %p6892_p5 = scmp.ne.s32.totalorder %s6883_s30, 0  ;;  %s3763_s6 = scalar_lea.sflag [#allocation4], %s3762_s13 }
 0x374   : > { %p5120_p6 = pnand %p5125_p2, %p6892_p5 }
 0x376   : > { %5482 = dma.done.wait (!%p5120_p6), %s3763_s6, 1024  }
 0x377   : > { %5484 = vsyncadd (!%p5120_p6), %s3763_s6, 4294966272  ;;  %s18_s22 = sadd.s32 1, %s5515_s22   ;;  %s6893_s15 = smov %s5491_s16 }
 0x378   : > { %p15_p7 = scmp.ge.s32.totalorder %s18_s22, 6   ;;  %s6894_s16 = smov %s5495_s17 }
 0x379   : > { %s6895_s17 = smov %s5628_s9  ;;  %s6896_s18 = smov %s5507_s20 }
 0x37a   : > { %s6897_s19 = smov %s5511_s21  ;;  %s6898_s20 = smov %s6901_s25 }
 0x37b   : > { %s6899_s21 = smov %s6905_s26  ;;  %17 = sbr.rel (!%p15_p7) target bundleno = 6 (0x6), region = 81 }
 0x382   :  { %3768 = vsyncpa [#allocation3], 1 }
 0x383   :  { %3770 = vsyncpa [#allocation3 + $0x1], 1 }
 0x384   :  { %3771 = vsyncpa [#allocation4], 1 }
 0x385   :  { %3773 = vsyncpa [#allocation4 + $0x1], 1 }

</bundles_post_ra>
